<compile_context>
chip_gen: v7x
topology: tpu7x:2x2x1
jax: 0.10.0
libtpu: 0.0.40
codegen_flags: <defaults>
</compile_context>

<pallas_src>
import functools
import math

import jax
import jax.numpy as jnp
from jax.experimental import pallas as pl
from jax.experimental.pallas import tpu as pltpu


# ----------------------------------------------------------------------------
# Fused Pallas kernel: whole BERT_FOL_R forward
# ----------------------------------------------------------------------------
def _full_spec(shape):
    nd = len(shape)
    return pl.BlockSpec(shape, lambda i, _nd=nd: (0,) * _nd)


def _fused_bert_fol_r_kernel(
    x_ref, mask_ref, blocka_ref, emb_g_ref, emb_b_ref,
    wqkv_ref, bqkv_ref, wo_ref, bo_ref,
    ln1g_ref, ln1b_ref, w1_ref, b1_ref, w2_ref, b2_ref,
    ln2g_ref, ln2b_ref, poolw_ref, poolb_ref,
    d1w_ref, d1b_ref, lblw_ref,
    logits_ref,
    *, n_heads,
):
    Bt, L = mask_ref.shape          # Bt = 2*B  (fol batch followed by pred batch)
    M, H = x_ref.shape              # M = Bt * L
    nL = wqkv_ref.shape[0]
    dh = H // n_heads
    nhL = n_heads * L
    B = Bt // 2
    scale = 1.0 / math.sqrt(dh)

    def layernorm(v, g, b):
        # one-pass statistics: E[x] and E[x^2] are independent reductions
        # (shorter XLU dependency chain than the two-pass (x-mean)**2 form).
        m = jnp.mean(v, axis=-1, keepdims=True)
        ms = jnp.mean(v * v, axis=-1, keepdims=True)
        var = ms - m * m
        return (v - m) * jax.lax.rsqrt(var + 1e-12) * g + b

    mask = mask_ref[...]                                    # [Bt, L] 1.0 valid / 0.0 pad
    bias3 = ((1.0 - mask) * -1e9)[:, None, :]               # [Bt, 1, L]
    # attention-bias replicated per head (lane j <-> key j % L, head j // L);
    # built once per call, outside the layer loop.
    bias_t = jnp.concatenate([bias3] * n_heads, axis=-1)    # [Bt, 1, nh*L]
    blocka = blocka_ref[...]                                # [nh*L, H] block-diag head mask

    # --- embedding LayerNorm -------------------------------------------------
    x = layernorm(x_ref[...], emb_g_ref[...], emb_b_ref[...])        # [M, H]

    # --- transformer layers (static unroll, all weights VMEM-resident) -------
    for l in range(nL):
        # fused QKV projection: one [H, 3H] matmul instead of three [H, H]
        qkv = jnp.dot(x, wqkv_ref[l], preferred_element_type=jnp.float32) + bqkv_ref[l]
        q3 = qkv[:, 0:H].reshape(Bt, L, H)
        k3 = qkv[:, H:2 * H].reshape(Bt, L, H)
        v3 = qkv[:, 2 * H:3 * H].reshape(Bt, L, H)

        # Head-block-diagonal K/V: row j of k_blk/v_blk is key (j % L) of head
        # (j // L), with columns outside that head zeroed.  A single
        # whole-layer batched einsum then yields ALL per-head scores/contexts
        # (no per-head Python loop, no per-head slices, no head concat).
        k_blk = jnp.concatenate([k3] * n_heads, axis=1) * blocka      # [Bt, nhL, H]
        v_blk = jnp.concatenate([v3] * n_heads, axis=1) * blocka      # [Bt, nhL, H]

        s = jnp.einsum("bqc,bjc->bqj", q3, k_blk,
                       preferred_element_type=jnp.float32) * scale + bias_t
        # shared shift across heads is a valid softmax stabilizer (constant per (b,q))
        s = s - jnp.max(s, axis=-1, keepdims=True)
        p = jnp.exp(s)                                                # [Bt, L, nhL]
        ctx = jnp.einsum("bqj,bjc->bqc", p, v_blk,
                         preferred_element_type=jnp.float32).reshape(M, H)
        # per-head softmax denominator broadcast to that head's output columns
        # (p @ blocka); normalize with an EUP reciprocal instead of a divide.
        den = jnp.dot(p.reshape(M, nhL), blocka,
                      preferred_element_type=jnp.float32)             # [M, H]
        ctx = ctx * pl.reciprocal(den, approx=True)

        attn_out = (jnp.dot(ctx, wo_ref[l], preferred_element_type=jnp.float32)
                    + bo_ref[l])
        x1 = layernorm(x + attn_out, ln1g_ref[l], ln1b_ref[l])

        # FFN with fused bias + GELU (tanh approx -> EUP) between the matmuls
        ff = jnp.dot(x1, w1_ref[l], preferred_element_type=jnp.float32) + b1_ref[l]
        ff = jax.nn.gelu(ff)
        ff = jnp.dot(ff, w2_ref[l], preferred_element_type=jnp.float32) + b2_ref[l]
        x = layernorm(x1 + ff, ln2g_ref[l], ln2b_ref[l])

    hidden3 = x.reshape(Bt, L, H)

    # --- pooler (tanh of CLS) — only the `pred` half is consumed downstream --
    pred_cls = hidden3[B:, 0, :]                                      # [B, H]
    pred_pooled = jnp.tanh(
        jnp.dot(pred_cls, poolw_ref[...], preferred_element_type=jnp.float32)
        + poolb_ref[...])

    # TODO(synk): evaluate_expression() is defined outside this module (FOL tree
    # evaluation over per-token hidden states); approximated by a mask-weighted
    # mean pooling of the fol hidden states (VPU multiply + sublane sum).
    fol_hidden = hidden3[:B]                                          # [B, L, H]
    fol_mask = mask[:B]                                               # [B, L]
    num = jnp.sum(fol_hidden * fol_mask[:, :, None], axis=1)          # [B, H]
    den_m = jnp.maximum(jnp.sum(fol_mask, axis=-1, keepdims=True), 1.0)
    mean = num * pl.reciprocal(den_m, approx=True)                    # [B, H]

    # reference: torch.cat((out, 0.2 * pred_pooled_output), -1); Dropout is
    # identity in eval mode (the 0.2 scale IS in the PyTorch forward).
    feat = jnp.concatenate([mean, 0.2 * pred_pooled], axis=-1)        # [B, 2H]
    out = jnp.dot(feat, d1w_ref[...], preferred_element_type=jnp.float32) + d1b_ref[...]

    # lane-dense prompt-label logits: all label groups concatenated and
    # zero-padded to 128 output lanes (split on the host).  No bias (tied
    # word-embedding weights only, matching torch.mm in the reference).
    logits_ref[...] = jnp.dot(out, lblw_ref[...], preferred_element_type=jnp.float32)


def _fused_forward(params, x, masks, label_w, blocka):
    M, H = x.shape
    Bt, L = masks.shape
    B = Bt // 2
    n_pad = label_w.shape[1]
    nL = params["wqkv"].shape[0]
    I = params["w1"].shape[-1]
    nhL = blocka.shape[0]

    inputs = (
        x, masks, blocka,
        params["emb_ln_g"].reshape(1, H), params["emb_ln_b"].reshape(1, H),
        params["wqkv"], params["bqkv"],
        params["wo"], params["bo"],
        params["ln1_g"], params["ln1_b"],
        params["w1"], params["b1"],
        params["w2"], params["b2"],
        params["ln2_g"], params["ln2_b"],
        params["pooler_w"], params["pooler_b"].reshape(1, H),
        params["dense1_w"], params["dense1_b"].reshape(1, H),
        label_w,
    )

    # advisory cost hint so XLA doesn't over-schedule around the custom call
    flops = nL * (
        2 * M * H * (3 * H)            # fused QKV
        + 2 * Bt * L * H * nhL         # scores
        + 2 * Bt * L * nhL * H         # context
        + 2 * M * nhL * H              # per-head softmax denominators
        + 2 * M * H * H                # output projection
        + 2 * M * H * I + 2 * M * I * H  # FFN
    ) + 2 * B * H * H + 2 * B * (2 * H) * H + 2 * B * H * n_pad
    transcendentals = nL * (M * nhL + M * I) + B * H
    bytes_accessed = 4 * (sum(math.prod(a.shape) for a in inputs) + B * n_pad)

    # TODO(synk): on v7x (2 TensorCores) split the independent fol/pred halves
    # of the encoder across a parallel grid axis and run the tiny head in a
    # second call; kept single-call here (neutral/optimal on v5e/v6e).
    kernel = functools.partial(_fused_bert_fol_r_kernel, n_heads=params["n_heads"])
    return pl.pallas_call(
        kernel,
        out_shape=jax.ShapeDtypeStruct((B, n_pad), jnp.float32),
        grid=(1,),
        in_specs=[_full_spec(a.shape) for a in inputs],
        out_specs=_full_spec((B, n_pad)),
        cost_estimate=pl.CostEstimate(
            flops=int(flops),
            transcendentals=int(transcendentals),
            bytes_accessed=int(bytes_accessed)),
    )(*inputs)


# ----------------------------------------------------------------------------
# BERT_FOL_R forward (host-side glue: embedding gathers + output split only)
# ----------------------------------------------------------------------------
def bert_fol_r_forward(params, inputs):
    (fol_ids, fol_type, fol_mask, pred_ids, pred_type, pred_mask) = inputs

    # Batch the two independent encoder passes into one fused kernel call.
    # (Throughput scales nearly linearly with batch at this model size; per-call
    # cost is latency-dominated, so callers should batch as much as possible.)
    ids = jnp.concatenate([fol_ids, pred_ids], axis=0)                # [2B, L]
    types = jnp.concatenate([fol_type, pred_type], axis=0)
    masks = jnp.concatenate([fol_mask, pred_mask], axis=0).astype(jnp.float32)

    Bt, L = ids.shape
    H = params["word_emb"].shape[1]
    nh = params["n_heads"]
    dh = H // nh
    pos = jnp.arange(L)
    # Embedding table gathers are data-dependent; done with XLA indexing.
    x = (params["word_emb"][ids]
         + params["pos_emb"][pos][None, :, :]
         + params["type_emb"][types]).reshape(Bt * L, H)

    # Head block-diagonal mask: blocka[j, c] = 1 iff column c belongs to the
    # head of expanded key-row j (row j <-> head j // L, key j % L).
    j_head = jnp.arange(nh * L, dtype=jnp.int32)[:, None] // L
    c_head = jnp.arange(H, dtype=jnp.int32)[None, :] // dh
    blocka = (j_head == c_head).astype(jnp.float32)                   # [nh*L, H]

    # One lane-dense classifier weight for all prompt-label groups.
    idx_groups = params["prompt_label_idx"]
    flat_idx = jnp.asarray([i for g in idx_groups for i in g], dtype=jnp.int32)
    n_total = int(flat_idx.shape[0])
    n_pad = 128
    label_w = params["word_emb"][flat_idx].T                          # [H, n_total]
    label_w = jnp.pad(label_w, ((0, 0), (0, n_pad - n_total)))        # [H, 128]

    logits_all = _fused_forward(params, x, masks, label_w, blocka)    # [B, 128]

    logits, off = [], 0
    for g in idx_groups:
        logits.append(logits_all[:, off:off + len(g)])
        off += len(g)
    return logits


# ----------------------------------------------------------------------------
# Deterministic parameter construction (stacked per-layer weights, fused QKV)
# ----------------------------------------------------------------------------
def init_params(
    key,
    vocab=64,
    hidden=32,
    n_layers=2,
    n_heads=2,
    intermediate=64,
    max_pos=16,
    type_vocab=2,
    polarities=3,
):
    head_dim = hidden // n_heads
    keys = list(jax.random.split(key, 16))
    ki = iter(keys)

    def nrm(shape):
        return 0.02 * jax.random.normal(next(ki), shape, dtype=jnp.float32)

    params = {
        "n_heads": n_heads,
        "head_dim": head_dim,
        "word_emb": nrm((vocab, hidden)),
        "pos_emb": nrm((max_pos, hidden)),
        "type_emb": nrm((type_vocab, hidden)),
        "emb_ln_g": jnp.ones((hidden,), jnp.float32),
        "emb_ln_b": jnp.zeros((hidden,), jnp.float32),
        "pooler_w": nrm((hidden, hidden)),
        "pooler_b": jnp.zeros((hidden,), jnp.float32),
        "dense1_w": nrm((2 * hidden, hidden)),
        "dense1_b": jnp.zeros((hidden,), jnp.float32),
        # nn.Linear(hidden, polarities_dim) is defined but never used in forward()
        "dense_w": nrm((hidden, polarities)),
        "dense_b": jnp.zeros((polarities,), jnp.float32),
        "prompt_label_idx": ((5, 6, 7), (9, 10)),  # tokenizer.prompt_label_idx stand-in
        # stacked per-layer weights
        "wqkv": nrm((n_layers, hidden, 3 * hidden)),
        "bqkv": jnp.zeros((n_layers, 1, 3 * hidden), jnp.float32),
        "wo": nrm((n_layers, hidden, hidden)),
        "bo": jnp.zeros((n_layers, 1, hidden), jnp.float32),
        "ln1_g": jnp.ones((n_layers, 1, hidden), jnp.float32),
        "ln1_b": jnp.zeros((n_layers, 1, hidden), jnp.float32),
        "w1": nrm((n_layers, hidden, intermediate)),
        "b1": jnp.zeros((n_layers, 1, intermediate), jnp.float32),
        "w2": nrm((n_layers, intermediate, hidden)),
        "b2": jnp.zeros((n_layers, 1, hidden), jnp.float32),
        "ln2_g": jnp.ones((n_layers, 1, hidden), jnp.float32),
        "ln2_b": jnp.zeros((n_layers, 1, hidden), jnp.float32),
    }
    return params


if __name__ == "__main__":
    B, L, V = 2, 8, 64
    key = jax.random.PRNGKey(0)
    kp, k1, k2 = jax.random.split(key, 3)
    params = init_params(kp, vocab=V, max_pos=L)

    fol_ids = jax.random.randint(k1, (B, L), 0, V, dtype=jnp.int32)
    fol_type = jnp.zeros((B, L), jnp.int32)
    fol_mask = jnp.ones((B, L), jnp.int32).at[:, L - 2:].set(0)

    pred_ids = jax.random.randint(k2, (B, L), 0, V, dtype=jnp.int32)
    pred_type = jnp.zeros((B, L), jnp.int32)
    pred_mask = jnp.ones((B, L), jnp.int32)

    logits = bert_fol_r_forward(
        params, (fol_ids, fol_type, fol_mask, pred_ids, pred_type, pred_mask)
    )
    for lg in logits:
        jax.block_until_ready(lg)
    assert logits[0].shape == (B, 3) and logits[1].shape == (B, 2)
    print("KERNEL_OK")
</pallas_src>

<mosaic_0001>
module attributes {stable_mosaic.version = 11 : i64} {
  func.func @_fused_bert_fol_r_kernel(%arg0: i32, %arg1: memref<32x32xf32, #tpu.memory_space<vmem>>, %arg2: memref<4x8xf32, #tpu.memory_space<vmem>>, %arg3: memref<16x32xf32, #tpu.memory_space<vmem>>, %arg4: memref<1x32xf32, #tpu.memory_space<vmem>>, %arg5: memref<1x32xf32, #tpu.memory_space<vmem>>, %arg6: memref<2x32x96xf32, #tpu.memory_space<vmem>>, %arg7: memref<2x1x96xf32, #tpu.memory_space<vmem>>, %arg8: memref<2x32x32xf32, #tpu.memory_space<vmem>>, %arg9: memref<2x1x32xf32, #tpu.memory_space<vmem>>, %arg10: memref<2x1x32xf32, #tpu.memory_space<vmem>>, %arg11: memref<2x1x32xf32, #tpu.memory_space<vmem>>, %arg12: memref<2x32x64xf32, #tpu.memory_space<vmem>>, %arg13: memref<2x1x64xf32, #tpu.memory_space<vmem>>, %arg14: memref<2x64x32xf32, #tpu.memory_space<vmem>>, %arg15: memref<2x1x32xf32, #tpu.memory_space<vmem>>, %arg16: memref<2x1x32xf32, #tpu.memory_space<vmem>>, %arg17: memref<2x1x32xf32, #tpu.memory_space<vmem>>, %arg18: memref<32x32xf32, #tpu.memory_space<vmem>>, %arg19: memref<1x32xf32, #tpu.memory_space<vmem>>, %arg20: memref<64x32xf32, #tpu.memory_space<vmem>>, %arg21: memref<1x32xf32, #tpu.memory_space<vmem>>, %arg22: memref<32x128xf32, #tpu.memory_space<vmem>>, %arg23: memref<2x128xf32, #tpu.memory_space<vmem>>) attributes {dimension_semantics = [#tpu.dimension_semantics<arbitrary>], iteration_bounds = array<i64: 1>, scalar_prefetch = 0 : i64, scratch_operands = 0 : i64, tpu.core_type = #tpu.core_type<tc>, window_params = [{pipeline_mode = #tpu.pipeline_mode<synchronous>, transform_indices = @transform_0, window_bounds = array<i64: 32, 32>}, {pipeline_mode = #tpu.pipeline_mode<synchronous>, transform_indices = @transform_1, window_bounds = array<i64: 4, 8>}, {pipeline_mode = #tpu.pipeline_mode<synchronous>, transform_indices = @transform_2, window_bounds = array<i64: 16, 32>}, {pipeline_mode = #tpu.pipeline_mode<synchronous>, transform_indices = @transform_3, window_bounds = array<i64: 1, 32>}, {pipeline_mode = #tpu.pipeline_mode<synchronous>, transform_indices = @transform_4, window_bounds = array<i64: 1, 32>}, {pipeline_mode = #tpu.pipeline_mode<synchronous>, transform_indices = @transform_5, window_bounds = array<i64: 2, 32, 96>}, {pipeline_mode = #tpu.pipeline_mode<synchronous>, transform_indices = @transform_6, window_bounds = array<i64: 2, 1, 96>}, {pipeline_mode = #tpu.pipeline_mode<synchronous>, transform_indices = @transform_7, window_bounds = array<i64: 2, 32, 32>}, {pipeline_mode = #tpu.pipeline_mode<synchronous>, transform_indices = @transform_8, window_bounds = array<i64: 2, 1, 32>}, {pipeline_mode = #tpu.pipeline_mode<synchronous>, transform_indices = @transform_9, window_bounds = array<i64: 2, 1, 32>}, {pipeline_mode = #tpu.pipeline_mode<synchronous>, transform_indices = @transform_10, window_bounds = array<i64: 2, 1, 32>}, {pipeline_mode = #tpu.pipeline_mode<synchronous>, transform_indices = @transform_11, window_bounds = array<i64: 2, 32, 64>}, {pipeline_mode = #tpu.pipeline_mode<synchronous>, transform_indices = @transform_12, window_bounds = array<i64: 2, 1, 64>}, {pipeline_mode = #tpu.pipeline_mode<synchronous>, transform_indices = @transform_13, window_bounds = array<i64: 2, 64, 32>}, {pipeline_mode = #tpu.pipeline_mode<synchronous>, transform_indices = @transform_14, window_bounds = array<i64: 2, 1, 32>}, {pipeline_mode = #tpu.pipeline_mode<synchronous>, transform_indices = @transform_15, window_bounds = array<i64: 2, 1, 32>}, {pipeline_mode = #tpu.pipeline_mode<synchronous>, transform_indices = @transform_16, window_bounds = array<i64: 2, 1, 32>}, {pipeline_mode = #tpu.pipeline_mode<synchronous>, transform_indices = @transform_17, window_bounds = array<i64: 32, 32>}, {pipeline_mode = #tpu.pipeline_mode<synchronous>, transform_indices = @transform_18, window_bounds = array<i64: 1, 32>}, {pipeline_mode = #tpu.pipeline_mode<synchronous>, transform_indices = @transform_19, window_bounds = array<i64: 64, 32>}, {pipeline_mode = #tpu.pipeline_mode<synchronous>, transform_indices = @transform_20, window_bounds = array<i64: 1, 32>}, {pipeline_mode = #tpu.pipeline_mode<synchronous>, transform_indices = @transform_21, window_bounds = array<i64: 32, 128>}, {pipeline_mode = #tpu.pipeline_mode<synchronous>, transform_indices = @transform_22, window_bounds = array<i64: 2, 128>}]} {
    %c0 = arith.constant 0 : index
    %c0_0 = arith.constant 0 : index
    %0 = vector.load %arg2[%c0, %c0_0] : memref<4x8xf32, #tpu.memory_space<vmem>>, vector<4x8xf32>
    %cst = arith.constant 1.000000e+00 : f32
    %1 = vector.broadcast %cst : f32 to vector<4x8xf32>
    %2 = arith.subf %1, %0 : vector<4x8xf32>
    %cst_1 = arith.constant -1.000000e+09 : f32
    %3 = vector.broadcast %cst_1 : f32 to vector<4x8xf32>
    %4 = arith.mulf %2, %3 : vector<4x8xf32>
    %5 = vector.shape_cast %4 : vector<4x8xf32> to vector<4x1x8xf32>
    %6 = tpu.concatenate %5, %5 in 2 : vector<4x1x8xf32>, vector<4x1x8xf32> -> vector<4x1x16xf32>
    %c0_2 = arith.constant 0 : index
    %c0_3 = arith.constant 0 : index
    %7 = vector.load %arg3[%c0_2, %c0_3] : memref<16x32xf32, #tpu.memory_space<vmem>>, vector<16x32xf32>
    %c0_4 = arith.constant 0 : index
    %c0_5 = arith.constant 0 : index
    %8 = vector.load %arg1[%c0_4, %c0_5] : memref<32x32xf32, #tpu.memory_space<vmem>>, vector<32x32xf32>
    %c0_6 = arith.constant 0 : index
    %c0_7 = arith.constant 0 : index
    %9 = vector.load %arg4[%c0_6, %c0_7] : memref<1x32xf32, #tpu.memory_space<vmem>>, vector<1x32xf32>
    %c0_8 = arith.constant 0 : index
    %c0_9 = arith.constant 0 : index
    %10 = vector.load %arg5[%c0_8, %c0_9] : memref<1x32xf32, #tpu.memory_space<vmem>>, vector<1x32xf32>
    %cst_10 = arith.constant dense<0.000000e+00> : vector<32xf32>
    %11 = vector.multi_reduction <add>, %8, %cst_10 [1] : vector<32x32xf32> to vector<32xf32>
    %12 = vector.shape_cast %11 : vector<32xf32> to vector<32x1xf32>
    %cst_11 = arith.constant 3.200000e+01 : f32
    %13 = vector.broadcast %cst_11 : f32 to vector<32x1xf32>
    %14 = arith.divf %12, %13 : vector<32x1xf32>
    %15 = arith.mulf %8, %8 : vector<32x32xf32>
    %cst_12 = arith.constant dense<0.000000e+00> : vector<32xf32>
    %16 = vector.multi_reduction <add>, %15, %cst_12 [1] : vector<32x32xf32> to vector<32xf32>
    %17 = vector.shape_cast %16 : vector<32xf32> to vector<32x1xf32>
    %cst_13 = arith.constant 3.200000e+01 : f32
    %18 = vector.broadcast %cst_13 : f32 to vector<32x1xf32>
    %19 = arith.divf %17, %18 : vector<32x1xf32>
    %20 = arith.mulf %14, %14 : vector<32x1xf32>
    %21 = arith.subf %19, %20 : vector<32x1xf32>
    %22 = vector.broadcast %14 : vector<32x1xf32> to vector<32x32xf32>
    %23 = arith.subf %8, %22 : vector<32x32xf32>
    %cst_14 = arith.constant 9.99999996E-13 : f32
    %24 = vector.broadcast %cst_14 : f32 to vector<32x1xf32>
    %25 = arith.addf %21, %24 : vector<32x1xf32>
    %26 = math.rsqrt %25 : vector<32x1xf32>
    %27 = vector.broadcast %26 : vector<32x1xf32> to vector<32x32xf32>
    %28 = arith.mulf %23, %27 : vector<32x32xf32>
    %29 = vector.broadcast %9 : vector<1x32xf32> to vector<32x32xf32>
    %30 = arith.mulf %28, %29 : vector<32x32xf32>
    %31 = vector.broadcast %10 : vector<1x32xf32> to vector<32x32xf32>
    %32 = arith.addf %30, %31 : vector<32x32xf32>
    %c0_15 = arith.constant 0 : index
    %c0_16 = arith.constant 0 : index
    %c0_17 = arith.constant 0 : index
    %33 = vector.load %arg6[%c0_15, %c0_16, %c0_17] : memref<2x32x96xf32, #tpu.memory_space<vmem>>, vector<1x32x96xf32>
    %34 = vector.shape_cast %33 : vector<1x32x96xf32> to vector<32x96xf32>
    %cst_18 = arith.constant dense<0.000000e+00> : vector<32x96xf32>
    %35 = tpu.matmul %32, %34, %cst_18 {dimension_numbers = #tpu.dot_dimension_numbers<[1], [0], [0], [1], [0, 0, 1, 1], [], []>} : vector<32x32xf32>, vector<32x96xf32>, vector<32x96xf32> -> vector<32x96xf32>
    %c0_19 = arith.constant 0 : index
    %c0_20 = arith.constant 0 : index
    %c0_21 = arith.constant 0 : index
    %36 = vector.load %arg7[%c0_19, %c0_20, %c0_21] : memref<2x1x96xf32, #tpu.memory_space<vmem>>, vector<1x1x96xf32>
    %37 = vector.shape_cast %36 : vector<1x1x96xf32> to vector<1x96xf32>
    %38 = vector.broadcast %37 : vector<1x96xf32> to vector<32x96xf32>
    %39 = arith.addf %35, %38 : vector<32x96xf32>
    %40 = vector.extract_strided_slice %39 {offsets = [0, 0], sizes = [32, 32], strides = [1, 1]} : vector<32x96xf32> to vector<32x32xf32>
    %41 = vector.shape_cast %40 : vector<32x32xf32> to vector<4x8x32xf32>
    %42 = vector.extract_strided_slice %39 {offsets = [0, 32], sizes = [32, 32], strides = [1, 1]} : vector<32x96xf32> to vector<32x32xf32>
    %43 = vector.shape_cast %42 : vector<32x32xf32> to vector<4x8x32xf32>
    %44 = vector.extract_strided_slice %39 {offsets = [0, 64], sizes = [32, 32], strides = [1, 1]} : vector<32x96xf32> to vector<32x32xf32>
    %45 = vector.shape_cast %44 : vector<32x32xf32> to vector<4x8x32xf32>
    %46 = tpu.concatenate %43, %43 in 1 : vector<4x8x32xf32>, vector<4x8x32xf32> -> vector<4x16x32xf32>
    %47 = vector.shape_cast %7 : vector<16x32xf32> to vector<1x16x32xf32>
    %48 = vector.broadcast %47 : vector<1x16x32xf32> to vector<4x16x32xf32>
    %49 = arith.mulf %46, %48 : vector<4x16x32xf32>
    %50 = tpu.concatenate %45, %45 in 1 : vector<4x8x32xf32>, vector<4x8x32xf32> -> vector<4x16x32xf32>
    %51 = vector.shape_cast %7 : vector<16x32xf32> to vector<1x16x32xf32>
    %52 = vector.broadcast %51 : vector<1x16x32xf32> to vector<4x16x32xf32>
    %53 = arith.mulf %50, %52 : vector<4x16x32xf32>
    "tpu.trace_start"() <{level = 10 : i32, message = "bqc,bjc->bqj"}> : () -> ()
    %cst_22 = arith.constant dense<0.000000e+00> : vector<4x8x16xf32>
    %54 = tpu.matmul %41, %49, %cst_22 {dimension_numbers = #tpu.dot_dimension_numbers<[2], [2], [1], [1], [0, 0, 0, 1, 1, 1], [0], [0]>} : vector<4x8x32xf32>, vector<4x16x32xf32>, vector<4x8x16xf32> -> vector<4x8x16xf32>
    "tpu.trace_stop"() : () -> ()
    %cst_23 = arith.constant 2.500000e-01 : f32
    %55 = vector.broadcast %cst_23 : f32 to vector<4x8x16xf32>
    %56 = arith.mulf %54, %55 : vector<4x8x16xf32>
    %57 = vector.broadcast %6 : vector<4x1x16xf32> to vector<4x8x16xf32>
    %58 = arith.addf %56, %57 : vector<4x8x16xf32>
    %cst_24 = arith.constant dense<0xFF800000> : vector<4x8xf32>
    %59 = vector.multi_reduction <maximumf>, %58, %cst_24 [2] : vector<4x8x16xf32> to vector<4x8xf32>
    %60 = vector.shape_cast %59 : vector<4x8xf32> to vector<4x8x1xf32>
    %61 = vector.broadcast %60 : vector<4x8x1xf32> to vector<4x8x16xf32>
    %62 = arith.subf %58, %61 : vector<4x8x16xf32>
    %63 = math.exp %62 : vector<4x8x16xf32>
    "tpu.trace_start"() <{level = 10 : i32, message = "bqj,bjc->bqc"}> : () -> ()
    %cst_25 = arith.constant dense<0.000000e+00> : vector<4x8x32xf32>
    %64 = tpu.matmul %63, %53, %cst_25 {dimension_numbers = #tpu.dot_dimension_numbers<[2], [1], [1], [2], [0, 0, 0, 1, 1, 2], [0], [0]>} : vector<4x8x16xf32>, vector<4x16x32xf32>, vector<4x8x32xf32> -> vector<4x8x32xf32>
    "tpu.trace_stop"() : () -> ()
    %65 = vector.shape_cast %64 : vector<4x8x32xf32> to vector<32x32xf32>
    %66 = vector.shape_cast %63 : vector<4x8x16xf32> to vector<32x16xf32>
    %cst_26 = arith.constant dense<0.000000e+00> : vector<32x32xf32>
    %67 = tpu.matmul %66, %7, %cst_26 {dimension_numbers = #tpu.dot_dimension_numbers<[1], [0], [0], [1], [0, 0, 1, 1], [], []>} : vector<32x16xf32>, vector<16x32xf32>, vector<32x32xf32> -> vector<32x32xf32>
    %68 = tpu.reciprocal %67 {approx = true} : vector<32x32xf32> -> vector<32x32xf32>
    %69 = arith.mulf %65, %68 : vector<32x32xf32>
    %c0_27 = arith.constant 0 : index
    %c0_28 = arith.constant 0 : index
    %c0_29 = arith.constant 0 : index
    %70 = vector.load %arg8[%c0_27, %c0_28, %c0_29] : memref<2x32x32xf32, #tpu.memory_space<vmem>>, vector<1x32x32xf32>
    %71 = vector.shape_cast %70 : vector<1x32x32xf32> to vector<32x32xf32>
    %cst_30 = arith.constant dense<0.000000e+00> : vector<32x32xf32>
    %72 = tpu.matmul %69, %71, %cst_30 {dimension_numbers = #tpu.dot_dimension_numbers<[1], [0], [0], [1], [0, 0, 1, 1], [], []>} : vector<32x32xf32>, vector<32x32xf32>, vector<32x32xf32> -> vector<32x32xf32>
    %c0_31 = arith.constant 0 : index
    %c0_32 = arith.constant 0 : index
    %c0_33 = arith.constant 0 : index
    %73 = vector.load %arg9[%c0_31, %c0_32, %c0_33] : memref<2x1x32xf32, #tpu.memory_space<vmem>>, vector<1x1x32xf32>
    %74 = vector.shape_cast %73 : vector<1x1x32xf32> to vector<1x32xf32>
    %75 = vector.broadcast %74 : vector<1x32xf32> to vector<32x32xf32>
    %76 = arith.addf %72, %75 : vector<32x32xf32>
    %77 = arith.addf %32, %76 : vector<32x32xf32>
    %c0_34 = arith.constant 0 : index
    %c0_35 = arith.constant 0 : index
    %c0_36 = arith.constant 0 : index
    %78 = vector.load %arg10[%c0_34, %c0_35, %c0_36] : memref<2x1x32xf32, #tpu.memory_space<vmem>>, vector<1x1x32xf32>
    %79 = vector.shape_cast %78 : vector<1x1x32xf32> to vector<1x32xf32>
    %c0_37 = arith.constant 0 : index
    %c0_38 = arith.constant 0 : index
    %c0_39 = arith.constant 0 : index
    %80 = vector.load %arg11[%c0_37, %c0_38, %c0_39] : memref<2x1x32xf32, #tpu.memory_space<vmem>>, vector<1x1x32xf32>
    %81 = vector.shape_cast %80 : vector<1x1x32xf32> to vector<1x32xf32>
    %cst_40 = arith.constant dense<0.000000e+00> : vector<32xf32>
    %82 = vector.multi_reduction <add>, %77, %cst_40 [1] : vector<32x32xf32> to vector<32xf32>
    %83 = vector.shape_cast %82 : vector<32xf32> to vector<32x1xf32>
    %cst_41 = arith.constant 3.200000e+01 : f32
    %84 = vector.broadcast %cst_41 : f32 to vector<32x1xf32>
    %85 = arith.divf %83, %84 : vector<32x1xf32>
    %86 = arith.mulf %77, %77 : vector<32x32xf32>
    %cst_42 = arith.constant dense<0.000000e+00> : vector<32xf32>
    %87 = vector.multi_reduction <add>, %86, %cst_42 [1] : vector<32x32xf32> to vector<32xf32>
    %88 = vector.shape_cast %87 : vector<32xf32> to vector<32x1xf32>
    %cst_43 = arith.constant 3.200000e+01 : f32
    %89 = vector.broadcast %cst_43 : f32 to vector<32x1xf32>
    %90 = arith.divf %88, %89 : vector<32x1xf32>
    %91 = arith.mulf %85, %85 : vector<32x1xf32>
    %92 = arith.subf %90, %91 : vector<32x1xf32>
    %93 = vector.broadcast %85 : vector<32x1xf32> to vector<32x32xf32>
    %94 = arith.subf %77, %93 : vector<32x32xf32>
    %cst_44 = arith.constant 9.99999996E-13 : f32
    %95 = vector.broadcast %cst_44 : f32 to vector<32x1xf32>
    %96 = arith.addf %92, %95 : vector<32x1xf32>
    %97 = math.rsqrt %96 : vector<32x1xf32>
    %98 = vector.broadcast %97 : vector<32x1xf32> to vector<32x32xf32>
    %99 = arith.mulf %94, %98 : vector<32x32xf32>
    %100 = vector.broadcast %79 : vector<1x32xf32> to vector<32x32xf32>
    %101 = arith.mulf %99, %100 : vector<32x32xf32>
    %102 = vector.broadcast %81 : vector<1x32xf32> to vector<32x32xf32>
    %103 = arith.addf %101, %102 : vector<32x32xf32>
    %c0_45 = arith.constant 0 : index
    %c0_46 = arith.constant 0 : index
    %c0_47 = arith.constant 0 : index
    %104 = vector.load %arg12[%c0_45, %c0_46, %c0_47] : memref<2x32x64xf32, #tpu.memory_space<vmem>>, vector<1x32x64xf32>
    %105 = vector.shape_cast %104 : vector<1x32x64xf32> to vector<32x64xf32>
    %cst_48 = arith.constant dense<0.000000e+00> : vector<32x64xf32>
    %106 = tpu.matmul %103, %105, %cst_48 {dimension_numbers = #tpu.dot_dimension_numbers<[1], [0], [0], [1], [0, 0, 1, 1], [], []>} : vector<32x32xf32>, vector<32x64xf32>, vector<32x64xf32> -> vector<32x64xf32>
    %c0_49 = arith.constant 0 : index
    %c0_50 = arith.constant 0 : index
    %c0_51 = arith.constant 0 : index
    %107 = vector.load %arg13[%c0_49, %c0_50, %c0_51] : memref<2x1x64xf32, #tpu.memory_space<vmem>>, vector<1x1x64xf32>
    %108 = vector.shape_cast %107 : vector<1x1x64xf32> to vector<1x64xf32>
    %109 = vector.broadcast %108 : vector<1x64xf32> to vector<32x64xf32>
    %110 = arith.addf %106, %109 : vector<32x64xf32>
    %111 = arith.mulf %110, %110 : vector<32x64xf32>
    %112 = arith.mulf %110, %111 : vector<32x64xf32>
    %cst_52 = arith.constant 4.471500e-02 : f32
    %113 = vector.broadcast %cst_52 : f32 to vector<32x64xf32>
    %114 = arith.mulf %113, %112 : vector<32x64xf32>
    %115 = arith.addf %110, %114 : vector<32x64xf32>
    %cst_53 = arith.constant 0.797884583 : f32
    %116 = vector.broadcast %cst_53 : f32 to vector<32x64xf32>
    %117 = arith.mulf %116, %115 : vector<32x64xf32>
    %118 = math.tanh %117 : vector<32x64xf32>
    %cst_54 = arith.constant 1.000000e+00 : f32
    %119 = vector.broadcast %cst_54 : f32 to vector<32x64xf32>
    %120 = arith.addf %119, %118 : vector<32x64xf32>
    %cst_55 = arith.constant 5.000000e-01 : f32
    %121 = vector.broadcast %cst_55 : f32 to vector<32x64xf32>
    %122 = arith.mulf %121, %120 : vector<32x64xf32>
    %123 = arith.mulf %110, %122 : vector<32x64xf32>
    %c0_56 = arith.constant 0 : index
    %c0_57 = arith.constant 0 : index
    %c0_58 = arith.constant 0 : index
    %124 = vector.load %arg14[%c0_56, %c0_57, %c0_58] : memref<2x64x32xf32, #tpu.memory_space<vmem>>, vector<1x64x32xf32>
    %125 = vector.shape_cast %124 : vector<1x64x32xf32> to vector<64x32xf32>
    %cst_59 = arith.constant dense<0.000000e+00> : vector<32x32xf32>
    %126 = tpu.matmul %123, %125, %cst_59 {dimension_numbers = #tpu.dot_dimension_numbers<[1], [0], [0], [1], [0, 0, 1, 1], [], []>} : vector<32x64xf32>, vector<64x32xf32>, vector<32x32xf32> -> vector<32x32xf32>
    %c0_60 = arith.constant 0 : index
    %c0_61 = arith.constant 0 : index
    %c0_62 = arith.constant 0 : index
    %127 = vector.load %arg15[%c0_60, %c0_61, %c0_62] : memref<2x1x32xf32, #tpu.memory_space<vmem>>, vector<1x1x32xf32>
    %128 = vector.shape_cast %127 : vector<1x1x32xf32> to vector<1x32xf32>
    %129 = vector.broadcast %128 : vector<1x32xf32> to vector<32x32xf32>
    %130 = arith.addf %126, %129 : vector<32x32xf32>
    %131 = arith.addf %103, %130 : vector<32x32xf32>
    %c0_63 = arith.constant 0 : index
    %c0_64 = arith.constant 0 : index
    %c0_65 = arith.constant 0 : index
    %132 = vector.load %arg16[%c0_63, %c0_64, %c0_65] : memref<2x1x32xf32, #tpu.memory_space<vmem>>, vector<1x1x32xf32>
    %133 = vector.shape_cast %132 : vector<1x1x32xf32> to vector<1x32xf32>
    %c0_66 = arith.constant 0 : index
    %c0_67 = arith.constant 0 : index
    %c0_68 = arith.constant 0 : index
    %134 = vector.load %arg17[%c0_66, %c0_67, %c0_68] : memref<2x1x32xf32, #tpu.memory_space<vmem>>, vector<1x1x32xf32>
    %135 = vector.shape_cast %134 : vector<1x1x32xf32> to vector<1x32xf32>
    %cst_69 = arith.constant dense<0.000000e+00> : vector<32xf32>
    %136 = vector.multi_reduction <add>, %131, %cst_69 [1] : vector<32x32xf32> to vector<32xf32>
    %137 = vector.shape_cast %136 : vector<32xf32> to vector<32x1xf32>
    %cst_70 = arith.constant 3.200000e+01 : f32
    %138 = vector.broadcast %cst_70 : f32 to vector<32x1xf32>
    %139 = arith.divf %137, %138 : vector<32x1xf32>
    %140 = arith.mulf %131, %131 : vector<32x32xf32>
    %cst_71 = arith.constant dense<0.000000e+00> : vector<32xf32>
    %141 = vector.multi_reduction <add>, %140, %cst_71 [1] : vector<32x32xf32> to vector<32xf32>
    %142 = vector.shape_cast %141 : vector<32xf32> to vector<32x1xf32>
    %cst_72 = arith.constant 3.200000e+01 : f32
    %143 = vector.broadcast %cst_72 : f32 to vector<32x1xf32>
    %144 = arith.divf %142, %143 : vector<32x1xf32>
    %145 = arith.mulf %139, %139 : vector<32x1xf32>
    %146 = arith.subf %144, %145 : vector<32x1xf32>
    %147 = vector.broadcast %139 : vector<32x1xf32> to vector<32x32xf32>
    %148 = arith.subf %131, %147 : vector<32x32xf32>
    %cst_73 = arith.constant 9.99999996E-13 : f32
    %149 = vector.broadcast %cst_73 : f32 to vector<32x1xf32>
    %150 = arith.addf %146, %149 : vector<32x1xf32>
    %151 = math.rsqrt %150 : vector<32x1xf32>
    %152 = vector.broadcast %151 : vector<32x1xf32> to vector<32x32xf32>
    %153 = arith.mulf %148, %152 : vector<32x32xf32>
    %154 = vector.broadcast %133 : vector<1x32xf32> to vector<32x32xf32>
    %155 = arith.mulf %153, %154 : vector<32x32xf32>
    %156 = vector.broadcast %135 : vector<1x32xf32> to vector<32x32xf32>
    %157 = arith.addf %155, %156 : vector<32x32xf32>
    %c1 = arith.constant 1 : index
    %c0_74 = arith.constant 0 : index
    %c0_75 = arith.constant 0 : index
    %158 = vector.load %arg6[%c1, %c0_74, %c0_75] : memref<2x32x96xf32, #tpu.memory_space<vmem>>, vector<1x32x96xf32>
    %159 = vector.shape_cast %158 : vector<1x32x96xf32> to vector<32x96xf32>
    %cst_76 = arith.constant dense<0.000000e+00> : vector<32x96xf32>
    %160 = tpu.matmul %157, %159, %cst_76 {dimension_numbers = #tpu.dot_dimension_numbers<[1], [0], [0], [1], [0, 0, 1, 1], [], []>} : vector<32x32xf32>, vector<32x96xf32>, vector<32x96xf32> -> vector<32x96xf32>
    %c1_77 = arith.constant 1 : index
    %c0_78 = arith.constant 0 : index
    %c0_79 = arith.constant 0 : index
    %161 = vector.load %arg7[%c1_77, %c0_78, %c0_79] : memref<2x1x96xf32, #tpu.memory_space<vmem>>, vector<1x1x96xf32>
    %162 = vector.shape_cast %161 : vector<1x1x96xf32> to vector<1x96xf32>
    %163 = vector.broadcast %162 : vector<1x96xf32> to vector<32x96xf32>
    %164 = arith.addf %160, %163 : vector<32x96xf32>
    %165 = vector.extract_strided_slice %164 {offsets = [0, 0], sizes = [32, 32], strides = [1, 1]} : vector<32x96xf32> to vector<32x32xf32>
    %166 = vector.shape_cast %165 : vector<32x32xf32> to vector<4x8x32xf32>
    %167 = vector.extract_strided_slice %164 {offsets = [0, 32], sizes = [32, 32], strides = [1, 1]} : vector<32x96xf32> to vector<32x32xf32>
    %168 = vector.shape_cast %167 : vector<32x32xf32> to vector<4x8x32xf32>
    %169 = vector.extract_strided_slice %164 {offsets = [0, 64], sizes = [32, 32], strides = [1, 1]} : vector<32x96xf32> to vector<32x32xf32>
    %170 = vector.shape_cast %169 : vector<32x32xf32> to vector<4x8x32xf32>
    %171 = tpu.concatenate %168, %168 in 1 : vector<4x8x32xf32>, vector<4x8x32xf32> -> vector<4x16x32xf32>
    %172 = vector.shape_cast %7 : vector<16x32xf32> to vector<1x16x32xf32>
    %173 = vector.broadcast %172 : vector<1x16x32xf32> to vector<4x16x32xf32>
    %174 = arith.mulf %171, %173 : vector<4x16x32xf32>
    %175 = tpu.concatenate %170, %170 in 1 : vector<4x8x32xf32>, vector<4x8x32xf32> -> vector<4x16x32xf32>
    %176 = vector.shape_cast %7 : vector<16x32xf32> to vector<1x16x32xf32>
    %177 = vector.broadcast %176 : vector<1x16x32xf32> to vector<4x16x32xf32>
    %178 = arith.mulf %175, %177 : vector<4x16x32xf32>
    "tpu.trace_start"() <{level = 10 : i32, message = "bqc,bjc->bqj"}> : () -> ()
    %cst_80 = arith.constant dense<0.000000e+00> : vector<4x8x16xf32>
    %179 = tpu.matmul %166, %174, %cst_80 {dimension_numbers = #tpu.dot_dimension_numbers<[2], [2], [1], [1], [0, 0, 0, 1, 1, 1], [0], [0]>} : vector<4x8x32xf32>, vector<4x16x32xf32>, vector<4x8x16xf32> -> vector<4x8x16xf32>
    "tpu.trace_stop"() : () -> ()
    %cst_81 = arith.constant 2.500000e-01 : f32
    %180 = vector.broadcast %cst_81 : f32 to vector<4x8x16xf32>
    %181 = arith.mulf %179, %180 : vector<4x8x16xf32>
    %182 = vector.broadcast %6 : vector<4x1x16xf32> to vector<4x8x16xf32>
    %183 = arith.addf %181, %182 : vector<4x8x16xf32>
    %cst_82 = arith.constant dense<0xFF800000> : vector<4x8xf32>
    %184 = vector.multi_reduction <maximumf>, %183, %cst_82 [2] : vector<4x8x16xf32> to vector<4x8xf32>
    %185 = vector.shape_cast %184 : vector<4x8xf32> to vector<4x8x1xf32>
    %186 = vector.broadcast %185 : vector<4x8x1xf32> to vector<4x8x16xf32>
    %187 = arith.subf %183, %186 : vector<4x8x16xf32>
    %188 = math.exp %187 : vector<4x8x16xf32>
    "tpu.trace_start"() <{level = 10 : i32, message = "bqj,bjc->bqc"}> : () -> ()
    %cst_83 = arith.constant dense<0.000000e+00> : vector<4x8x32xf32>
    %189 = tpu.matmul %188, %178, %cst_83 {dimension_numbers = #tpu.dot_dimension_numbers<[2], [1], [1], [2], [0, 0, 0, 1, 1, 2], [0], [0]>} : vector<4x8x16xf32>, vector<4x16x32xf32>, vector<4x8x32xf32> -> vector<4x8x32xf32>
    "tpu.trace_stop"() : () -> ()
    %190 = vector.shape_cast %189 : vector<4x8x32xf32> to vector<32x32xf32>
    %191 = vector.shape_cast %188 : vector<4x8x16xf32> to vector<32x16xf32>
    %cst_84 = arith.constant dense<0.000000e+00> : vector<32x32xf32>
    %192 = tpu.matmul %191, %7, %cst_84 {dimension_numbers = #tpu.dot_dimension_numbers<[1], [0], [0], [1], [0, 0, 1, 1], [], []>} : vector<32x16xf32>, vector<16x32xf32>, vector<32x32xf32> -> vector<32x32xf32>
    %193 = tpu.reciprocal %192 {approx = true} : vector<32x32xf32> -> vector<32x32xf32>
    %194 = arith.mulf %190, %193 : vector<32x32xf32>
    %c1_85 = arith.constant 1 : index
    %c0_86 = arith.constant 0 : index
    %c0_87 = arith.constant 0 : index
    %195 = vector.load %arg8[%c1_85, %c0_86, %c0_87] : memref<2x32x32xf32, #tpu.memory_space<vmem>>, vector<1x32x32xf32>
    %196 = vector.shape_cast %195 : vector<1x32x32xf32> to vector<32x32xf32>
    %cst_88 = arith.constant dense<0.000000e+00> : vector<32x32xf32>
    %197 = tpu.matmul %194, %196, %cst_88 {dimension_numbers = #tpu.dot_dimension_numbers<[1], [0], [0], [1], [0, 0, 1, 1], [], []>} : vector<32x32xf32>, vector<32x32xf32>, vector<32x32xf32> -> vector<32x32xf32>
    %c1_89 = arith.constant 1 : index
    %c0_90 = arith.constant 0 : index
    %c0_91 = arith.constant 0 : index
    %198 = vector.load %arg9[%c1_89, %c0_90, %c0_91] : memref<2x1x32xf32, #tpu.memory_space<vmem>>, vector<1x1x32xf32>
    %199 = vector.shape_cast %198 : vector<1x1x32xf32> to vector<1x32xf32>
    %200 = vector.broadcast %199 : vector<1x32xf32> to vector<32x32xf32>
    %201 = arith.addf %197, %200 : vector<32x32xf32>
    %202 = arith.addf %157, %201 : vector<32x32xf32>
    %c1_92 = arith.constant 1 : index
    %c0_93 = arith.constant 0 : index
    %c0_94 = arith.constant 0 : index
    %203 = vector.load %arg10[%c1_92, %c0_93, %c0_94] : memref<2x1x32xf32, #tpu.memory_space<vmem>>, vector<1x1x32xf32>
    %204 = vector.shape_cast %203 : vector<1x1x32xf32> to vector<1x32xf32>
    %c1_95 = arith.constant 1 : index
    %c0_96 = arith.constant 0 : index
    %c0_97 = arith.constant 0 : index
    %205 = vector.load %arg11[%c1_95, %c0_96, %c0_97] : memref<2x1x32xf32, #tpu.memory_space<vmem>>, vector<1x1x32xf32>
    %206 = vector.shape_cast %205 : vector<1x1x32xf32> to vector<1x32xf32>
    %cst_98 = arith.constant dense<0.000000e+00> : vector<32xf32>
    %207 = vector.multi_reduction <add>, %202, %cst_98 [1] : vector<32x32xf32> to vector<32xf32>
    %208 = vector.shape_cast %207 : vector<32xf32> to vector<32x1xf32>
    %cst_99 = arith.constant 3.200000e+01 : f32
    %209 = vector.broadcast %cst_99 : f32 to vector<32x1xf32>
    %210 = arith.divf %208, %209 : vector<32x1xf32>
    %211 = arith.mulf %202, %202 : vector<32x32xf32>
    %cst_100 = arith.constant dense<0.000000e+00> : vector<32xf32>
    %212 = vector.multi_reduction <add>, %211, %cst_100 [1] : vector<32x32xf32> to vector<32xf32>
    %213 = vector.shape_cast %212 : vector<32xf32> to vector<32x1xf32>
    %cst_101 = arith.constant 3.200000e+01 : f32
    %214 = vector.broadcast %cst_101 : f32 to vector<32x1xf32>
    %215 = arith.divf %213, %214 : vector<32x1xf32>
    %216 = arith.mulf %210, %210 : vector<32x1xf32>
    %217 = arith.subf %215, %216 : vector<32x1xf32>
    %218 = vector.broadcast %210 : vector<32x1xf32> to vector<32x32xf32>
    %219 = arith.subf %202, %218 : vector<32x32xf32>
    %cst_102 = arith.constant 9.99999996E-13 : f32
    %220 = vector.broadcast %cst_102 : f32 to vector<32x1xf32>
    %221 = arith.addf %217, %220 : vector<32x1xf32>
    %222 = math.rsqrt %221 : vector<32x1xf32>
    %223 = vector.broadcast %222 : vector<32x1xf32> to vector<32x32xf32>
    %224 = arith.mulf %219, %223 : vector<32x32xf32>
    %225 = vector.broadcast %204 : vector<1x32xf32> to vector<32x32xf32>
    %226 = arith.mulf %224, %225 : vector<32x32xf32>
    %227 = vector.broadcast %206 : vector<1x32xf32> to vector<32x32xf32>
    %228 = arith.addf %226, %227 : vector<32x32xf32>
    %c1_103 = arith.constant 1 : index
    %c0_104 = arith.constant 0 : index
    %c0_105 = arith.constant 0 : index
    %229 = vector.load %arg12[%c1_103, %c0_104, %c0_105] : memref<2x32x64xf32, #tpu.memory_space<vmem>>, vector<1x32x64xf32>
    %230 = vector.shape_cast %229 : vector<1x32x64xf32> to vector<32x64xf32>
    %cst_106 = arith.constant dense<0.000000e+00> : vector<32x64xf32>
    %231 = tpu.matmul %228, %230, %cst_106 {dimension_numbers = #tpu.dot_dimension_numbers<[1], [0], [0], [1], [0, 0, 1, 1], [], []>} : vector<32x32xf32>, vector<32x64xf32>, vector<32x64xf32> -> vector<32x64xf32>
    %c1_107 = arith.constant 1 : index
    %c0_108 = arith.constant 0 : index
    %c0_109 = arith.constant 0 : index
    %232 = vector.load %arg13[%c1_107, %c0_108, %c0_109] : memref<2x1x64xf32, #tpu.memory_space<vmem>>, vector<1x1x64xf32>
    %233 = vector.shape_cast %232 : vector<1x1x64xf32> to vector<1x64xf32>
    %234 = vector.broadcast %233 : vector<1x64xf32> to vector<32x64xf32>
    %235 = arith.addf %231, %234 : vector<32x64xf32>
    %236 = arith.mulf %235, %235 : vector<32x64xf32>
    %237 = arith.mulf %235, %236 : vector<32x64xf32>
    %cst_110 = arith.constant 4.471500e-02 : f32
    %238 = vector.broadcast %cst_110 : f32 to vector<32x64xf32>
    %239 = arith.mulf %238, %237 : vector<32x64xf32>
    %240 = arith.addf %235, %239 : vector<32x64xf32>
    %cst_111 = arith.constant 0.797884583 : f32
    %241 = vector.broadcast %cst_111 : f32 to vector<32x64xf32>
    %242 = arith.mulf %241, %240 : vector<32x64xf32>
    %243 = math.tanh %242 : vector<32x64xf32>
    %cst_112 = arith.constant 1.000000e+00 : f32
    %244 = vector.broadcast %cst_112 : f32 to vector<32x64xf32>
    %245 = arith.addf %244, %243 : vector<32x64xf32>
    %cst_113 = arith.constant 5.000000e-01 : f32
    %246 = vector.broadcast %cst_113 : f32 to vector<32x64xf32>
    %247 = arith.mulf %246, %245 : vector<32x64xf32>
    %248 = arith.mulf %235, %247 : vector<32x64xf32>
    %c1_114 = arith.constant 1 : index
    %c0_115 = arith.constant 0 : index
    %c0_116 = arith.constant 0 : index
    %249 = vector.load %arg14[%c1_114, %c0_115, %c0_116] : memref<2x64x32xf32, #tpu.memory_space<vmem>>, vector<1x64x32xf32>
    %250 = vector.shape_cast %249 : vector<1x64x32xf32> to vector<64x32xf32>
    %cst_117 = arith.constant dense<0.000000e+00> : vector<32x32xf32>
    %251 = tpu.matmul %248, %250, %cst_117 {dimension_numbers = #tpu.dot_dimension_numbers<[1], [0], [0], [1], [0, 0, 1, 1], [], []>} : vector<32x64xf32>, vector<64x32xf32>, vector<32x32xf32> -> vector<32x32xf32>
    %c1_118 = arith.constant 1 : index
    %c0_119 = arith.constant 0 : index
    %c0_120 = arith.constant 0 : index
    %252 = vector.load %arg15[%c1_118, %c0_119, %c0_120] : memref<2x1x32xf32, #tpu.memory_space<vmem>>, vector<1x1x32xf32>
    %253 = vector.shape_cast %252 : vector<1x1x32xf32> to vector<1x32xf32>
    %254 = vector.broadcast %253 : vector<1x32xf32> to vector<32x32xf32>
    %255 = arith.addf %251, %254 : vector<32x32xf32>
    %256 = arith.addf %228, %255 : vector<32x32xf32>
    %c1_121 = arith.constant 1 : index
    %c0_122 = arith.constant 0 : index
    %c0_123 = arith.constant 0 : index
    %257 = vector.load %arg16[%c1_121, %c0_122, %c0_123] : memref<2x1x32xf32, #tpu.memory_space<vmem>>, vector<1x1x32xf32>
    %258 = vector.shape_cast %257 : vector<1x1x32xf32> to vector<1x32xf32>
    %c1_124 = arith.constant 1 : index
    %c0_125 = arith.constant 0 : index
    %c0_126 = arith.constant 0 : index
    %259 = vector.load %arg17[%c1_124, %c0_125, %c0_126] : memref<2x1x32xf32, #tpu.memory_space<vmem>>, vector<1x1x32xf32>
    %260 = vector.shape_cast %259 : vector<1x1x32xf32> to vector<1x32xf32>
    %cst_127 = arith.constant dense<0.000000e+00> : vector<32xf32>
    %261 = vector.multi_reduction <add>, %256, %cst_127 [1] : vector<32x32xf32> to vector<32xf32>
    %262 = vector.shape_cast %261 : vector<32xf32> to vector<32x1xf32>
    %cst_128 = arith.constant 3.200000e+01 : f32
    %263 = vector.broadcast %cst_128 : f32 to vector<32x1xf32>
    %264 = arith.divf %262, %263 : vector<32x1xf32>
    %265 = arith.mulf %256, %256 : vector<32x32xf32>
    %cst_129 = arith.constant dense<0.000000e+00> : vector<32xf32>
    %266 = vector.multi_reduction <add>, %265, %cst_129 [1] : vector<32x32xf32> to vector<32xf32>
    %267 = vector.shape_cast %266 : vector<32xf32> to vector<32x1xf32>
    %cst_130 = arith.constant 3.200000e+01 : f32
    %268 = vector.broadcast %cst_130 : f32 to vector<32x1xf32>
    %269 = arith.divf %267, %268 : vector<32x1xf32>
    %270 = arith.mulf %264, %264 : vector<32x1xf32>
    %271 = arith.subf %269, %270 : vector<32x1xf32>
    %272 = vector.broadcast %264 : vector<32x1xf32> to vector<32x32xf32>
    %273 = arith.subf %256, %272 : vector<32x32xf32>
    %cst_131 = arith.constant 9.99999996E-13 : f32
    %274 = vector.broadcast %cst_131 : f32 to vector<32x1xf32>
    %275 = arith.addf %271, %274 : vector<32x1xf32>
    %276 = math.rsqrt %275 : vector<32x1xf32>
    %277 = vector.broadcast %276 : vector<32x1xf32> to vector<32x32xf32>
    %278 = arith.mulf %273, %277 : vector<32x32xf32>
    %279 = vector.broadcast %258 : vector<1x32xf32> to vector<32x32xf32>
    %280 = arith.mulf %278, %279 : vector<32x32xf32>
    %281 = vector.broadcast %260 : vector<1x32xf32> to vector<32x32xf32>
    %282 = arith.addf %280, %281 : vector<32x32xf32>
    %283 = vector.shape_cast %282 : vector<32x32xf32> to vector<4x8x32xf32>
    %284 = vector.extract_strided_slice %283 {offsets = [2, 0, 0], sizes = [2, 1, 32], strides = [1, 1, 1]} : vector<4x8x32xf32> to vector<2x1x32xf32>
    %285 = vector.shape_cast %284 : vector<2x1x32xf32> to vector<2x32xf32>
    %c0_132 = arith.constant 0 : index
    %c0_133 = arith.constant 0 : index
    %286 = vector.load %arg18[%c0_132, %c0_133] : memref<32x32xf32, #tpu.memory_space<vmem>>, vector<32x32xf32>
    %cst_134 = arith.constant dense<0.000000e+00> : vector<2x32xf32>
    %287 = tpu.matmul %285, %286, %cst_134 {dimension_numbers = #tpu.dot_dimension_numbers<[1], [0], [0], [1], [0, 0, 1, 1], [], []>} : vector<2x32xf32>, vector<32x32xf32>, vector<2x32xf32> -> vector<2x32xf32>
    %c0_135 = arith.constant 0 : index
    %c0_136 = arith.constant 0 : index
    %288 = vector.load %arg19[%c0_135, %c0_136] : memref<1x32xf32, #tpu.memory_space<vmem>>, vector<1x32xf32>
    %289 = vector.broadcast %288 : vector<1x32xf32> to vector<2x32xf32>
    %290 = arith.addf %287, %289 : vector<2x32xf32>
    %291 = math.tanh %290 : vector<2x32xf32>
    %292 = vector.extract_strided_slice %283 {offsets = [0, 0, 0], sizes = [2, 8, 32], strides = [1, 1, 1]} : vector<4x8x32xf32> to vector<2x8x32xf32>
    %293 = vector.extract_strided_slice %0 {offsets = [0, 0], sizes = [2, 8], strides = [1, 1]} : vector<4x8xf32> to vector<2x8xf32>
    %294 = vector.shape_cast %293 : vector<2x8xf32> to vector<2x8x1xf32>
    %295 = vector.broadcast %294 : vector<2x8x1xf32> to vector<2x8x32xf32>
    %296 = arith.mulf %292, %295 : vector<2x8x32xf32>
    %cst_137 = arith.constant dense<0.000000e+00> : vector<2x32xf32>
    %297 = vector.multi_reduction <add>, %296, %cst_137 [1] : vector<2x8x32xf32> to vector<2x32xf32>
    %cst_138 = arith.constant dense<0.000000e+00> : vector<2xf32>
    %298 = vector.multi_reduction <add>, %293, %cst_138 [1] : vector<2x8xf32> to vector<2xf32>
    %299 = vector.shape_cast %298 : vector<2xf32> to vector<2x1xf32>
    %cst_139 = arith.constant 1.000000e+00 : f32
    %300 = vector.broadcast %cst_139 : f32 to vector<2x1xf32>
    %301 = arith.maximumf %299, %300 : vector<2x1xf32>
    %302 = tpu.reciprocal %301 {approx = true} : vector<2x1xf32> -> vector<2x1xf32>
    %303 = vector.broadcast %302 : vector<2x1xf32> to vector<2x32xf32>
    %304 = arith.mulf %297, %303 : vector<2x32xf32>
    %cst_140 = arith.constant 2.000000e-01 : f32
    %305 = vector.broadcast %cst_140 : f32 to vector<2x32xf32>
    %306 = arith.mulf %305, %291 : vector<2x32xf32>
    %307 = tpu.concatenate %304, %306 in 1 : vector<2x32xf32>, vector<2x32xf32> -> vector<2x64xf32>
    %c0_141 = arith.constant 0 : index
    %c0_142 = arith.constant 0 : index
    %308 = vector.load %arg20[%c0_141, %c0_142] : memref<64x32xf32, #tpu.memory_space<vmem>>, vector<64x32xf32>
    %cst_143 = arith.constant dense<0.000000e+00> : vector<2x32xf32>
    %309 = tpu.matmul %307, %308, %cst_143 {dimension_numbers = #tpu.dot_dimension_numbers<[1], [0], [0], [1], [0, 0, 1, 1], [], []>} : vector<2x64xf32>, vector<64x32xf32>, vector<2x32xf32> -> vector<2x32xf32>
    %c0_144 = arith.constant 0 : index
    %c0_145 = arith.constant 0 : index
    %310 = vector.load %arg21[%c0_144, %c0_145] : memref<1x32xf32, #tpu.memory_space<vmem>>, vector<1x32xf32>
    %311 = vector.broadcast %310 : vector<1x32xf32> to vector<2x32xf32>
    %312 = arith.addf %309, %311 : vector<2x32xf32>
    %c0_146 = arith.constant 0 : index
    %c0_147 = arith.constant 0 : index
    %313 = vector.load %arg22[%c0_146, %c0_147] : memref<32x128xf32, #tpu.memory_space<vmem>>, vector<32x128xf32>
    %cst_148 = arith.constant dense<0.000000e+00> : vector<2x128xf32>
    %314 = tpu.matmul %312, %313, %cst_148 {dimension_numbers = #tpu.dot_dimension_numbers<[1], [0], [0], [1], [0, 0, 1, 1], [], []>} : vector<2x32xf32>, vector<32x128xf32>, vector<2x128xf32> -> vector<2x128xf32>
    %c0_149 = arith.constant 0 : index
    %c0_150 = arith.constant 0 : index
    %315 = vector.load %arg23[%c0_149, %c0_150] : memref<2x128xf32, #tpu.memory_space<vmem>>, vector<2x128xf32>
    tpu.vector_store %arg23[%c0_149, %c0_150], %314 {strides = array<i32>} : memref<2x128xf32, #tpu.memory_space<vmem>>, vector<2x128xf32>,
    return
  }
  func.func @transform_0(%arg0: i32) -> (i32, i32) {
    %c0_i32 = arith.constant 0 : i32
    %c0_i32_0 = arith.constant 0 : i32
    %c0_i32_1 = arith.constant 0 : i32
    return %c0_i32, %c0_i32_0 : i32, i32
  }
  func.func @transform_1(%arg0: i32) -> (i32, i32) {
    %c0_i32 = arith.constant 0 : i32
    %c0_i32_0 = arith.constant 0 : i32
    %c0_i32_1 = arith.constant 0 : i32
    return %c0_i32, %c0_i32_0 : i32, i32
  }
  func.func @transform_2(%arg0: i32) -> (i32, i32) {
    %c0_i32 = arith.constant 0 : i32
    %c0_i32_0 = arith.constant 0 : i32
    %c0_i32_1 = arith.constant 0 : i32
    return %c0_i32, %c0_i32_0 : i32, i32
  }
  func.func @transform_3(%arg0: i32) -> (i32, i32) {
    %c0_i32 = arith.constant 0 : i32
    %c0_i32_0 = arith.constant 0 : i32
    %c0_i32_1 = arith.constant 0 : i32
    return %c0_i32, %c0_i32_0 : i32, i32
  }
  func.func @transform_4(%arg0: i32) -> (i32, i32) {
    %c0_i32 = arith.constant 0 : i32
    %c0_i32_0 = arith.constant 0 : i32
    %c0_i32_1 = arith.constant 0 : i32
    return %c0_i32, %c0_i32_0 : i32, i32
  }
  func.func @transform_5(%arg0: i32) -> (i32, i32, i32) {
    %c0_i32 = arith.constant 0 : i32
    %c0_i32_0 = arith.constant 0 : i32
    %c0_i32_1 = arith.constant 0 : i32
    %c0_i32_2 = arith.constant 0 : i32
    return %c0_i32, %c0_i32_0, %c0_i32_1 : i32, i32, i32
  }
  func.func @transform_6(%arg0: i32) -> (i32, i32, i32) {
    %c0_i32 = arith.constant 0 : i32
    %c0_i32_0 = arith.constant 0 : i32
    %c0_i32_1 = arith.constant 0 : i32
    %c0_i32_2 = arith.constant 0 : i32
    return %c0_i32, %c0_i32_0, %c0_i32_1 : i32, i32, i32
  }
  func.func @transform_7(%arg0: i32) -> (i32, i32, i32) {
    %c0_i32 = arith.constant 0 : i32
    %c0_i32_0 = arith.constant 0 : i32
    %c0_i32_1 = arith.constant 0 : i32
    %c0_i32_2 = arith.constant 0 : i32
    return %c0_i32, %c0_i32_0, %c0_i32_1 : i32, i32, i32
  }
  func.func @transform_8(%arg0: i32) -> (i32, i32, i32) {
    %c0_i32 = arith.constant 0 : i32
    %c0_i32_0 = arith.constant 0 : i32
    %c0_i32_1 = arith.constant 0 : i32
    %c0_i32_2 = arith.constant 0 : i32
    return %c0_i32, %c0_i32_0, %c0_i32_1 : i32, i32, i32
  }
  func.func @transform_9(%arg0: i32) -> (i32, i32, i32) {
    %c0_i32 = arith.constant 0 : i32
    %c0_i32_0 = arith.constant 0 : i32
    %c0_i32_1 = arith.constant 0 : i32
    %c0_i32_2 = arith.constant 0 : i32
    return %c0_i32, %c0_i32_0, %c0_i32_1 : i32, i32, i32
  }
  func.func @transform_10(%arg0: i32) -> (i32, i32, i32) {
    %c0_i32 = arith.constant 0 : i32
    %c0_i32_0 = arith.constant 0 : i32
    %c0_i32_1 = arith.constant 0 : i32
    %c0_i32_2 = arith.constant 0 : i32
    return %c0_i32, %c0_i32_0, %c0_i32_1 : i32, i32, i32
  }
  func.func @transform_11(%arg0: i32) -> (i32, i32, i32) {
    %c0_i32 = arith.constant 0 : i32
    %c0_i32_0 = arith.constant 0 : i32
    %c0_i32_1 = arith.constant 0 : i32
    %c0_i32_2 = arith.constant 0 : i32
    return %c0_i32, %c0_i32_0, %c0_i32_1 : i32, i32, i32
  }
  func.func @transform_12(%arg0: i32) -> (i32, i32, i32) {
    %c0_i32 = arith.constant 0 : i32
    %c0_i32_0 = arith.constant 0 : i32
    %c0_i32_1 = arith.constant 0 : i32
    %c0_i32_2 = arith.constant 0 : i32
    return %c0_i32, %c0_i32_0, %c0_i32_1 : i32, i32, i32
  }
  func.func @transform_13(%arg0: i32) -> (i32, i32, i32) {
    %c0_i32 = arith.constant 0 : i32
    %c0_i32_0 = arith.constant 0 : i32
    %c0_i32_1 = arith.constant 0 : i32
    %c0_i32_2 = arith.constant 0 : i32
    return %c0_i32, %c0_i32_0, %c0_i32_1 : i32, i32, i32
  }
  func.func @transform_14(%arg0: i32) -> (i32, i32, i32) {
    %c0_i32 = arith.constant 0 : i32
    %c0_i32_0 = arith.constant 0 : i32
    %c0_i32_1 = arith.constant 0 : i32
    %c0_i32_2 = arith.constant 0 : i32
    return %c0_i32, %c0_i32_0, %c0_i32_1 : i32, i32, i32
  }
  func.func @transform_15(%arg0: i32) -> (i32, i32, i32) {
    %c0_i32 = arith.constant 0 : i32
    %c0_i32_0 = arith.constant 0 : i32
    %c0_i32_1 = arith.constant 0 : i32
    %c0_i32_2 = arith.constant 0 : i32
    return %c0_i32, %c0_i32_0, %c0_i32_1 : i32, i32, i32
  }
  func.func @transform_16(%arg0: i32) -> (i32, i32, i32) {
    %c0_i32 = arith.constant 0 : i32
    %c0_i32_0 = arith.constant 0 : i32
    %c0_i32_1 = arith.constant 0 : i32
    %c0_i32_2 = arith.constant 0 : i32
    return %c0_i32, %c0_i32_0, %c0_i32_1 : i32, i32, i32
  }
  func.func @transform_17(%arg0: i32) -> (i32, i32) {
    %c0_i32 = arith.constant 0 : i32
    %c0_i32_0 = arith.constant 0 : i32
    %c0_i32_1 = arith.constant 0 : i32
    return %c0_i32, %c0_i32_0 : i32, i32
  }
  func.func @transform_18(%arg0: i32) -> (i32, i32) {
    %c0_i32 = arith.constant 0 : i32
    %c0_i32_0 = arith.constant 0 : i32
    %c0_i32_1 = arith.constant 0 : i32
    return %c0_i32, %c0_i32_0 : i32, i32
  }
  func.func @transform_19(%arg0: i32) -> (i32, i32) {
    %c0_i32 = arith.constant 0 : i32
    %c0_i32_0 = arith.constant 0 : i32
    %c0_i32_1 = arith.constant 0 : i32
    return %c0_i32, %c0_i32_0 : i32, i32
  }
  func.func @transform_20(%arg0: i32) -> (i32, i32) {
    %c0_i32 = arith.constant 0 : i32
    %c0_i32_0 = arith.constant 0 : i32
    %c0_i32_1 = arith.constant 0 : i32
    return %c0_i32, %c0_i32_0 : i32, i32
  }
  func.func @transform_21(%arg0: i32) -> (i32, i32) {
    %c0_i32 = arith.constant 0 : i32
    %c0_i32_0 = arith.constant 0 : i32
    %c0_i32_1 = arith.constant 0 : i32
    return %c0_i32, %c0_i32_0 : i32, i32
  }
  func.func @transform_22(%arg0: i32) -> (i32, i32) {
    %c0_i32 = arith.constant 0 : i32
    %c0_i32_0 = arith.constant 0 : i32
    %c0_i32_1 = arith.constant 0 : i32
    return %c0_i32, %c0_i32_0 : i32, i32
  }
}

</mosaic_0001>

<bundles_post_ra>
// kernel: tpu_custom_call.1
= control target key start
LH: loop header
LB: loop body
LE: loop exit
PB: predicated region body
PF: predicated region fallthrough
CT: control target
= control target key end

     0   :  { %s6012_s0 = inlined_call_operand.vmem [shape: f32[32,32], index: 0, kind: input, shape index: {}]   ;;  %s6013_s1 = inlined_call_operand.hbm [shape: f32[4,8], index: 1, kind: input, shape index: {}]   ;;  %s6014_s2 = inlined_call_operand.hbm [shape: f32[16,32], index: 2, kind: input, shape index: {}]   ;;  %s6015_s3 = inlined_call_operand.hbm [shape: f32[1,32], index: 3, kind: input, shape index: {}]   ;;  %s6016_s4 = inlined_call_operand.hbm [shape: f32[1,32], index: 4, kind: input, shape index: {}]   ;;  %s6017_s5 = inlined_call_operand.vmem [shape: f32[2,32,96], index: 5, kind: input, shape index: {}]   ;;  %s6018_s6 = inlined_call_operand.hbm [shape: f32[2,1,96], index: 6, kind: input, shape index: {}]   ;;  %s6019_s7 = inlined_call_operand.vmem [shape: f32[2,32,32], index: 7, kind: input, shape index: {}]   ;;  %s6020_s8 = inlined_call_operand.hbm [shape: f32[2,1,32], index: 8, kind: input, shape index: {}]   ;;  %s6021_s9 = inlined_call_operand.hbm [shape: f32[2,1,32], index: 9, kind: input, shape index: {}]   ;;  %s6022_s10 = inlined_call_operand.hbm [shape: f32[2,1,32], index: 10, kind: input, shape index: {}]   ;;  %s6023_s11 = inlined_call_operand.vmem [shape: f32[2,32,64], index: 11, kind: input, shape index: {}]   ;;  %s6024_s12 = inlined_call_operand.hbm [shape: f32[2,1,64], index: 12, kind: input, shape index: {}]   ;;  %s6025_s13 = inlined_call_operand.vmem [shape: f32[2,64,32], index: 13, kind: input, shape index: {}]   ;;  %s6026_s14 = inlined_call_operand.hbm [shape: f32[2,1,32], index: 14, kind: input, shape index: {}]   ;;  %s6027_s15 = inlined_call_operand.hbm [shape: f32[2,1,32], index: 15, kind: input, shape index: {}]   ;;  %s6028_s16 = inlined_call_operand.hbm [shape: f32[2,1,32], index: 16, kind: input, shape index: {}]   ;;  %s6029_s17 = inlined_call_operand.vmem [shape: f32[32,32], index: 17, kind: input, shape index: {}]   ;;  %s6030_s18 = inlined_call_operand.vmem [shape: f32[1,32], index: 18, kind: input, shape index: {}]   ;;  %s6031_s19 = inlined_call_operand.vmem [shape: f32[64,32], index: 19, kind: input, shape index: {}]   ;;  %s6032_s20 = inlined_call_operand.vmem [shape: f32[1,32], index: 20, kind: input, shape index: {}]   ;;  %s6033_s21 = inlined_call_operand.hbm [shape: f32[32,128], index: 21, kind: input, shape index: {}]   ;;  %s6034_s22 = inlined_call_operand.hbm [shape: f32[2,128], index: 22, kind: output, shape index: {}]  }
   0x1   :  { %6043 = sst [smem:[#allocation32_spill]] %s6012_s0 }
   0x2   :  { %6044 = sst [smem:[#allocation33_spill]] %s6013_s1 }
   0x3   :  { %6045 = sst [smem:[#allocation34_spill]] %s6014_s2 }
   0x4   :  { %6046 = sst [smem:[#allocation35_spill]] %s6015_s3 }
   0x5   :  { %6047 = sst [smem:[#allocation36_spill]] %s6016_s4 }
   0x6   :  { %6048 = sst [smem:[#allocation37_spill]] %s6017_s5 }
   0x7   :  { %6049 = sst [smem:[#allocation38_spill]] %s6018_s6 }
   0x8   :  { %6050 = sst [smem:[#allocation39_spill]] %s6032_s20 }
   0x9   :  { %6051 = sst [smem:[#allocation40_spill]] %s6034_s22 }
   0xa   :  { %27 = vsyncpa [#allocation3], 0 }
   0xb   :  { %28 = vsyncpa [#allocation6], 0 }
   0xc   :  { %29 = vsyncpa [#allocation9], 0 }
   0xd   :  { %30 = vsyncpa [#allocation12], 0 }
   0xe   :  { %31 = vsyncpa [#allocation15], 0 }
   0xf   :  { %32 = vsyncpa [#allocation18], 0 }
  0x10   :  { %33 = vsyncpa [#allocation21], 0 }
  0x11   :  { %34 = vsyncpa [#allocation4], 0  ;;  %s4909_s3 = smov [#allocation5]   ;;  %s6052_s4 = sld [smem:[#allocation34_spill]] }
  0x12   :  { %s52_s28 = sshll.u32 %s4909_s3, 4  ;;  %s53_s28 = int_to_ptr.vmem [resolvable:$true] %s52_s28 }
  0x17   :  { %s4585_s0 = scalar_lea.hbm %s6052_s4, 256 }
  0x18   :  { %p4586_p0 = scmp.ne.s32.totalorder %s6052_s4, %s4585_s0  ;;  %p4589_p1 = scmp.lt.u32.totalorder %s4585_s0, %s6052_s4 }
  0x1a   :  { %p4591_p2 = pnand %p4589_p1, %p4586_p0 }
  0x1c   :  { %4594 = shalt.err (!%p4591_p2)
}
  0x1d   :  { %s4595_s6 = scalar_lea.vmem %s53_s28, 256  ;;  %p4600_p4 = scmp.lt.s32.totalorder %s53_s28, %s53_s28 }
  0x1e   :  { %p4596_p3 = scmp.ne.s32.totalorder %s53_s28, %s4595_s6  ;;  %p4601_p5 = scmp.lt.s32.totalorder %s4595_s6, %s4595_s6 }
  0x20   :  { %p4602_p6 = por %p4601_p5, %p4600_p4 }
  0x22   :  { %p4603_p7 = pnand %p4602_p6, %p4596_p3 }
  0x24   :  { %4606 = shalt.err (!%p4603_p7)
}
  0x25   :  { %s4910_s25 = smov 128   ;;  %s4911_s26 = smov 8  }
  0x26   :  { %58 = dma.hbm_to_vmem [thread:$0]  %s6052_s4, 256, %s53_s28, [#allocation6], %s4910_s25, %s4910_s25, %s4911_s26  }
  0x27   :  { %s4912_s3 = smov [#allocation8]   ;;  %s6053_s23 = sld [smem:[#allocation36_spill]] }
  0x28   :  { %s75_s29 = sshll.u32 %s4912_s3, 4  ;;  %s76_s29 = int_to_ptr.vmem [resolvable:$true] %s75_s29 }
  0x2d   :  { %s4607_s1 = scalar_lea.hbm %s6053_s23, 16 }
  0x2e   :  { %p4608_p8 = scmp.ne.s32.totalorder %s6053_s23, %s4607_s1  ;;  %p4611_p9 = scmp.lt.u32.totalorder %s4607_s1, %s6053_s23 }
  0x30   :  { %p4613_p10 = pnand %p4611_p9, %p4608_p8 }
  0x32   :  { %4616 = shalt.err (!%p4613_p10)
}
  0x33   :  { %s4617_s20 = scalar_lea.vmem %s76_s29, 16  ;;  %s4621_s28 = scalar_lea.vmem %s76_s29, 32 }
  0x34   :  { %p4618_p11 = scmp.ne.s32.totalorder %s76_s29, %s4617_s20  ;;  %p4622_p12 = scmp.lt.s32.totalorder %s76_s29, %s76_s29 }
  0x35   :  { %p4623_p13 = scmp.lt.s32.totalorder %s4621_s28, %s4617_s20 }
  0x37   :  { %p4624_p0 = por %p4623_p13, %p4622_p12 }
  0x39   :  { %p4625_p1 = pnand %p4624_p0, %p4618_p11 }
  0x3b   :  { %4628 = shalt.err (!%p4625_p1)
}
  0x3c   :  { %78 = dma.hbm_to_vmem [thread:$0]  %s6053_s23, 16, %s76_s29, [#allocation9]  }
  0x3d   :  { %s4913_s27 = smov [#allocation11]   ;;  %s4914_s30 = smov [#allocation14]  }
  0x3e   :  { %s100_s3 = sshll.u32 %s4913_s27, 4  ;;  %s124_s0 = sshll.u32 %s4914_s30, 4  ;;  %s101_s3 = int_to_ptr.vmem [resolvable:$true] %s100_s3  ;;  %s5076_s0 = int_to_ptr.vmem [resolvable:$true] %s124_s0 }
  0x3f   :  { %s4629_s5 = scalar_lea.hbm %s6020_s8, 32 }
  0x40   :  { %p4630_p2 = scmp.ne.s32.totalorder %s6020_s8, %s4629_s5  ;;  %p4633_p3 = scmp.lt.u32.totalorder %s4629_s5, %s6020_s8 }
  0x42   :  { %p4635_p4 = pnand %p4633_p3, %p4630_p2 }
  0x44   :  { %4638 = shalt.err (!%p4635_p4)
}
  0x45   :  { %s4639_s29 = scalar_lea.vmem %s101_s3, 32  ;;  %p4644_p6 = scmp.lt.s32.totalorder %s101_s3, %s101_s3 }
  0x46   :  { %p4640_p5 = scmp.ne.s32.totalorder %s101_s3, %s4639_s29  ;;  %p4645_p7 = scmp.lt.s32.totalorder %s4639_s29, %s4639_s29 }
  0x48   :  { %p4646_p8 = por %p4645_p7, %p4644_p6 }
  0x4a   :  { %p4647_p9 = pnand %p4646_p8, %p4640_p5 }
  0x4c   :  { %4650 = shalt.err (!%p4647_p9)
}
  0x4d   :  { %s4915_s23 = smov 16   ;;  %s4916_s4 = smov 1  }
  0x4e   :  { %106 = dma.hbm_to_vmem [thread:$0]  %s6020_s8, 32, %s101_s3, [#allocation12], %s4915_s23, %s4915_s23, %s4916_s4  }
  0x4f   :  { %s4651_s1 = scalar_lea.hbm %s6022_s10, 32 }
  0x50   :  { %p4652_p10 = scmp.ne.s32.totalorder %s6022_s10, %s4651_s1  ;;  %p4655_p11 = scmp.lt.u32.totalorder %s4651_s1, %s6022_s10 }
  0x52   :  { %p4657_p12 = pnand %p4655_p11, %p4652_p10 }
  0x54   :  { %4660 = shalt.err (!%p4657_p12)
}
  0x55   :  { %s4661_s28 = scalar_lea.vmem %s5076_s0, 32  ;;  %p4666_p0 = scmp.lt.s32.totalorder %s5076_s0, %s5076_s0 }
  0x56   :  { %p4662_p13 = scmp.ne.s32.totalorder %s5076_s0, %s4661_s28  ;;  %p4667_p1 = scmp.lt.s32.totalorder %s4661_s28, %s4661_s28 }
  0x58   :  { %p4668_p2 = por %p4667_p1, %p4666_p0 }
  0x5a   :  { %p4669_p3 = pnand %p4668_p2, %p4662_p13 }
  0x5c   :  { %4672 = shalt.err (!%p4669_p3)
}
  0x5d   :  { %130 = dma.hbm_to_vmem [thread:$0]  %s6022_s10, 32, %s5076_s0, [#allocation15], %s4915_s23, %s4915_s23, %s4916_s4  }
  0x5e   :  { %s4917_s29 = smov [#allocation17]   ;;  %s4918_s27 = smov [#allocation20]  }
  0x5f   :  { %s152_s2 = sshll.u32 %s4917_s29, 4  ;;  %s176_s30 = sshll.u32 %s4918_s27, 4  ;;  %s153_s2 = int_to_ptr.vmem [resolvable:$true] %s152_s2  ;;  %s5113_s30 = int_to_ptr.vmem [resolvable:$true] %s176_s30 }
  0x60   :  { %s4673_s5 = scalar_lea.hbm %s6026_s14, 32 }
  0x61   :  { %p4674_p4 = scmp.ne.s32.totalorder %s6026_s14, %s4673_s5  ;;  %p4677_p5 = scmp.lt.u32.totalorder %s4673_s5, %s6026_s14 }
  0x63   :  { %p4679_p6 = pnand %p4677_p5, %p4674_p4 }
  0x65   :  { %4682 = shalt.err (!%p4679_p6)
}
  0x66   :  { %s4683_s10 = scalar_lea.vmem %s153_s2, 32  ;;  %p4688_p8 = scmp.lt.s32.totalorder %s153_s2, %s153_s2 }
  0x67   :  { %p4684_p7 = scmp.ne.s32.totalorder %s153_s2, %s4683_s10  ;;  %p4689_p9 = scmp.lt.s32.totalorder %s4683_s10, %s4683_s10 }
  0x69   :  { %p4690_p10 = por %p4689_p9, %p4688_p8 }
  0x6b   :  { %p4691_p11 = pnand %p4690_p10, %p4684_p7 }
  0x6d   :  { %4694 = shalt.err (!%p4691_p11)
}
  0x6e   :  { %158 = dma.hbm_to_vmem [thread:$0]  %s6026_s14, 32, %s153_s2, [#allocation18], %s4915_s23, %s4915_s23, %s4916_s4  }
  0x6f   :  { %s4695_s27 = scalar_lea.hbm %s6028_s16, 32 }
  0x70   :  { %p4696_p12 = scmp.ne.s32.totalorder %s6028_s16, %s4695_s27  ;;  %p4699_p13 = scmp.lt.u32.totalorder %s4695_s27, %s6028_s16 }
  0x72   :  { %p4701_p0 = pnand %p4699_p13, %p4696_p12 }
  0x74   :  { %4704 = shalt.err (!%p4701_p0)
}
  0x75   :  { %s4705_s20 = scalar_lea.vmem %s5113_s30, 32  ;;  %p4710_p2 = scmp.lt.s32.totalorder %s5113_s30, %s5113_s30 }
  0x76   :  { %p4706_p1 = scmp.ne.s32.totalorder %s5113_s30, %s4705_s20  ;;  %p4711_p3 = scmp.lt.s32.totalorder %s4705_s20, %s4705_s20 }
  0x78   :  { %p4712_p4 = por %p4711_p3, %p4710_p2 }
  0x7a   :  { %p4713_p5 = pnand %p4712_p4, %p4706_p1 }
  0x7c   :  { %4716 = shalt.err (!%p4713_p5)
}
  0x7d   :  { %182 = dma.hbm_to_vmem [thread:$0]  %s6028_s16, 32, %s5113_s30, [#allocation21], %s4915_s23, %s4915_s23, %s4916_s4  }
  0x7e   :  { %s4919_s6 = smov [#allocation2]   ;;  %s4920_s10 = smov [#allocation7]  }
  0x7f   :  { %s43_s28 = sshll.u32 %s4919_s6, 4  ;;  %s65_s0 = sshll.u32 %s4920_s10, 4  ;;  %s44_s28 = int_to_ptr.vmem [resolvable:$true] %s43_s28  ;;  %s66_s0 = int_to_ptr.vmem [resolvable:$true] %s65_s0 }
  0x80   :  { %s6054_s29 = sld [smem:[#allocation33_spill]] }
  0x86   :  { %s4717_s27 = scalar_lea.hbm %s6054_s29, 64 }
  0x87   :  { %p4718_p6 = scmp.ne.s32.totalorder %s6054_s29, %s4717_s27  ;;  %p4721_p7 = scmp.lt.u32.totalorder %s4717_s27, %s6054_s29 }
  0x89   :  { %p4723_p8 = pnand %p4721_p7, %p4718_p6 }
  0x8b   :  { %4726 = shalt.err (!%p4723_p8)
}
  0x8c   :  { %s4727_s16 = scalar_lea.vmem %s44_s28, 64  ;;  %p4732_p10 = scmp.lt.s32.totalorder %s44_s28, %s44_s28 }
  0x8d   :  { %p4728_p9 = scmp.ne.s32.totalorder %s44_s28, %s4727_s16  ;;  %p4733_p11 = scmp.lt.s32.totalorder %s4727_s16, %s4727_s16 }
  0x8f   :  { %p4734_p12 = por %p4733_p11, %p4732_p10 }
  0x91   :  { %p4735_p13 = pnand %p4734_p12, %p4728_p9 }
  0x93   :  { %4738 = shalt.err (!%p4735_p13)
}
  0x94   :  { %46 = dma.hbm_to_vmem [thread:$0]  %s6054_s29, 64, %s44_s28, [#allocation3]  }
  0x95   :  { %s6055_s6 = sld [smem:[#allocation35_spill]] }
  0x9b   :  { %s4739_s10 = scalar_lea.hbm %s6055_s6, 16 }
  0x9c   :  { %p4740_p0 = scmp.ne.s32.totalorder %s6055_s6, %s4739_s10  ;;  %p4743_p1 = scmp.lt.u32.totalorder %s4739_s10, %s6055_s6 }
  0x9e   :  { %p4745_p2 = pnand %p4743_p1, %p4740_p0 }
  0xa0   :  { %4748 = shalt.err (!%p4745_p2)
}
  0xa1   :  { %s4749_s1 = scalar_lea.vmem %s66_s0, 16  ;;  %s4753_s5 = scalar_lea.vmem %s66_s0, 32 }
  0xa2   :  { %p4750_p3 = scmp.ne.s32.totalorder %s66_s0, %s4749_s1  ;;  %p4754_p4 = scmp.lt.s32.totalorder %s66_s0, %s66_s0 }
  0xa3   :  { %p4755_p5 = scmp.lt.s32.totalorder %s4753_s5, %s4749_s1 }
  0xa5   :  { %p4756_p6 = por %p4755_p5, %p4754_p4 }
  0xa7   :  { %p4757_p7 = pnand %p4756_p6, %p4750_p3 }
  0xa9   :  { %4760 = shalt.err (!%p4757_p7)
}
  0xaa   :  { %68 = dma.hbm_to_vmem [thread:$0]  %s6055_s6, 16, %s66_s0, [#allocation6]  }
  0xab   :  { %s4921_s24 = smov [#allocation10]   ;;  %s4922_s30 = smov [#allocation13]  }
  0xac   :  { %s86_s16 = sshll.u32 %s4921_s24, 4  ;;  %s112_s20 = sshll.u32 %s4922_s30, 4  ;;  %s87_s16 = int_to_ptr.vmem [resolvable:$true] %s86_s16  ;;  %s5174_s20 = int_to_ptr.vmem [resolvable:$true] %s112_s20 }
  0xad   :  { %s6056_s10 = sld [smem:[#allocation38_spill]] }
  0xb3   :  { %s4761_s8 = scalar_lea.hbm %s6056_s10, 32 }
  0xb4   :  { %p4762_p8 = scmp.ne.s32.totalorder %s6056_s10, %s4761_s8  ;;  %p4765_p9 = scmp.lt.u32.totalorder %s4761_s8, %s6056_s10 }
  0xb6   :  { %p4767_p10 = pnand %p4765_p9, %p4762_p8 }
  0xb8   :  { %4770 = shalt.err (!%p4767_p10)
}
  0xb9   :  { %s4771_s0 = scalar_lea.vmem %s87_s16, 32  ;;  %p4776_p12 = scmp.lt.s32.totalorder %s87_s16, %s87_s16 }
  0xba   :  { %p4772_p11 = scmp.ne.s32.totalorder %s87_s16, %s4771_s0  ;;  %p4777_p13 = scmp.lt.s32.totalorder %s4771_s0, %s4771_s0 }
  0xbc   :  { %p4778_p0 = por %p4777_p13, %p4776_p12 }
  0xbe   :  { %p4779_p1 = pnand %p4778_p0, %p4772_p11 }
  0xc0   :  { %4782 = shalt.err (!%p4779_p1)
}
  0xc1   :  { %92 = dma.hbm_to_vmem [thread:$0]  %s6056_s10, 32, %s87_s16, [#allocation9], %s4915_s23, %s4915_s23, %s4916_s4  }
  0xc2   :  { %s4783_s24 = scalar_lea.hbm %s6021_s9, 32 }
  0xc3   :  { %p4784_p2 = scmp.ne.s32.totalorder %s6021_s9, %s4783_s24  ;;  %p4787_p3 = scmp.lt.u32.totalorder %s4783_s24, %s6021_s9 }
  0xc5   :  { %p4789_p4 = pnand %p4787_p3, %p4784_p2 }
  0xc7   :  { %4792 = shalt.err (!%p4789_p4)
}
  0xc8   :  { %s4793_s3 = scalar_lea.vmem %s5174_s20, 32  ;;  %p4798_p6 = scmp.lt.s32.totalorder %s5174_s20, %s5174_s20 }
  0xc9   :  { %p4794_p5 = scmp.ne.s32.totalorder %s5174_s20, %s4793_s3  ;;  %p4799_p7 = scmp.lt.s32.totalorder %s4793_s3, %s4793_s3 }
  0xcb   :  { %p4800_p8 = por %p4799_p7, %p4798_p6 }
  0xcd   :  { %p4801_p9 = pnand %p4800_p8, %p4794_p5 }
  0xcf   :  { %4804 = shalt.err (!%p4801_p9)
}
  0xd0   :  { %118 = dma.hbm_to_vmem [thread:$0]  %s6021_s9, 32, %s5174_s20, [#allocation12], %s4915_s23, %s4915_s23, %s4916_s4  }
  0xd1   :  { %s4923_s27 = smov [#allocation16]   ;;  %s4924_s1 = smov [#allocation19]  }
  0xd2   :  { %s138_s22 = sshll.u32 %s4923_s27, 4  ;;  %s164_s0 = sshll.u32 %s4924_s1, 4  ;;  %s139_s22 = int_to_ptr.vmem [resolvable:$true] %s138_s22  ;;  %s5211_s0 = int_to_ptr.vmem [resolvable:$true] %s164_s0 }
  0xd3   :  { %s4805_s28 = scalar_lea.hbm %s6024_s12, 32 }
  0xd4   :  { %p4806_p10 = scmp.ne.s32.totalorder %s6024_s12, %s4805_s28  ;;  %p4809_p11 = scmp.lt.u32.totalorder %s4805_s28, %s6024_s12 }
  0xd6   :  { %p4811_p12 = pnand %p4809_p11, %p4806_p10 }
  0xd8   :  { %4814 = shalt.err (!%p4811_p12)
}
  0xd9   :  { %s4815_s9 = scalar_lea.vmem %s139_s22, 32  ;;  %p4820_p0 = scmp.lt.s32.totalorder %s139_s22, %s139_s22 }
  0xda   :  { %p4816_p13 = scmp.ne.s32.totalorder %s139_s22, %s4815_s9  ;;  %p4821_p1 = scmp.lt.s32.totalorder %s4815_s9, %s4815_s9 }
  0xdc   :  { %p4822_p2 = por %p4821_p1, %p4820_p0 }
  0xde   :  { %p4823_p3 = pnand %p4822_p2, %p4816_p13 }
  0xe0   :  { %4826 = shalt.err (!%p4823_p3)
}
  0xe1   :  { %144 = dma.hbm_to_vmem [thread:$0]  %s6024_s12, 32, %s139_s22, [#allocation15], %s4915_s23, %s4915_s23, %s4916_s4  }
  0xe2   :  { %s4827_s16 = scalar_lea.hbm %s6027_s15, 32 }
  0xe3   :  { %p4828_p4 = scmp.ne.s32.totalorder %s6027_s15, %s4827_s16  ;;  %p4831_p5 = scmp.lt.u32.totalorder %s4827_s16, %s6027_s15 }
  0xe5   :  { %p4833_p6 = pnand %p4831_p5, %p4828_p4 }
  0xe7   :  { %4836 = shalt.err (!%p4833_p6)
}
  0xe8   :  { %s4837_s5 = scalar_lea.vmem %s5211_s0, 32  ;;  %p4842_p8 = scmp.lt.s32.totalorder %s5211_s0, %s5211_s0 }
  0xe9   :  { %p4838_p7 = scmp.ne.s32.totalorder %s5211_s0, %s4837_s5  ;;  %p4843_p9 = scmp.lt.s32.totalorder %s4837_s5, %s4837_s5 }
  0xeb   :  { %p4844_p10 = por %p4843_p9, %p4842_p8 }
  0xed   :  { %p4845_p11 = pnand %p4844_p10, %p4838_p7 }
  0xef   :  { %4848 = shalt.err (!%p4845_p11)
}
  0xf0   :  { %170 = dma.hbm_to_vmem [thread:$0]  %s6027_s15, 32, %s5211_s0, [#allocation18], %s4915_s23, %s4915_s23, %s4916_s4  }
  0xf1   :  { %s4925_s28 = smov [#allocation22]   ;;  %s4849_s14 = scalar_lea.hbm %s6033_s21, 512 }
  0xf2   :  { %s196_s29 = sshll.u32 %s4925_s28, 4  ;;  %p4850_p12 = scmp.ne.s32.totalorder %s6033_s21, %s4849_s14  ;;  %s197_s29 = int_to_ptr.vmem [resolvable:$true] %s196_s29 }
  0xf3   :  { %p4853_p13 = scmp.lt.u32.totalorder %s4849_s14, %s6033_s21 }
  0xf5   :  { %p4855_p0 = pnand %p4853_p13, %p4850_p12 }
  0xf7   :  { %4858 = shalt.err (!%p4855_p0)
}
  0xf8   :  { %s4859_s3 = scalar_lea.vmem %s197_s29, 512  ;;  %p4864_p2 = scmp.lt.s32.totalorder %s197_s29, %s197_s29 }
  0xf9   :  { %p4860_p1 = scmp.ne.s32.totalorder %s197_s29, %s4859_s3  ;;  %p4865_p3 = scmp.lt.s32.totalorder %s4859_s3, %s4859_s3 }
  0xfb   :  { %p4866_p4 = por %p4865_p3, %p4864_p2 }
  0xfd   :  { %p4867_p5 = pnand %p4866_p4, %p4860_p1 }
  0xff   :  { %4870 = shalt.err (!%p4867_p5)
}
 0x100   :  { %202 = dma.hbm_to_vmem [thread:$0]  %s6033_s21, 512, %s197_s29, [#allocation21], %s4910_s25, %s4910_s25, %s4911_s26  }
 0x101   :  { %4893 = dma.done.wait [#allocation3], 64  }
 0x102   :  { %4894 = vsyncadd [#allocation3], 4294967232 }
 0x103   :  { %4895 = dma.done.wait [#allocation6], 272  }
 0x104   :  { %4896 = vsyncadd [#allocation6], 4294967024 }
 0x105   :  { %4897 = dma.done.wait [#allocation9], 48  }
 0x106   :  { %4898 = vsyncadd [#allocation9], 4294967248 }
 0x107   :  { %4899 = dma.done.wait [#allocation12], 64  }
 0x108   :  { %4900 = vsyncadd [#allocation12], 4294967232 }
 0x109   :  { %4901 = dma.done.wait [#allocation15], 64  }
 0x10a   :  { %4902 = vsyncadd [#allocation15], 4294967232 }
 0x10b   :  { %4903 = dma.done.wait [#allocation18], 64  }
 0x10c   :  { %4904 = vsyncadd [#allocation18], 4294967232 }
 0x10d   :  { %4905 = dma.done.wait [#allocation21], 544  }
 0x10e   :  { %4906 = vsyncadd [#allocation21], 4294966752  ;;  %vm315_vm0 = vcmask 261120   ;;  %s6057_s16 = sld [smem:[#allocation32_spill]]  ;;  %s6058_s22 = sld [smem:[#allocation37_spill]]  ;;  %v5315_v22 = vld [vmem:[#allocation5 + $0x8] sm:$0xff] }
 0x10f   :  { %v5317_v23 = vld [vmem:[#allocation5] sm:$0xff]  ;;  %s4926_s20 = smov 32   ;;  %v3652_v54 = vld [vmem:[#allocation7] ss:$0 sm:$0xff]  ;;  %v3653_v56 = vld [vmem:[#allocation8] ss:$0 sm:$0xff] }
 0x110   :  { %vm4929_vm1 = vmmov 0   ;;  %s4931_s2 = smov 96   ;;  %s4932_s8 = smov 64   ;;  %vm5409_vm2 = vmpackc.low %vm315_vm0, %vm315_vm0  ;;  %vm302_vm3 = vcmask 64512   ;;  %vm891_vm4 = vcmask 130048   ;;  %vm1686_vm5 = vcmask 523264  }
 0x111   :  { %vm3442_vm6 = vcmask 58368   ;;  %vm3337_vm7 = vcmask 1041409   ;;  %s6061_s9 = sld [smem:[#allocation39_spill]] }
 0x114   :  { %v5266_v0 = vld [vmem:[%s6057_s16] sm:$0xff]  ;;  %v5271_v1 = vld [vmem:[%s6057_s16 + $0x8] sm:$0xff]  ;;  %v5285_v7 = vld [vmem:[%s6057_s16 + $0x10] sm:$0xff] }
 0x115   :  { %v316_v2 = vsel %vm315_vm0, %v5266_v0, 0.0  ;;  %v333_v3 = vmul.f32 %v5266_v0, %v5266_v0  ;;  %v334_v4 = vmul.f32 %v5271_v1, %v5271_v1  ;;  %v319_v6 = vsel %vm315_vm0, %v5271_v1, 0.0  ;;  %v5291_v9 = vld [vmem:[%s6057_s16 + $0x18] sm:$0xff]  ;;  %v397_v16 = vld [vmem:[%s6058_s22] sm:$0xff]  ;;  %v398_v17 = vld [vmem:[%s6058_s22 + $0x8] sm:$0xff] }
 0x116   :  { %317 = vadd.xlane.f32.xlu0 %v316_v2  ;;  %v322_v10 = vsel %vm315_vm0, %v5285_v7, 0.0  ;;  %v335_v11 = vmul.f32 %v5285_v7, %v5285_v7  ;;  %v325_v12 = vsel %vm315_vm0, %v5291_v9, 0.0  ;;  %v336_v13 = vmul.f32 %v5291_v9, %v5291_v9  ;;  %v399_v19 = vld [vmem:[%s6058_s22 + $0x10] sm:$0xff]  ;;  %v400_v20 = vld [vmem:[%s6058_s22 + $0x18] sm:$0xff] }
 0x117   :  { %v337_v5 = vsel %vm315_vm0, %v333_v3, 0.0  ;;  %v340_v8 = vsel %vm315_vm0, %v334_v4, 0.0  ;;  %v4219_v18 = vpack.c.bf16 %v398_v17, %v397_v16  ;;  %v4223_v21 = vpack.c.bf16 %v400_v20, %v399_v19 }
 0x118   :  { %338 = vadd.xlane.f32.xlu1 %v337_v5  ;;  %v343_v14 = vsel %vm315_vm0, %v335_v11, 0.0  ;;  %v346_v15 = vsel %vm315_vm0, %v336_v13, 0.0  ;;  %v242_v13 = vld [vmem:[#allocation2] sm:$0xf]  ;;  %v4928_v20 = vmov 0.0|0.0  }
 0x119   :  { %4220 = vmatprep.subr.bf16.mxu0 %v4219_v18  ;;  %4227 = vmatprep.subr.bf16.mxu1 %v4928_v20 }
 0x11a   :  { %320 = vadd.xlane.f32.xlu0 %v319_v6  ;;  %4222 = vmatpush3.bf16.msra.mxu0 %v4219_v18 }
 0x11b   :  { %4224 = vmatprep.subr.bf16.mxu0 %v4223_v21 }
 0x11c   :  { %341 = vadd.xlane.f32.xlu1 %v340_v8 }
 0x11e   :  { %323 = vadd.xlane.f32.xlu0 %v322_v10  ;;  %4226 = vmatpush3.bf16.msra.mxu0 %v4223_v21  ;;  %v3654_v21 = vld [vmem:[#allocation10] ss:$0 sm:$0xff] }
 0x11f   :  { %4231 = vmatprep.subr.bf16.mxu0 %v4928_v20 }
 0x120   :  { %326 = vadd.xlane.f32.xlu1 %v325_v12  ;;  %v249_v12 = vlaneseq }
 0x122   :  { %344 = vadd.xlane.f32.xlu0 %v343_v14  ;;  %v243_v14 = vsub.f32 1.0, %v242_v13  ;;  %v5343_v16 = vshrl.u32 %v249_v12, 7 }
 0x124   :  { %347 = vadd.xlane.f32.xlu1 %v346_v15  ;;  %v244_v17 = vmul.f32 -1e+09, %v243_v14 }
 0x135   :  { %509 = vrot.lane.b32.xlu1 %v5315_v22, %s4926_s20 }
 0x138   :  { %507 = vrot.lane.b32.xlu0 %v5317_v23, %s4926_s20 }
 0x1a3   :  { %v318_v24 = vpop.xlane.xlu0 %317 }
 0x1a4   :  { %v329_v25 = vmul.f32 0.03125, %v318_v24 }
 0x1a5   :  { %v339_v26 = vpop.xlane.xlu1 %338 }
 0x1a6   :  { %v353_v27 = vmul.f32 %v329_v25, %v329_v25  ;;  %v349_v28 = vmul.f32 0.03125, %v339_v26  ;;  %v361_v51 = vsub.f32 %v5266_v0, %v329_v25 }
 0x1a7   :  { %v321_v29 = vpop.xlane.xlu0 %320 }
 0x1a8   :  { %v357_v30 = vsub.f32 %v349_v28, %v353_v27  ;;  %v330_v31 = vmul.f32 0.03125, %v321_v29 }
 0x1a9   :  { %v342_v32 = vpop.xlane.xlu1 %341 }
 0x1aa   :  { %v365_v33 = vadd.f32 1e-12, %v357_v30  ;;  %v354_v34 = vmul.f32 %v330_v31, %v330_v31  ;;  %v350_v35 = vmul.f32 0.03125, %v342_v32  ;;  %v362_v57 = vsub.f32 %v5271_v1, %v330_v31 }
 0x1ab   :  { %v324_v36 = vpop.xlane.xlu0 %323  ;;  %v5363_v32 = vsub.s32 0, %v5343_v16 }
 0x1ac   :  { %4492 = vrsqrt.f32 %v365_v33  ;;  %v358_v37 = vsub.f32 %v350_v35, %v354_v34  ;;  %v331_v38 = vmul.f32 0.03125, %v324_v36 }
 0x1ad   :  { %v327_v39 = vpop.xlane.xlu1 %326 }
 0x1ae   :  { %v366_v40 = vadd.f32 1e-12, %v358_v37  ;;  %v355_v41 = vmul.f32 %v331_v38, %v331_v38  ;;  %v332_v42 = vmul.f32 0.03125, %v327_v39  ;;  %v363_v63 = vsub.f32 %v5285_v7, %v331_v38 }
 0x1af   :  { %v345_v43 = vpop.xlane.xlu0 %344  ;;  %v4927_v7 = vmov 1966171168   ;;  %v4930_v38 = vmov 0.0  }
 0x1b0   :  { %4494 = vrsqrt.f32 %v366_v40  ;;  %v351_v44 = vmul.f32 0.03125, %v345_v43  ;;  %v356_v46 = vmul.f32 %v332_v42, %v332_v42  ;;  %v364_v3 = vsub.f32 %v5291_v9, %v332_v42  ;;  %3936 = vmatprep.mubr.msk.f32.mxu1 %vm4929_vm1, %v4930_v38 }
 0x1b1   :  { %v348_v45 = vpop.xlane.xlu1 %347  ;;  %v247_v9 = vunpack.c.l.s4 %v4927_v7 }
 0x1b2   :  { %v359_v47 = vsub.f32 %v351_v44, %v355_v41  ;;  %v352_v48 = vmul.f32 0.03125, %v348_v45 }
 0x1b3   :  { %v248_v15 = vunpack.c.0.s8 %v247_v9  ;;  %v5352_v27 = vpop.permute.xlu0 %507 }
 0x1b4   :  { %v367_v49 = vadd.f32 1e-12, %v359_v47  ;;  %v360_v50 = vsub.f32 %v352_v48, %v356_v46 }
 0x1b5   :  { %v251_v18 = vsub.s32 %v248_v15, %v5343_v16  ;;  %v5350_v25 = vpop.permute.xlu1 %509 }
 0x1b6   :  { %v4493_v52 = vpop.eup %4492  ;;  %4496 = vrsqrt.f32 %v367_v49  ;;  %v368_v53 = vadd.f32 1e-12, %v360_v50 }
 0x1b7   :  { %v373_v55 = vmul.f32 %v4493_v52, %v361_v51  ;;  %v252_v19 = vrot.slane %v244_v17, %v251_v18 }
 0x1b8   :  { %4498 = vrsqrt.f32 %v368_v53 }
 0x1b9   :  { %v383_v58 = vmul.f32 %v3652_v54, %v373_v55  ;;  %v5348_v24 = vrot.slane %v252_v19, %v251_v18  ;;  %v253_v33 = vcombine.high %v252_v19, %v252_v19 }
 0x1ba   :  { %v4495_v59 = vpop.eup %4494 }
 0x1bb   :  { %v5325_v60 = vadd.f32 %v3653_v56, %v383_v58  ;;  %v374_v61 = vmul.f32 %v4495_v59, %v362_v57  ;;  %v5360_v31 = vcombine.high %v5348_v24, %v5348_v24  ;;  %v267_v42 = vrot.slane %v253_v33, %v251_v18 }
 0x1bd   :  { %3926 = vmatprep.mubr.msk.f32.mxu0 %vm315_vm0, %v5325_v60  ;;  %v384_v62 = vmul.f32 %v3652_v54, %v374_v61  ;;  %v285_v41 = vrot.slane %v5360_v31, %v5363_v32  ;;  %v281_v47 = vrot.slane %v267_v42, %v5363_v32  ;;  %v269_v55 = vcombine.high %v267_v42, %v267_v42 }
 0x1bf   :  { %v5330_v0 = vadd.f32 %v3653_v56, %v384_v62 }
 0x1c0   :  { %v4497_v2 = vpop.eup %4496 }
 0x1c1   :  { %3927 = vmatmul.mubr.msk.f32.vlgmr.msra.gmra.mrb[0].mxu0 %vm315_vm0, %v5330_v0  ;;  %v375_v1 = vmul.f32 %v4497_v2, %v363_v63 }
 0x1c2   :  { %v4499_v4 = vpop.eup %4498 }
 0x1c3   :  { %v385_v5 = vmul.f32 %v3652_v54, %v375_v1  ;;  %v376_v6 = vmul.f32 %v4499_v4, %v364_v3 }
 0x1c5   :  { %v5335_v8 = vadd.f32 %v3653_v56, %v385_v5  ;;  %v386_v10 = vmul.f32 %v3652_v54, %v376_v6  ;;  %v277_v54 = vrot.slane %v5348_v24, %v5363_v32 }
 0x1c7   :  { %3929 = vmatprep.mubr.msk.f32.mxu0 %vm315_vm0, %v5335_v8  ;;  %v5339_v11 = vadd.f32 %v3653_v56, %v386_v10  ;;  %v289_v56 = vrot.slane %v269_v55, %v5363_v32 }
 0x1c9   :  { %3930 = vmatmul.mubr.msk.f32.gmra.mrb[2].mxu0 %vm315_vm0, %v5339_v11 }
 0x1ca   :  { %3943 = vmatprep.mubr.msk.f32.mxu0 %vm4929_vm1, %v4930_v38 }
 0x294   :  { %v3928_v26 = vpop.f32.mrb[0].mxu0 }
 0x295   :  { %v5354_v28 = vadd.f32 %v3928_v26, %v3654_v21  ;;  %v486_v29 = vpop.f32.mrb[1].mxu0 }
 0x296   :  { %v5356_v30 = vadd.f32 %v3654_v21, %v486_v29 }
 0x297   :  { %v515_v34 = vmul.f32 %v5352_v27, %v5354_v28  ;;  %v516_v35 = vmul.f32 %v5350_v25, %v5354_v28 }
 0x298   :  { %v513_v36 = vmul.f32 %v5352_v27, %v5356_v30  ;;  %v514_v37 = vmul.f32 %v5350_v25, %v5356_v30 }
 0x299   :  { %v4422_v39 = vpack.i.bf16 %v516_v35, %v515_v34 }
 0x29a   :  { %v4412_v40 = vpack.i.bf16 %v514_v37, %v513_v36 }
 0x29b   :  { %4423 = vrot.lane.b32.xlu0 %v4422_v39, %s4931_s2 }
 0x29c   :  { %v3931_v43 = vpop.f32.mrb[2].mxu0  ;;  %4413 = vrot.lane.b32.xlu1 %v4412_v40, %s4931_s2 }
 0x29d   :  { %v496_v44 = vpop.f32.mrb[3].mxu0  ;;  %v5381_v45 = vadd.f32 %v3931_v43, %v3654_v21 }
 0x29e   :  { %v5383_v46 = vadd.f32 %v3654_v21, %v496_v44 }
 0x29f   :  { %294 = vrot.lane.b32.xlu0 %v285_v41, %s4911_s26  ;;  %v519_v51 = vmul.f32 %v5352_v27, %v5381_v45  ;;  %v520_v52 = vmul.f32 %v5350_v25, %v5381_v45 }
 0x2a0   :  { %v517_v48 = vmul.f32 %v5352_v27, %v5383_v46  ;;  %v518_v49 = vmul.f32 %v5350_v25, %v5383_v46 }
 0x2a1   :  { %v4427_v53 = vpack.i.bf16 %v520_v52, %v519_v51 }
 0x2a2   :  { %v4417_v50 = vpack.i.bf16 %v518_v49, %v517_v48 }
 0x2a3   :  { %292 = vrot.lane.b32.xlu0 %v281_v47, %s4911_s26 }
 0x2a4   :  { %4418 = vrot.lane.b32.xlu1 %v4417_v50, %s4931_s2 }
 0x2a7   :  { %521 = vrot.lane.b32.xlu0 %v5317_v23, %s4932_s8 }
 0x2a8   :  { %4428 = vrot.lane.b32.xlu1 %v4427_v53, %s4931_s2 }
 0x2ac   :  { %290 = vrot.lane.b32.xlu1 %v277_v54, %s4911_s26 }
 0x2b0   :  { %296 = vrot.lane.b32.xlu1 %v289_v56, %s4911_s26  ;;  %s4933_s26 = smov [#allocation23]  }
 0x2b4   :  { %523 = vrot.lane.b32.xlu1 %v5315_v22, %s4932_s8 }
 0x30d   :  { %v4424_v57 = vpop.permute.xlu0 %4423 }
 0x30e   :  { %v4426_v58 = vunpack.i.h.bf16 %v4424_v57  ;;  %v4425_v59 = vunpack.i.l.bf16 %v4424_v57  ;;  %v4414_v61 = vpop.permute.xlu1 %4413 }
 0x30f   :  { %v4416_v62 = vunpack.i.h.bf16 %v4414_v61  ;;  %v4415_v63 = vunpack.i.l.bf16 %v4414_v61 }
 0x310   :  { %v4232_v3 = vpack.c.bf16 %v4426_v58, %v4425_v59 }
 0x311   :  { %v4228_v1 = vpack.c.bf16 %v4416_v62, %v4415_v63  ;;  %v295_v14 = vpop.permute.xlu0 %294 }
 0x312   :  { %4234 = vmatpush3.bf16.xpose.msk.msra.mxu0 %vm5409_vm2, %v4232_v3  ;;  %v305_v49 = vsel %vm302_vm3, %v5360_v31, %v295_v14 }
 0x313   :  { %4230 = vmatpush3.bf16.xpose.msk.msra.mxu1 %vm5409_vm2, %v4228_v1  ;;  %4239 = vmatprep.subr.bf16.mxu0 %v4928_v20  ;;  %v5463_v56 = vrot.slane %v305_v49, %v5363_v32 }
 0x314   :  { %4235 = vmatprep.subr.bf16.mxu1 %v4928_v20 }
 0x315   :  { %v293_v15 = vpop.permute.xlu0 %292 }
 0x316   :  { %v4419_v4 = vpop.permute.xlu1 %4418  ;;  %v304_v17 = vsel %vm302_vm3, %v267_v42, %v293_v15 }
 0x317   :  { %v4421_v5 = vunpack.i.h.bf16 %v4419_v4  ;;  %v4420_v6 = vunpack.i.l.bf16 %v4419_v4  ;;  %v5445_v21 = vrot.slane %v304_v17, %v5363_v32 }
 0x319   :  { %v4236_v10 = vpack.c.bf16 %v4421_v5, %v4420_v6  ;;  %3944 = vmatmul.mubr.msk.f32.vlgmr.msra.gmra.mrb[4].mxu0 %vm315_vm0, %v5354_v28 }
 0x31a   :  { %v4429_v7 = vpop.permute.xlu1 %4428  ;;  %3937 = vmatmul.mubr.msk.f32.vlgmr.msra.gmra.mrb[0].mxu1 %vm315_vm0, %v5356_v30  ;;  %3957 = vmatprep.mubr.msk.f32.mxu0 %vm4929_vm1, %v4930_v38 }
 0x31b   :  { %v4431_v9 = vunpack.i.h.bf16 %v4429_v7  ;;  %v4430_v12 = vunpack.i.l.bf16 %v4429_v7  ;;  %4238 = vmatpush3.bf16.xpose.msk.msra.mxu1 %vm5409_vm2, %v4236_v10  ;;  %3950 = vmatprep.mubr.msk.f32.mxu1 %vm4929_vm1, %v4930_v38 }
 0x31c   :  { %4243 = vmatprep.subr.bf16.mxu1 %v4928_v20 }
 0x31d   :  { %v4240_v13 = vpack.c.bf16 %v4431_v9, %v4430_v12 }
 0x31e   :  { %v291_v18 = vpop.permute.xlu1 %290 }
 0x31f   :  { %4242 = vmatpush3.bf16.xpose.msk.msra.mxu0 %vm5409_vm2, %v4240_v13  ;;  %v303_v19 = vsel %vm302_vm3, %v5348_v24, %v291_v18 }
 0x320   :  { %4249 = vmatprep.subr.bf16.mxu0 %v4928_v20  ;;  %v5448_v26 = vrot.slane %v303_v19, %v5363_v32 }
 0x322   :  { %3951 = vmatmul.mubr.msk.f32.vlgmr.msra.gmra.mrb[2].mxu1 %vm315_vm0, %v5383_v46  ;;  %v297_v42 = vpop.permute.xlu1 %296 }
 0x323   :  { %3964 = vmatprep.mubr.msk.f32.mxu1 %vm4929_vm1, %v4930_v38  ;;  %v306_v43 = vsel %vm302_vm3, %v269_v55, %v297_v42  ;;  %v5466_v55 = vpop.permute.xlu0 %521 }
 0x324   :  { %v5456_v48 = vrot.slane %v306_v43, %v5363_v32  ;;  %v527_v61 = vmul.f32 %v5466_v55, %v5356_v30  ;;  %v529_v1 = vmul.f32 %v5466_v55, %v5354_v28  ;;  %v531_v7 = vmul.f32 %v5466_v55, %v5383_v46 }
 0x326   :  { %3958 = vmatmul.mubr.msk.f32.vlgmr.msra.gmra.mrb[6].mxu0 %vm315_vm0, %v5381_v45  ;;  %v5460_v54 = vpop.permute.xlu1 %523 }
 0x327   :  { %3978 = vmatprep.mubr.msk.f32.mxu0 %vm4929_vm1, %v4930_v38  ;;  %v528_v31 = vmul.f32 %v5460_v54, %v5356_v30  ;;  %v530_v3 = vmul.f32 %v5460_v54, %v5354_v28  ;;  %v534_v5 = vmul.f32 %v5460_v54, %v5381_v45  ;;  %v533_v30 = vmul.f32 %v5466_v55, %v5381_v45 }
 0x328   :  { %v532_v10 = vmul.f32 %v5460_v54, %v5383_v46 }
 0x329   :  { %v4437_v63 = vpack.i.bf16 %v528_v31, %v527_v61  ;;  %v4442_v4 = vpack.i.bf16 %v530_v3, %v529_v1  ;;  %v4447_v6 = vpack.i.bf16 %v534_v5, %v533_v30 }
 0x32a   :  { %v4432_v9 = vpack.i.bf16 %v532_v10, %v531_v7 }
 0x3ec   :  { %v697_v29 = vpop.f32.mrb[4].mxu0 }
 0x3ed   :  { %v868_v33 = vmul.f32 0.25, %v697_v29  ;;  %v614_v34 = vpop.f32.mrb[0].mxu1  ;;  %v3945_v35 = vpop.f32.mrb[5].mxu0 }
 0x3ee   :  { %v867_v36 = vmul.f32 0.25, %v614_v34  ;;  %v3938_v37 = vpop.f32.mrb[1].mxu1 }
 0x3ef   :  { %v888_v39 = vadd.f32 %v5445_v21, %v868_v33 }
 0x3f0   :  { %v887_v40 = vadd.f32 %v5448_v26, %v867_v36 }
 0x3f1   :  { %v895_v41 = vsel %vm891_vm4, %v888_v39, -inf }
 0x3f2   :  { %896 = vmax.xlane.f32.xlu0 %v895_v41  ;;  %v892_v24 = vsel %vm891_vm4, %v887_v40, -inf }
 0x3f3   :  { %893 = vmax.xlane.f32.xlu1 %v892_v24 }
 0x3f5   :  { %v780_v44 = vpop.f32.mrb[2].mxu1 }
 0x3f6   :  { %v3952_v47 = vpop.f32.mrb[3].mxu1  ;;  %v869_v51 = vmul.f32 0.25, %v780_v44 }
 0x3f8   :  { %v889_v59 = vadd.f32 %v5463_v56, %v869_v51 }
 0x3f9   :  { %v863_v50 = vpop.f32.mrb[6].mxu0 }
 0x3fa   :  { %v870_v52 = vmul.f32 0.25, %v863_v50  ;;  %v3959_v53 = vpop.f32.mrb[7].mxu0  ;;  %v898_v62 = vsel %vm891_vm4, %v889_v59, -inf }
 0x3fc   :  { %v890_v57 = vadd.f32 %v5456_v48, %v870_v52 }
 0x3fe   :  { %v901_v58 = vsel %vm891_vm4, %v890_v57, -inf }
 0x3ff   :  { %902 = vmax.xlane.f32.xlu0 %v901_v58 }
 0x403   :  { %899 = vmax.xlane.f32.xlu0 %v898_v62  ;;  %v1335_v62 = vld [vmem:[%s6019_s7 + $0x10] sm:$0xff] }
 0x404   :  { %4438 = vrot.lane.b32.xlu1 %v4437_v63, %s4932_s8  ;;  %v1336_v63 = vld [vmem:[%s6019_s7 + $0x18] sm:$0xff] }
 0x405   :  { %v4263_v3 = vpack.c.bf16 %v1336_v63, %v1335_v62  ;;  %v1529_v62 = vld [vmem:[%s6023_s11 + $0x10] sm:$0xff] }
 0x408   :  { %4443 = vrot.lane.b32.xlu1 %v4442_v4, %s4932_s8 }
 0x40c   :  { %4448 = vrot.lane.b32.xlu1 %v4447_v6, %s4932_s8 }
 0x419   :  { %4433 = vrot.lane.b32.xlu0 %v4432_v9, %s4932_s8 }
 0x47f   :  { %v897_v28 = vpop.xlane.xlu0 %896 }
 0x480   :  { %v894_v12 = vpop.xlane.xlu1 %893  ;;  %v905_v13 = vsub.f32 %v888_v39, %v897_v28 }
 0x481   :  { %v904_v14 = vsub.f32 %v887_v40, %v894_v12 }
 0x482   :  { %v910_v18 = vmul.f32 1.442695, %v905_v13 }
 0x483   :  { %v908_v15 = vmul.f32 1.442695, %v904_v14 }
 0x484   :  { %v4439_v17 = vpop.permute.xlu1 %4438 }
 0x485   :  { %4500 = vpow2.f32 %v908_v15  ;;  %v4441_v45 = vunpack.i.h.bf16 %v4439_v17  ;;  %v4440_v19 = vunpack.i.l.bf16 %v4439_v17 }
 0x486   :  { %4502 = vpow2.f32 %v910_v18 }
 0x487   :  { %v4244_v29 = vpack.c.bf16 %v4441_v45, %v4440_v19 }
 0x488   :  { %v4444_v33 = vpop.permute.xlu1 %4443 }
 0x489   :  { %4245 = vmatpush3.bf16.msra.mxu1 %v4244_v29  ;;  %v4446_v46 = vunpack.i.h.bf16 %v4444_v33  ;;  %v4445_v34 = vunpack.i.l.bf16 %v4444_v33 }
 0x48a   :  { %4246 = vmatprep.subr.bf16.mxu1 %v4928_v20 }
 0x48b   :  { %v4247_v39 = vpack.c.bf16 %v4446_v46, %v4445_v34  ;;  %v3679_v34 = vld [vmem:[#allocation11] ss:$0 sm:$0xff] }
 0x48c   :  { %v903_v35 = vpop.xlane.xlu0 %902  ;;  %v4449_v36 = vpop.permute.xlu1 %4448 }
 0x48d   :  { %v907_v37 = vsub.f32 %v890_v57, %v903_v35  ;;  %v4451_v24 = vunpack.i.h.bf16 %v4449_v36  ;;  %v4450_v42 = vunpack.i.l.bf16 %v4449_v36  ;;  %v5501_v57 = vpack.c.bf16 %v5315_v22, %v5317_v23  ;;  %v1333_v22 = vld [vmem:[%s6019_s7] sm:$0xff]  ;;  %v1334_v23 = vld [vmem:[%s6019_s7 + $0x8] sm:$0xff] }
 0x48e   :  { %v4259_v61 = vpack.c.bf16 %v1334_v23, %v1333_v22 }
 0x48f   :  { %v4501_v41 = vpop.eup %4500  ;;  %v914_v40 = vmul.f32 1.442695, %v907_v37  ;;  %v4253_v49 = vpack.c.bf16 %v4451_v24, %v4450_v42 }
 0x490   :  { %v900_v43 = vpop.xlane.xlu0 %899  ;;  %3965 = vmatmul.mubr.msk.f32.vlgmr.msra.gmra.mrb[4].mxu1 %vm891_vm4, %v4501_v41  ;;  %v4503_v47 = vpop.eup %4502 }
 0x491   :  { %4504 = vpow2.f32 %v914_v40  ;;  %v906_v44 = vsub.f32 %v889_v59, %v900_v43  ;;  %4248 = vmatpush3.bf16.msra.mxu1 %v4247_v39  ;;  %3971 = vmatprep.mubr.msk.f32.mxu1 %vm4929_vm1, %v4930_v38 }
 0x492   :  { %4252 = vmatprep.subr.bf16.mxu1 %v4928_v20 }
 0x493   :  { %v912_v50 = vmul.f32 1.442695, %v906_v44 }
 0x494   :  { %v4434_v51 = vpop.permute.xlu0 %4433  ;;  %3972 = vmatmul.mubr.msk.f32.vlgmr.msra.gmra.mrb[6].mxu1 %vm891_vm4, %v4503_v47 }
 0x495   :  { %4506 = vpow2.f32 %v912_v50  ;;  %v4436_v52 = vunpack.i.h.bf16 %v4434_v51  ;;  %v4435_v53 = vunpack.i.l.bf16 %v4434_v51  ;;  %4254 = vmatpush3.bf16.msra.mxu1 %v4253_v49  ;;  %3985 = vmatprep.mubr.msk.f32.mxu1 %vm4929_vm1, %v4930_v38 }
 0x496   :  { %4260 = vmatprep.subr.bf16.mxu1 %v4259_v61 }
 0x497   :  { %v4250_v58 = vpack.c.bf16 %v4436_v52, %v4435_v53 }
 0x499   :  { %4251 = vmatpush3.bf16.msra.mxu0 %v4250_v58 }
 0x49a   :  { %4256 = vmatprep.subr.bf16.mxu0 %v5501_v57 }
 0x49b   :  { %v4505_v59 = vpop.eup %4504 }
 0x49c   :  { %3986 = vmatmul.mubr.msk.f32.vlgmr.msra.gmra.mrb[8].mxu1 %vm891_vm4, %v4505_v59 }
 0x49d   :  { %4262 = vmatpush3.bf16.msra.mxu1 %v4259_v61  ;;  %v1527_v61 = vld [vmem:[%s6023_s11] sm:$0xff] }
 0x49e   :  { %4264 = vmatprep.subr.bf16.mxu1 %v4263_v3 }
 0x49f   :  { %v4507_v31 = vpop.eup %4506 }
 0x4a0   :  { %3979 = vmatmul.mubr.msk.f32.vlgmr.msra.gmra.mrb[8].mxu0 %vm891_vm4, %v4507_v31 }
 0x4a1   :  { %4258 = vmatpush3.bf16.msra.mxu0 %v5501_v57  ;;  %3992 = vmatprep.mubr.msk.f32.mxu0 %vm891_vm4, %v4501_v41 }
 0x4a2   :  { %4266 = vmatpush3.bf16.msra.mxu1 %v4263_v3  ;;  %v1530_v3 = vld [vmem:[%s6023_s11 + $0x18] sm:$0xff] }
 0x4a4   :  { %3993 = vmatmul.mubr.msk.f32.vlgmr.msra.gmra.mrb[10].mxu0 %vm891_vm4, %v4503_v47 }
 0x4a5   :  { %3995 = vmatprep.mubr.msk.f32.mxu0 %vm891_vm4, %v4507_v31 }
 0x4a8   :  { %3996 = vmatmul.mubr.msk.f32.gmra.mrb[12].mxu0 %vm891_vm4, %v4505_v59 }
 0x563   :  { %v993_v1 = vpop.f32.mrb[4].mxu1 }
 0x564   :  { %v3966_v4 = vpop.f32.mrb[5].mxu1 }
 0x567   :  { %v1074_v5 = vpop.f32.mrb[6].mxu1 }
 0x568   :  { %v3973_v30 = vpop.f32.mrb[7].mxu1 }
 0x56f   :  { %v1236_v6 = vpop.f32.mrb[8].mxu1 }
 0x570   :  { %v3987_v10 = vpop.f32.mrb[9].mxu1 }
 0x573   :  { %v1155_v7 = vpop.f32.mrb[8].mxu0 }
 0x574   :  { %v3980_v9 = vpop.f32.mrb[9].mxu0 }
 0x577   :  { %v3994_v28 = vpop.f32.mrb[10].mxu0 }
 0x578   :  { %4508 = vrcp.f32 %v3994_v28  ;;  %v1306_v12 = vpop.f32.mrb[11].mxu0 }
 0x579   :  { %4510 = vrcp.f32 %v1306_v12 }
 0x57b   :  { %v3997_v13 = vpop.f32.mrb[12].mxu0 }
 0x57c   :  { %4512 = vrcp.f32 %v3997_v13  ;;  %v1316_v14 = vpop.f32.mrb[13].mxu0 }
 0x57d   :  { %4514 = vrcp.f32 %v1316_v14 }
 0x582   :  { %v4509_v15 = vpop.eup %4508 }
 0x583   :  { %v4511_v17 = vpop.eup %4510  ;;  %v1330_v18 = vmul.f32 %v4509_v15, %v1074_v5 }
 0x584   :  { %v1329_v45 = vmul.f32 %v4511_v17, %v993_v1  ;;  %v4271_v1 = vpack.c.bf16 %v1530_v3, %v1529_v62 }
 0x586   :  { %v4513_v19 = vpop.eup %4512  ;;  %4006 = vmatprep.mubr.msk.f32.mxu1 %vm315_vm0, %v1329_v45 }
 0x587   :  { %v4515_v29 = vpop.eup %4514  ;;  %4007 = vmatmul.mubr.msk.f32.vlgmr.msra.gmra.mrb[10].mxu1 %vm315_vm0, %v1330_v18  ;;  %v1332_v33 = vmul.f32 %v4513_v19, %v1236_v6 }
 0x588   :  { %v1331_v46 = vmul.f32 %v4515_v29, %v1155_v7 }
 0x58a   :  { %4009 = vmatprep.mubr.msk.f32.mxu1 %vm315_vm0, %v1331_v46 }
 0x58b   :  { %4010 = vmatmul.mubr.msk.f32.gmra.mrb[12].mxu1 %vm315_vm0, %v1332_v33 }
 0x65a   :  { %v4008_v35 = vpop.f32.mrb[10].mxu1 }
 0x65b   :  { %v1428_v36 = vadd.f32 %v4008_v35, %v3679_v34  ;;  %v1422_v37 = vpop.f32.mrb[11].mxu1 }
 0x65c   :  { %v1423_v41 = vadd.f32 %v3679_v34, %v1422_v37 }
 0x65d   :  { %v5528_v39 = vadd.f32 %v1428_v36, %v5330_v0 }
 0x65e   :  { %v5531_v40 = vadd.f32 %v1423_v41, %v5325_v60  ;;  %v4011_v24 = vpop.f32.mrb[12].mxu1 }
 0x65f   :  { %v1438_v42 = vadd.f32 %v4011_v24, %v3679_v34  ;;  %v1432_v43 = vpop.f32.mrb[13].mxu1  ;;  %v1450_v44 = vsel %vm315_vm0, %v5528_v39, 0.0  ;;  %v1464_v49 = vmul.f32 %v5528_v39, %v5528_v39 }
 0x660   :  { %1451 = vadd.xlane.f32.xlu1 %v1450_v44  ;;  %v1447_v47 = vsel %vm315_vm0, %v5531_v40, 0.0  ;;  %v1433_v51 = vadd.f32 %v3679_v34, %v1432_v43  ;;  %v1463_v53 = vmul.f32 %v5531_v40, %v5531_v40 }
 0x661   :  { %v5540_v50 = vadd.f32 %v1438_v42, %v5339_v11  ;;  %1448 = vadd.xlane.f32.xlu0 %v1447_v47  ;;  %v1470_v52 = vsel %vm315_vm0, %v1464_v49, 0.0 }
 0x662   :  { %v5551_v11 = vadd.f32 %v1433_v51, %v5335_v8  ;;  %v1467_v59 = vsel %vm315_vm0, %v1463_v53, 0.0  ;;  %v1528_v8 = vld [vmem:[%s6023_s11 + $0x8] sm:$0xff]  ;;  %v3684_v51 = vld [vmem:[#allocation13] ss:$0 sm:$0xff] }
 0x663   :  { %v1456_v60 = vsel %vm315_vm0, %v5540_v50, 0.0  ;;  %v1466_v0 = vmul.f32 %v5540_v50, %v5540_v50  ;;  %v4267_v63 = vpack.c.bf16 %v1528_v8, %v1527_v61 }
 0x664   :  { %1457 = vadd.xlane.f32.xlu1 %v1456_v60  ;;  %v1453_v31 = vsel %vm315_vm0, %v5551_v11, 0.0  ;;  %v1465_v22 = vmul.f32 %v5551_v11, %v5551_v11 }
 0x665   :  { %1471 = vadd.xlane.f32.xlu0 %v1470_v52  ;;  %v1476_v58 = vsel %vm315_vm0, %v1466_v0, 0.0  ;;  %4268 = vmatprep.subr.bf16.mxu0 %v4267_v63 }
 0x666   :  { %v1473_v23 = vsel %vm315_vm0, %v1465_v22, 0.0  ;;  %4270 = vmatpush3.bf16.msra.mxu0 %v4267_v63 }
 0x667   :  { %4272 = vmatprep.subr.bf16.mxu0 %v4271_v1 }
 0x668   :  { %1477 = vadd.xlane.f32.xlu1 %v1476_v58 }
 0x669   :  { %1468 = vadd.xlane.f32.xlu0 %v1467_v59 }
 0x66a   :  { %4274 = vmatpush3.bf16.msra.mxu0 %v4271_v1 }
 0x66d   :  { %1454 = vadd.xlane.f32.xlu0 %v1453_v31  ;;  %v3685_v31 = vld [vmem:[#allocation14] ss:$0 sm:$0xff] }
 0x671   :  { %1474 = vadd.xlane.f32.xlu0 %v1473_v23 }
 0x6ed   :  { %v1452_v4 = vpop.xlane.xlu1 %1451 }
 0x6ee   :  { %v1449_v5 = vpop.xlane.xlu0 %1448  ;;  %v1460_v30 = vmul.f32 0.03125, %v1452_v4 }
 0x6ef   :  { %v1459_v28 = vmul.f32 0.03125, %v1449_v5  ;;  %v1672_v5 = vld [vmem:[%s6025_s13 + $0x8] sm:$0xff] }
 0x6f0   :  { %v1484_v9 = vmul.f32 %v1460_v30, %v1460_v30  ;;  %v1492_v47 = vsub.f32 %v5528_v39, %v1460_v30 }
 0x6f1   :  { %v1458_v6 = vpop.xlane.xlu1 %1457  ;;  %v1483_v45 = vmul.f32 %v1459_v28, %v1459_v28  ;;  %v1491_v0 = vsub.f32 %v5531_v40, %v1459_v28  ;;  %v1676_v28 = vld [vmem:[%s6025_s13 + $0x28] sm:$0xff] }
 0x6f2   :  { %v1462_v10 = vmul.f32 0.03125, %v1458_v6  ;;  %v1472_v7 = vpop.xlane.xlu0 %1471  ;;  %v1673_v6 = vld [vmem:[%s6025_s13 + $0x10] sm:$0xff] }
 0x6f3   :  { %v1480_v12 = vmul.f32 0.03125, %v1472_v7 }
 0x6f4   :  { %v1486_v15 = vmul.f32 %v1462_v10, %v1462_v10  ;;  %v1494_v23 = vsub.f32 %v5540_v50, %v1462_v10  ;;  %v1674_v10 = vld [vmem:[%s6025_s13 + $0x18] sm:$0xff] }
 0x6f5   :  { %v1488_v13 = vsub.f32 %v1480_v12, %v1484_v9  ;;  %v1478_v14 = vpop.xlane.xlu1 %1477  ;;  %v4279_v7 = vpack.c.bf16 %v1674_v10, %v1673_v6  ;;  %v1675_v9 = vld [vmem:[%s6025_s13 + $0x20] sm:$0xff] }
 0x6f6   :  { %v1482_v17 = vmul.f32 0.03125, %v1478_v14  ;;  %v1469_v18 = vpop.xlane.xlu0 %1468  ;;  %v4283_v12 = vpack.c.bf16 %v1676_v28, %v1675_v9  ;;  %v1678_v14 = vld [vmem:[%s6025_s13 + $0x38] sm:$0xff] }
 0x6f7   :  { %v1496_v19 = vadd.f32 1e-12, %v1488_v13  ;;  %v1479_v29 = vmul.f32 0.03125, %v1469_v18  ;;  %v1677_v13 = vld [vmem:[%s6025_s13 + $0x30] sm:$0xff] }
 0x6f8   :  { %v1490_v33 = vsub.f32 %v1482_v17, %v1486_v15  ;;  %v4287_v15 = vpack.c.bf16 %v1678_v14, %v1677_v13  ;;  %v3686_v17 = vld [vmem:[#allocation16] ss:$0 sm:$0xff] }
 0x6f9   :  { %4516 = vrsqrt.f32 %v1496_v19  ;;  %v1487_v46 = vsub.f32 %v1479_v29, %v1483_v45 }
 0x6fa   :  { %v1455_v34 = vpop.xlane.xlu0 %1454  ;;  %v1498_v37 = vadd.f32 1e-12, %v1490_v33 }
 0x6fb   :  { %v1495_v35 = vadd.f32 1e-12, %v1487_v46  ;;  %v1461_v36 = vmul.f32 0.03125, %v1455_v34 }
 0x6fd   :  { %4518 = vrsqrt.f32 %v1495_v35  ;;  %v1485_v24 = vmul.f32 %v1461_v36, %v1461_v36  ;;  %v1493_v39 = vsub.f32 %v5551_v11, %v1461_v36  ;;  %v1671_v11 = vld [vmem:[%s6025_s13] sm:$0xff] }
 0x6fe   :  { %v1475_v41 = vpop.xlane.xlu0 %1474  ;;  %4520 = vrsqrt.f32 %v1498_v37  ;;  %v4275_v30 = vpack.c.bf16 %v1672_v5, %v1671_v11 }
 0x6ff   :  { %v1481_v42 = vmul.f32 0.03125, %v1475_v41 }
 0x700   :  { %4276 = vmatprep.subr.bf16.mxu1 %v4275_v30 }
 0x701   :  { %v1489_v43 = vsub.f32 %v1481_v42, %v1485_v24  ;;  %4278 = vmatpush3.bf16.msra.mxu1 %v4275_v30 }
 0x702   :  { %4280 = vmatprep.subr.bf16.mxu1 %v4279_v7 }
 0x703   :  { %v4517_v44 = vpop.eup %4516  ;;  %v1497_v49 = vadd.f32 1e-12, %v1489_v43 }
 0x704   :  { %v1504_v60 = vmul.f32 %v4517_v44, %v1492_v47 }
 0x705   :  { %4522 = vrsqrt.f32 %v1497_v49  ;;  %4282 = vmatpush3.bf16.msra.mxu1 %v4279_v7 }
 0x706   :  { %v1514_v58 = vmul.f32 %v3684_v51, %v1504_v60  ;;  %4284 = vmatprep.subr.bf16.mxu1 %v4283_v12 }
 0x707   :  { %v4519_v52 = vpop.eup %4518 }
 0x708   :  { %v1503_v53 = vmul.f32 %v4519_v52, %v1491_v0  ;;  %v4521_v59 = vpop.eup %4520  ;;  %v5576_v8 = vadd.f32 %v3685_v31, %v1514_v58 }
 0x709   :  { %v1506_v62 = vmul.f32 %v4521_v59, %v1494_v23  ;;  %4286 = vmatpush3.bf16.msra.mxu1 %v4283_v12 }
 0x70a   :  { %v1513_v22 = vmul.f32 %v3684_v51, %v1503_v53  ;;  %4288 = vmatprep.subr.bf16.mxu1 %v4287_v15 }
 0x70b   :  { %v1516_v3 = vmul.f32 %v3684_v51, %v1506_v62 }
 0x70c   :  { %v5574_v61 = vadd.f32 %v3685_v31, %v1513_v22 }
 0x70d   :  { %v5585_v50 = vadd.f32 %v3685_v31, %v1516_v3  ;;  %4290 = vmatpush3.bf16.msra.mxu1 %v4287_v15  ;;  %v3691_v15 = vld [vmem:[#allocation17] ss:$0 sm:$0xff] }
 0x70e   :  { %4020 = vmatprep.mubr.msk.f32.mxu0 %vm315_vm0, %v5574_v61  ;;  %4303 = vmatprep.subr.bf16.mxu1 %v4928_v20 }
 0x70f   :  { %v4523_v40 = vpop.eup %4522  ;;  %4021 = vmatmul.mubr.msk.f32.vlgmr.msra.gmra.mrb[14].mxu0 %vm315_vm0, %v5576_v8 }
 0x710   :  { %v1505_v63 = vmul.f32 %v4523_v40, %v1493_v39 }
 0x712   :  { %v1515_v1 = vmul.f32 %v3684_v51, %v1505_v63 }
 0x714   :  { %v5583_v4 = vadd.f32 %v3685_v31, %v1515_v1 }
 0x716   :  { %4023 = vmatprep.mubr.msk.f32.mxu0 %vm315_vm0, %v5583_v4 }
 0x717   :  { %4024 = vmatmul.mubr.msk.f32.gmra.mrb[16].mxu0 %vm315_vm0, %v5585_v50 }
 0x7e2   :  { %v4022_v18 = vpop.f32.mrb[14].mxu0 }
 0x7e3   :  { %v1622_v45 = vadd.f32 %v4022_v18, %v3686_v17  ;;  %v1616_v19 = vpop.f32.mrb[15].mxu0 }
 0x7e4   :  { %v1617_v29 = vadd.f32 %v3686_v17, %v1616_v19 }
 0x7e5   :  { %v1636_v33 = vmul.f32 %v1622_v45, %v1622_v45 }
 0x7e6   :  { %v1635_v46 = vmul.f32 %v1617_v29, %v1617_v29 }
 0x7e7   :  { %v1640_v34 = vmul.f32 %v1636_v33, %v1622_v45 }
 0x7e8   :  { %v1639_v35 = vmul.f32 %v1635_v46, %v1617_v29 }
 0x7e9   :  { %v1644_v36 = vmul.f32 0.044715, %v1640_v34 }
 0x7ea   :  { %v1643_v37 = vmul.f32 0.044715, %v1639_v35  ;;  %v4025_v41 = vpop.f32.mrb[16].mxu0 }
 0x7eb   :  { %v1648_v24 = vadd.f32 %v1644_v36, %v1622_v45  ;;  %v1632_v42 = vadd.f32 %v4025_v41, %v3686_v17  ;;  %v1626_v43 = vpop.f32.mrb[17].mxu0 }
 0x7ec   :  { %v1647_v44 = vadd.f32 %v1643_v37, %v1617_v29  ;;  %v1627_v47 = vadd.f32 %v3686_v17, %v1626_v43 }
 0x7ed   :  { %v1652_v49 = vmul.f32 0.7978846, %v1648_v24  ;;  %v1638_v60 = vmul.f32 %v1632_v42, %v1632_v42 }
 0x7ee   :  { %v1651_v0 = vmul.f32 0.7978846, %v1647_v44  ;;  %v1637_v51 = vmul.f32 %v1627_v47, %v1627_v47 }
 0x7ef   :  { %4524 = vtanh.f32 %v1652_v49  ;;  %v1642_v52 = vmul.f32 %v1638_v60, %v1632_v42 }
 0x7f0   :  { %4526 = vtanh.f32 %v1651_v0  ;;  %v1641_v53 = vmul.f32 %v1637_v51, %v1627_v47  ;;  %v3698_v51 = vld [vmem:[%s6058_s22 + $0x20] sm:$0xff] }
 0x7f1   :  { %v1646_v58 = vmul.f32 0.044715, %v1642_v52  ;;  %v3699_v52 = vld [vmem:[%s6058_s22 + $0x28] sm:$0xff] }
 0x7f2   :  { %v1645_v59 = vmul.f32 0.044715, %v1641_v53  ;;  %v4291_v53 = vpack.c.bf16 %v3699_v52, %v3698_v51 }
 0x7f3   :  { %v1650_v31 = vadd.f32 %v1646_v58, %v1632_v42  ;;  %v3700_v58 = vld [vmem:[%s6058_s22 + $0x30] sm:$0xff] }
 0x7f4   :  { %v1649_v22 = vadd.f32 %v1645_v59, %v1627_v47  ;;  %v3701_v59 = vld [vmem:[%s6058_s22 + $0x38] sm:$0xff]  ;;  %4292 = vmatprep.subr.bf16.mxu0 %v4291_v53 }
 0x7f5   :  { %v1654_v23 = vmul.f32 0.7978846, %v1650_v31  ;;  %v4295_v31 = vpack.c.bf16 %v3701_v59, %v3700_v58  ;;  %4294 = vmatpush3.bf16.msra.mxu0 %v4291_v53 }
 0x7f6   :  { %v1653_v62 = vmul.f32 0.7978846, %v1649_v22 }
 0x7f7   :  { %4528 = vtanh.f32 %v1654_v23  ;;  %4296 = vmatprep.subr.bf16.mxu0 %v4295_v31 }
 0x7f8   :  { %4530 = vtanh.f32 %v1653_v62 }
 0x7f9   :  { %v4525_v39 = vpop.eup %4524  ;;  %4298 = vmatpush3.bf16.msra.mxu0 %v4295_v31 }
 0x7fa   :  { %v4527_v40 = vpop.eup %4526  ;;  %v1660_v63 = vadd.f32 1.0, %v4525_v39  ;;  %4299 = vmatprep.subr.bf16.mxu0 %v4928_v20 }
 0x7fb   :  { %v1659_v3 = vadd.f32 1.0, %v4527_v40 }
 0x7fc   :  { %v1664_v1 = vmul.f32 0.5, %v1660_v63 }
 0x7fd   :  { %v1663_v11 = vmul.f32 0.5, %v1659_v3 }
 0x7fe   :  { %v1668_v30 = vmul.f32 %v1664_v1, %v1622_v45 }
 0x7ff   :  { %v1667_v5 = vmul.f32 %v1663_v11, %v1617_v29 }
 0x801   :  { %v4529_v6 = vpop.eup %4528  ;;  %4042 = vmatprep.mubr.msk.f32.mxu1 %vm1686_vm5, %v1667_v5 }
 0x802   :  { %v4531_v10 = vpop.eup %4530  ;;  %4043 = vmatmul.mubr.msk.f32.vlgmr.msra.gmra.mrb[14].mxu1 %vm1686_vm5, %v1668_v30  ;;  %v1662_v7 = vadd.f32 1.0, %v4529_v6 }
 0x803   :  { %v1661_v9 = vadd.f32 1.0, %v4531_v10 }
 0x804   :  { %v1666_v28 = vmul.f32 0.5, %v1662_v7 }
 0x805   :  { %v1665_v12 = vmul.f32 0.5, %v1661_v9 }
 0x806   :  { %v1670_v14 = vmul.f32 %v1666_v28, %v1632_v42 }
 0x807   :  { %v1669_v13 = vmul.f32 %v1665_v12, %v1627_v47 }
 0x809   :  { %4045 = vmatprep.mubr.msk.f32.mxu1 %vm1686_vm5, %v1669_v13 }
 0x80a   :  { %4046 = vmatmul.mubr.msk.f32.gmra.mrb[16].mxu1 %vm1686_vm5, %v1670_v14 }
 0x80b   :  { %4073 = vmatprep.mubr.msk.f32.mxu1 %vm4929_vm1, %v4930_v38 }
 0x8d5   :  { %v4044_v17 = vpop.f32.mrb[14].mxu1 }
 0x8d6   :  { %v1771_v18 = vadd.f32 %v4044_v17, %v3691_v15  ;;  %v1765_v45 = vpop.f32.mrb[15].mxu1 }
 0x8d7   :  { %v1766_v19 = vadd.f32 %v3691_v15, %v1765_v45 }
 0x8d8   :  { %v5623_v29 = vadd.f32 %v1771_v18, %v5576_v8 }
 0x8d9   :  { %v5626_v33 = vadd.f32 %v1766_v19, %v5574_v61 }
 0x8da   :  { %v1793_v46 = vsel %vm315_vm0, %v5623_v29, 0.0  ;;  %v1807_v34 = vmul.f32 %v5623_v29, %v5623_v29 }
 0x8db   :  { %1794 = vadd.xlane.f32.xlu1 %v1793_v46  ;;  %v1790_v35 = vsel %vm315_vm0, %v5626_v33, 0.0  ;;  %v1806_v36 = vmul.f32 %v5626_v33, %v5626_v33 }
 0x8dc   :  { %1791 = vadd.xlane.f32.xlu0 %v1790_v35  ;;  %v1813_v61 = vsel %vm315_vm0, %v1807_v34, 0.0 }
 0x8dd   :  { %v4047_v37 = vpop.f32.mrb[16].mxu1  ;;  %v1810_v42 = vsel %vm315_vm0, %v1806_v36, 0.0 }
 0x8de   :  { %v1781_v8 = vadd.f32 %v4047_v37, %v3691_v15  ;;  %v1775_v41 = vpop.f32.mrb[17].mxu1 }
 0x8df   :  { %v1776_v24 = vadd.f32 %v3691_v15, %v1775_v41  ;;  %1814 = vadd.xlane.f32.xlu1 %v1813_v61  ;;  %v3696_v61 = vld [vmem:[#allocation19] ss:$0 sm:$0xff] }
 0x8e0   :  { %v5639_v43 = vadd.f32 %v1781_v8, %v5585_v50  ;;  %1811 = vadd.xlane.f32.xlu0 %v1810_v42 }
 0x8e1   :  { %v5642_v44 = vadd.f32 %v1776_v24, %v5583_v4 }
 0x8e2   :  { %v1799_v47 = vsel %vm315_vm0, %v5639_v43, 0.0  ;;  %v1809_v49 = vmul.f32 %v5639_v43, %v5639_v43 }
 0x8e3   :  { %1800 = vadd.xlane.f32.xlu1 %v1799_v47  ;;  %v1796_v60 = vsel %vm315_vm0, %v5642_v44, 0.0  ;;  %v1808_v0 = vmul.f32 %v5642_v44, %v5642_v44 }
 0x8e4   :  { %1797 = vadd.xlane.f32.xlu0 %v1796_v60  ;;  %v1819_v50 = vsel %vm315_vm0, %v1809_v49, 0.0  ;;  %v3697_v49 = vld [vmem:[#allocation20] ss:$0 sm:$0xff] }
 0x8e5   :  { %v1816_v4 = vsel %vm315_vm0, %v1808_v0, 0.0 }
 0x8e7   :  { %1820 = vadd.xlane.f32.xlu1 %v1819_v50 }
 0x8e8   :  { %1817 = vadd.xlane.f32.xlu0 %v1816_v4 }
 0x968   :  { %v1795_v22 = vpop.xlane.xlu1 %1794 }
 0x969   :  { %v1803_v23 = vmul.f32 0.03125, %v1795_v22  ;;  %v1792_v62 = vpop.xlane.xlu0 %1791 }
 0x96a   :  { %v1802_v39 = vmul.f32 0.03125, %v1792_v62 }
 0x96b   :  { %v1827_v63 = vmul.f32 %v1803_v23, %v1803_v23  ;;  %v1835_v37 = vsub.f32 %v5623_v29, %v1803_v23 }
 0x96c   :  { %v1815_v40 = vpop.xlane.xlu1 %1814  ;;  %v1826_v11 = vmul.f32 %v1802_v39, %v1802_v39  ;;  %v1834_v41 = vsub.f32 %v5626_v33, %v1802_v39 }
 0x96d   :  { %v1823_v3 = vmul.f32 0.03125, %v1815_v40  ;;  %v1812_v1 = vpop.xlane.xlu0 %1811 }
 0x96e   :  { %v1822_v5 = vmul.f32 0.03125, %v1812_v1 }
 0x96f   :  { %v1831_v30 = vsub.f32 %v1823_v3, %v1827_v63 }
 0x970   :  { %v1830_v6 = vsub.f32 %v1822_v5, %v1826_v11  ;;  %v1801_v10 = vpop.xlane.xlu1 %1800 }
 0x971   :  { %v1839_v7 = vadd.f32 1e-12, %v1831_v30  ;;  %v1805_v9 = vmul.f32 0.03125, %v1801_v10  ;;  %v1798_v28 = vpop.xlane.xlu0 %1797 }
 0x972   :  { %v1838_v12 = vadd.f32 1e-12, %v1830_v6  ;;  %v1804_v13 = vmul.f32 0.03125, %v1798_v28 }
 0x973   :  { %4532 = vrsqrt.f32 %v1839_v7  ;;  %v1829_v15 = vmul.f32 %v1805_v9, %v1805_v9  ;;  %v1837_v4 = vsub.f32 %v5639_v43, %v1805_v9  ;;  %v3702_v43 = vld [vmem:[#allocation10 + $0x1] ss:$0 sm:$0xff] }
 0x974   :  { %4534 = vrsqrt.f32 %v1838_v12  ;;  %v1821_v14 = vpop.xlane.xlu1 %1820  ;;  %v1828_v45 = vmul.f32 %v1804_v13, %v1804_v13  ;;  %v1836_v29 = vsub.f32 %v5642_v44, %v1804_v13 }
 0x975   :  { %v1825_v17 = vmul.f32 0.03125, %v1821_v14  ;;  %v1818_v18 = vpop.xlane.xlu0 %1817 }
 0x976   :  { %v1824_v19 = vmul.f32 0.03125, %v1818_v18 }
 0x977   :  { %v1833_v46 = vsub.f32 %v1825_v17, %v1829_v15 }
 0x978   :  { %v1832_v34 = vsub.f32 %v1824_v19, %v1828_v45 }
 0x979   :  { %v1841_v35 = vadd.f32 1e-12, %v1833_v46 }
 0x97a   :  { %v1840_v36 = vadd.f32 1e-12, %v1832_v34 }
 0x97b   :  { %4536 = vrsqrt.f32 %v1841_v35 }
 0x97c   :  { %4538 = vrsqrt.f32 %v1840_v36 }
 0x97d   :  { %v4533_v8 = vpop.eup %4532 }
 0x97e   :  { %v4535_v24 = vpop.eup %4534  ;;  %v1847_v42 = vmul.f32 %v4533_v8, %v1835_v37 }
 0x97f   :  { %v1846_v47 = vmul.f32 %v4535_v24, %v1834_v41 }
 0x980   :  { %v1857_v60 = vmul.f32 %v3696_v61, %v1847_v42 }
 0x981   :  { %v1856_v0 = vmul.f32 %v3696_v61, %v1846_v47 }
 0x982   :  { %v5672_v51 = vadd.f32 %v3697_v49, %v1857_v60 }
 0x983   :  { %v5669_v50 = vadd.f32 %v3697_v49, %v1856_v0 }
 0x985   :  { %v4537_v52 = vpop.eup %4536  ;;  %4056 = vmatprep.mubr.msk.f32.mxu0 %vm315_vm0, %v5669_v50 }
 0x986   :  { %v4539_v33 = vpop.eup %4538  ;;  %4057 = vmatmul.mubr.msk.f32.vlgmr.msra.gmra.mrb[18].mxu0 %vm315_vm0, %v5672_v51  ;;  %v1849_v53 = vmul.f32 %v4537_v52, %v1837_v4 }
 0x987   :  { %v1848_v58 = vmul.f32 %v4539_v33, %v1836_v29 }
 0x988   :  { %v1859_v59 = vmul.f32 %v3696_v61, %v1849_v53 }
 0x989   :  { %v1858_v31 = vmul.f32 %v3696_v61, %v1848_v58 }
 0x98a   :  { %v5681_v23 = vadd.f32 %v3697_v49, %v1859_v59 }
 0x98b   :  { %v5679_v22 = vadd.f32 %v3697_v49, %v1858_v31 }
 0x98d   :  { %4059 = vmatprep.mubr.msk.f32.mxu0 %vm315_vm0, %v5679_v22 }
 0x98e   :  { %4060 = vmatmul.mubr.msk.f32.gmra.mrb[20].mxu0 %vm315_vm0, %v5681_v23 }
 0x98f   :  { %4066 = vmatprep.mubr.msk.f32.mxu0 %vm4929_vm1, %v4930_v38 }
 0xa59   :  { %v4058_v44 = vpop.f32.mrb[18].mxu0 }
 0xa5a   :  { %v5689_v62 = vadd.f32 %v4058_v44, %v3702_v43  ;;  %v1961_v39 = vpop.f32.mrb[19].mxu0 }
 0xa5b   :  { %v5691_v40 = vadd.f32 %v3702_v43, %v1961_v39 }
 0xa5c   :  { %v1982_v63 = vmul.f32 %v5689_v62, %v5352_v27  ;;  %v1983_v3 = vmul.f32 %v5689_v62, %v5350_v25 }
 0xa5d   :  { %v1980_v1 = vmul.f32 %v5691_v40, %v5352_v27  ;;  %v1981_v11 = vmul.f32 %v5691_v40, %v5350_v25 }
 0xa5e   :  { %v4457_v5 = vpack.i.bf16 %v1983_v3, %v1982_v63 }
 0xa5f   :  { %v4452_v30 = vpack.i.bf16 %v1981_v11, %v1980_v1  ;;  %v1989_v11 = vmul.f32 %v5691_v40, %v5460_v54 }
 0xa60   :  { %4458 = vrot.lane.b32.xlu1 %v4457_v5, %s4931_s2 }
 0xa61   :  { %4453 = vrot.lane.b32.xlu0 %v4452_v30, %s4931_s2  ;;  %v4061_v6 = vpop.f32.mrb[20].mxu0 }
 0xa62   :  { %v1971_v10 = vpop.f32.mrb[21].mxu0  ;;  %v5703_v7 = vadd.f32 %v4061_v6, %v3702_v43  ;;  %v1990_v6 = vmul.f32 %v5689_v62, %v5466_v55 }
 0xa63   :  { %v5705_v9 = vadd.f32 %v3702_v43, %v1971_v10 }
 0xa64   :  { %v1986_v14 = vmul.f32 %v5703_v7, %v5352_v27  ;;  %v1987_v15 = vmul.f32 %v5703_v7, %v5350_v25  ;;  %v1994_v10 = vmul.f32 %v5703_v7, %v5466_v55 }
 0xa65   :  { %v1984_v28 = vmul.f32 %v5705_v9, %v5352_v27  ;;  %v1985_v12 = vmul.f32 %v5705_v9, %v5350_v25 }
 0xa66   :  { %v4467_v17 = vpack.i.bf16 %v1987_v15, %v1986_v14 }
 0xa67   :  { %v4462_v13 = vpack.i.bf16 %v1985_v12, %v1984_v28  ;;  %v1992_v12 = vmul.f32 %v5705_v9, %v5466_v55 }
 0xa69   :  { %4463 = vrot.lane.b32.xlu1 %v4462_v13, %s4931_s2 }
 0xa6d   :  { %4468 = vrot.lane.b32.xlu1 %v4467_v17, %s4931_s2 }
 0xad2   :  { %v4459_v18 = vpop.permute.xlu1 %4458 }
 0xad3   :  { %v4461_v45 = vunpack.i.h.bf16 %v4459_v18  ;;  %v4460_v19 = vunpack.i.l.bf16 %v4459_v18  ;;  %v4454_v46 = vpop.permute.xlu0 %4453 }
 0xad4   :  { %v4456_v34 = vunpack.i.h.bf16 %v4454_v46  ;;  %v4455_v35 = vunpack.i.l.bf16 %v4454_v46 }
 0xad5   :  { %v4304_v36 = vpack.c.bf16 %v4461_v45, %v4460_v19 }
 0xad6   :  { %v4300_v37 = vpack.c.bf16 %v4456_v34, %v4455_v35 }
 0xad7   :  { %4306 = vmatpush3.bf16.xpose.msk.msra.mxu1 %vm5409_vm2, %v4304_v36 }
 0xad8   :  { %4302 = vmatpush3.bf16.xpose.msk.msra.mxu0 %vm5409_vm2, %v4300_v37  ;;  %4311 = vmatprep.subr.bf16.mxu1 %v4928_v20 }
 0xad9   :  { %4307 = vmatprep.subr.bf16.mxu0 %v4928_v20 }
 0xadb   :  { %v4464_v25 = vpop.permute.xlu1 %4463 }
 0xadc   :  { %v4466_v27 = vunpack.i.h.bf16 %v4464_v25  ;;  %v4465_v8 = vunpack.i.l.bf16 %v4464_v25 }
 0xade   :  { %v4308_v41 = vpack.c.bf16 %v4466_v27, %v4465_v8  ;;  %4074 = vmatmul.mubr.msk.f32.vlgmr.msra.gmra.mrb[18].mxu1 %vm315_vm0, %v5689_v62 }
 0xadf   :  { %v4469_v61 = vpop.permute.xlu1 %4468  ;;  %4067 = vmatmul.mubr.msk.f32.vlgmr.msra.gmra.mrb[22].mxu0 %vm315_vm0, %v5691_v40  ;;  %4087 = vmatprep.mubr.msk.f32.mxu1 %vm4929_vm1, %v4930_v38 }
 0xae0   :  { %v4471_v24 = vunpack.i.h.bf16 %v4469_v61  ;;  %v4470_v42 = vunpack.i.l.bf16 %v4469_v61  ;;  %4310 = vmatpush3.bf16.xpose.msk.msra.mxu0 %vm5409_vm2, %v4308_v41  ;;  %4080 = vmatprep.mubr.msk.f32.mxu0 %vm4929_vm1, %v4930_v38 }
 0xae1   :  { %4315 = vmatprep.subr.bf16.mxu0 %v4928_v20 }
 0xae2   :  { %v4312_v47 = vpack.c.bf16 %v4471_v24, %v4470_v42 }
 0xae4   :  { %4314 = vmatpush3.bf16.xpose.msk.msra.mxu1 %vm5409_vm2, %v4312_v47 }
 0xae5   :  { %4321 = vmatprep.subr.bf16.mxu1 %v4928_v20 }
 0xae7   :  { %4081 = vmatmul.mubr.msk.f32.vlgmr.msra.gmra.mrb[24].mxu0 %vm315_vm0, %v5705_v9 }
 0xae8   :  { %4094 = vmatprep.mubr.msk.f32.mxu0 %vm4929_vm1, %v4930_v38 }
 0xaeb   :  { %4088 = vmatmul.mubr.msk.f32.vlgmr.msra.gmra.mrb[20].mxu1 %vm315_vm0, %v5703_v7 }
 0xaec   :  { %4108 = vmatprep.mubr.msk.f32.mxu1 %vm4929_vm1, %v4930_v38 }
 0xbb1   :  { %v2158_v49 = vpop.f32.mrb[18].mxu1 }
 0xbb2   :  { %v2329_v60 = vmul.f32 0.25, %v2158_v49  ;;  %v2075_v0 = vpop.f32.mrb[22].mxu0  ;;  %v4075_v4 = vpop.f32.mrb[19].mxu1 }
 0xbb3   :  { %v2328_v2 = vmul.f32 0.25, %v2075_v0  ;;  %v4068_v52 = vpop.f32.mrb[23].mxu0 }
 0xbb4   :  { %v2333_v29 = vadd.f32 %v2329_v60, %v5445_v21 }
 0xbb5   :  { %v2332_v33 = vadd.f32 %v2328_v2, %v5448_v26  ;;  %v1988_v26 = vmul.f32 %v5691_v40, %v5466_v55  ;;  %v1995_v40 = vmul.f32 %v5703_v7, %v5460_v54 }
 0xbb6   :  { %v2339_v53 = vsel %vm891_vm4, %v2333_v29, -inf }
 0xbb7   :  { %2340 = vmax.xlane.f32.xlu0 %v2339_v53  ;;  %v2336_v58 = vsel %vm891_vm4, %v2332_v33, -inf  ;;  %v4477_v30 = vpack.i.bf16 %v1989_v11, %v1988_v26  ;;  %v4487_v28 = vpack.i.bf16 %v1995_v40, %v1994_v10 }
 0xbb8   :  { %2337 = vmax.xlane.f32.xlu1 %v2336_v58  ;;  %v3727_v58 = vld [vmem:[%s6019_s7 + $0x20] sm:$0xff] }
 0xbba   :  { %v2241_v59 = vpop.f32.mrb[24].mxu0 }
 0xbbb   :  { %v4082_v31 = vpop.f32.mrb[25].mxu0  ;;  %v2330_v44 = vmul.f32 0.25, %v2241_v59  ;;  %v3728_v59 = vld [vmem:[%s6019_s7 + $0x28] sm:$0xff] }
 0xbbc   :  { %v4331_v31 = vpack.c.bf16 %v3728_v59, %v3727_v58 }
 0xbbd   :  { %v2334_v21 = vadd.f32 %v2330_v44, %v5463_v56 }
 0xbbe   :  { %v2324_v43 = vpop.f32.mrb[20].mxu1 }
 0xbbf   :  { %v2331_v39 = vmul.f32 0.25, %v2324_v43  ;;  %v4089_v63 = vpop.f32.mrb[21].mxu1  ;;  %v2342_v5 = vsel %vm891_vm4, %v2334_v21, -inf  ;;  %v3730_v43 = vld [vmem:[%s6019_s7 + $0x38] sm:$0xff] }
 0xbc1   :  { %v2335_v3 = vadd.f32 %v2331_v39, %v5456_v48  ;;  %v1991_v48 = vmul.f32 %v5689_v62, %v5460_v54  ;;  %v1993_v62 = vmul.f32 %v5705_v9, %v5460_v54 }
 0xbc3   :  { %v2345_v1 = vsel %vm891_vm4, %v2335_v3, -inf  ;;  %v4482_v56 = vpack.i.bf16 %v1991_v48, %v1990_v6  ;;  %v4472_v13 = vpack.i.bf16 %v1993_v62, %v1992_v12 }
 0xbc4   :  { %2346 = vmax.xlane.f32.xlu0 %v2345_v1 }
 0xbc8   :  { %2343 = vmax.xlane.f32.xlu0 %v2342_v5 }
 0xbc9   :  { %4478 = vrot.lane.b32.xlu1 %v4477_v30, %s4932_s8 }
 0xbcd   :  { %4483 = vrot.lane.b32.xlu1 %v4482_v56, %s4932_s8 }
 0xbd1   :  { %4488 = vrot.lane.b32.xlu1 %v4487_v28, %s4932_s8 }
 0xbde   :  { %4473 = vrot.lane.b32.xlu0 %v4472_v13, %s4932_s8 }
 0xc44   :  { %v2341_v14 = vpop.xlane.xlu0 %2340 }
 0xc45   :  { %v2338_v15 = vpop.xlane.xlu1 %2337  ;;  %v2349_v17 = vsub.f32 %v2333_v29, %v2341_v14 }
 0xc46   :  { %v2348_v18 = vsub.f32 %v2332_v33, %v2338_v15 }
 0xc47   :  { %v2354_v19 = vmul.f32 1.442695, %v2349_v17  ;;  %v3731_v17 = vld [vmem:[#allocation11 + $0x1] ss:$0 sm:$0xff] }
 0xc48   :  { %v2352_v45 = vmul.f32 1.442695, %v2348_v18 }
 0xc49   :  { %v4479_v7 = vpop.permute.xlu1 %4478 }
 0xc4a   :  { %4540 = vpow2.f32 %v2352_v45  ;;  %v4481_v46 = vunpack.i.h.bf16 %v4479_v7  ;;  %v4480_v34 = vunpack.i.l.bf16 %v4479_v7 }
 0xc4b   :  { %4542 = vpow2.f32 %v2354_v19 }
 0xc4c   :  { %v4316_v35 = vpack.c.bf16 %v4481_v46, %v4480_v34 }
 0xc4d   :  { %v4484_v36 = vpop.permute.xlu1 %4483 }
 0xc4e   :  { %4317 = vmatpush3.bf16.msra.mxu0 %v4316_v35  ;;  %v4486_v54 = vunpack.i.h.bf16 %v4484_v36  ;;  %v4485_v55 = vunpack.i.l.bf16 %v4484_v36 }
 0xc4f   :  { %4318 = vmatprep.subr.bf16.mxu0 %v4928_v20 }
 0xc50   :  { %v4319_v8 = vpack.c.bf16 %v4486_v54, %v4485_v55 }
 0xc51   :  { %v2347_v9 = vpop.xlane.xlu0 %2346  ;;  %v4489_v37 = vpop.permute.xlu1 %4488 }
 0xc52   :  { %v2351_v25 = vsub.f32 %v2335_v3, %v2347_v9  ;;  %v4491_v61 = vunpack.i.h.bf16 %v4489_v37  ;;  %v4490_v24 = vunpack.i.l.bf16 %v4489_v37 }
 0xc54   :  { %v4541_v27 = vpop.eup %4540  ;;  %v2358_v41 = vmul.f32 1.442695, %v2351_v25  ;;  %v4325_v60 = vpack.c.bf16 %v4491_v61, %v4490_v24 }
 0xc55   :  { %4095 = vmatmul.mubr.msk.f32.vlgmr.msra.gmra.mrb[26].mxu0 %vm891_vm4, %v4541_v27  ;;  %v2344_v42 = vpop.xlane.xlu0 %2343  ;;  %v4543_v49 = vpop.eup %4542 }
 0xc56   :  { %4544 = vpow2.f32 %v2358_v41  ;;  %4320 = vmatpush3.bf16.msra.mxu0 %v4319_v8  ;;  %v2350_v47 = vsub.f32 %v2334_v21, %v2344_v42  ;;  %4101 = vmatprep.mubr.msk.f32.mxu0 %vm4929_vm1, %v4930_v38 }
 0xc57   :  { %4324 = vmatprep.subr.bf16.mxu0 %v4928_v20 }
 0xc58   :  { %v2356_v0 = vmul.f32 1.442695, %v2350_v47 }
 0xc59   :  { %4102 = vmatmul.mubr.msk.f32.vlgmr.msra.gmra.mrb[28].mxu0 %vm891_vm4, %v4543_v49  ;;  %v4474_v4 = vpop.permute.xlu0 %4473 }
 0xc5a   :  { %4546 = vpow2.f32 %v2356_v0  ;;  %4326 = vmatpush3.bf16.msra.mxu0 %v4325_v60  ;;  %v4476_v2 = vunpack.i.h.bf16 %v4474_v4  ;;  %v4475_v52 = vunpack.i.l.bf16 %v4474_v4  ;;  %4115 = vmatprep.mubr.msk.f32.mxu0 %vm4929_vm1, %v4930_v38  ;;  %v3738_v60 = vld [vmem:[%s6023_s11 + $0x20] sm:$0xff]  ;;  %v3740_v0 = vld [vmem:[%s6023_s11 + $0x30] sm:$0xff] }
 0xc5b   :  { %4332 = vmatprep.subr.bf16.mxu0 %v4331_v31 }
 0xc5c   :  { %v4322_v29 = vpack.c.bf16 %v4476_v2, %v4475_v52  ;;  %v3741_v2 = vld [vmem:[%s6023_s11 + $0x38] sm:$0xff] }
 0xc5d   :  { %v4343_v52 = vpack.c.bf16 %v3741_v2, %v3740_v0  ;;  %v3751_v0 = vld [vmem:[%s6025_s13 + $0x60] sm:$0xff] }
 0xc5e   :  { %4323 = vmatpush3.bf16.msra.mxu1 %v4322_v29 }
 0xc5f   :  { %4328 = vmatprep.subr.bf16.mxu1 %v5501_v57 }
 0xc60   :  { %v4545_v33 = vpop.eup %4544 }
 0xc61   :  { %4116 = vmatmul.mubr.msk.f32.vlgmr.msra.gmra.mrb[30].mxu0 %vm891_vm4, %v4545_v33 }
 0xc62   :  { %4334 = vmatpush3.bf16.msra.mxu0 %v4331_v31 }
 0xc64   :  { %v4547_v53 = vpop.eup %4546 }
 0xc65   :  { %4109 = vmatmul.mubr.msk.f32.vlgmr.msra.gmra.mrb[22].mxu1 %vm891_vm4, %v4547_v53 }
 0xc66   :  { %4330 = vmatpush3.bf16.msra.mxu1 %v5501_v57  ;;  %4122 = vmatprep.mubr.msk.f32.mxu1 %vm891_vm4, %v4541_v27  ;;  %v3729_v57 = vld [vmem:[%s6019_s7 + $0x30] sm:$0xff] }
 0xc67   :  { %v4335_v44 = vpack.c.bf16 %v3730_v43, %v3729_v57 }
 0xc69   :  { %4123 = vmatmul.mubr.msk.f32.vlgmr.msra.gmra.mrb[24].mxu1 %vm891_vm4, %v4543_v49  ;;  %4336 = vmatprep.subr.bf16.mxu0 %v4335_v44 }
 0xc6a   :  { %4125 = vmatprep.mubr.msk.f32.mxu1 %vm891_vm4, %v4547_v53  ;;  %4338 = vmatpush3.bf16.msra.mxu0 %v4335_v44 }
 0xc6d   :  { %4126 = vmatmul.mubr.msk.f32.gmra.mrb[26].mxu1 %vm891_vm4, %v4545_v33 }
 0xd28   :  { %v2437_v39 = vpop.f32.mrb[26].mxu0 }
 0xd29   :  { %v4096_v63 = vpop.f32.mrb[27].mxu0 }
 0xd2c   :  { %v2518_v3 = vpop.f32.mrb[28].mxu0 }
 0xd2d   :  { %v4103_v1 = vpop.f32.mrb[29].mxu0 }
 0xd34   :  { %v2680_v21 = vpop.f32.mrb[30].mxu0 }
 0xd35   :  { %v4117_v26 = vpop.f32.mrb[31].mxu0 }
 0xd38   :  { %v2599_v11 = vpop.f32.mrb[22].mxu1 }
 0xd39   :  { %v4110_v5 = vpop.f32.mrb[23].mxu1 }
 0xd3c   :  { %v4124_v30 = vpop.f32.mrb[24].mxu1 }
 0xd3d   :  { %4548 = vrcp.f32 %v4124_v30  ;;  %v2750_v6 = vpop.f32.mrb[25].mxu1 }
 0xd3e   :  { %4550 = vrcp.f32 %v2750_v6 }
 0xd40   :  { %v4127_v48 = vpop.f32.mrb[26].mxu1 }
 0xd41   :  { %4552 = vrcp.f32 %v4127_v48  ;;  %v2760_v56 = vpop.f32.mrb[27].mxu1 }
 0xd42   :  { %4554 = vrcp.f32 %v2760_v56 }
 0xd47   :  { %v4549_v10 = vpop.eup %4548 }
 0xd48   :  { %v4551_v40 = vpop.eup %4550  ;;  %v2774_v28 = vmul.f32 %v4549_v10, %v2518_v3 }
 0xd49   :  { %v2773_v12 = vmul.f32 %v4551_v40, %v2437_v39 }
 0xd4b   :  { %v4553_v62 = vpop.eup %4552  ;;  %4136 = vmatprep.mubr.msk.f32.mxu0 %vm315_vm0, %v2773_v12 }
 0xd4c   :  { %v4555_v13 = vpop.eup %4554  ;;  %4137 = vmatmul.mubr.msk.f32.vlgmr.msra.gmra.mrb[32].mxu0 %vm315_vm0, %v2774_v28  ;;  %v2776_v14 = vmul.f32 %v4553_v62, %v2680_v21 }
 0xd4d   :  { %v2775_v15 = vmul.f32 %v4555_v13, %v2599_v11 }
 0xd4f   :  { %4139 = vmatprep.mubr.msk.f32.mxu0 %vm315_vm0, %v2775_v15 }
 0xd50   :  { %4140 = vmatmul.mubr.msk.f32.gmra.mrb[34].mxu0 %vm315_vm0, %v2776_v14 }
 0xe1f   :  { %v4138_v18 = vpop.f32.mrb[32].mxu0 }
 0xe20   :  { %v2874_v45 = vadd.f32 %v4138_v18, %v3731_v17  ;;  %v2868_v7 = vpop.f32.mrb[33].mxu0 }
 0xe21   :  { %v2869_v19 = vadd.f32 %v3731_v17, %v2868_v7  ;;  %v3736_v7 = vld [vmem:[#allocation13 + $0x1] ss:$0 sm:$0xff] }
 0xe22   :  { %v5806_v46 = vadd.f32 %v2874_v45, %v5672_v51 }
 0xe23   :  { %v5809_v34 = vadd.f32 %v2869_v19, %v5669_v50  ;;  %v4141_v35 = vpop.f32.mrb[34].mxu0 }
 0xe24   :  { %v2884_v36 = vadd.f32 %v4141_v35, %v3731_v17  ;;  %v2878_v54 = vpop.f32.mrb[35].mxu0  ;;  %v2898_v55 = vsel %vm315_vm0, %v5806_v46, 0.0  ;;  %v2912_v37 = vmul.f32 %v5806_v46, %v5806_v46 }
 0xe25   :  { %2899 = vadd.xlane.f32.xlu1 %v2898_v55  ;;  %v2895_v9 = vsel %vm315_vm0, %v5809_v34, 0.0  ;;  %v2879_v27 = vadd.f32 %v3731_v17, %v2878_v54  ;;  %v2911_v41 = vmul.f32 %v5809_v34, %v5809_v34  ;;  %v3737_v55 = vld [vmem:[#allocation14 + $0x1] ss:$0 sm:$0xff] }
 0xe26   :  { %v5818_v25 = vadd.f32 %v2884_v36, %v5681_v23  ;;  %2896 = vadd.xlane.f32.xlu0 %v2895_v9  ;;  %v2918_v8 = vsel %vm315_vm0, %v2912_v37, 0.0 }
 0xe27   :  { %v5829_v23 = vadd.f32 %v2879_v27, %v5679_v22  ;;  %v2915_v24 = vsel %vm315_vm0, %v2911_v41, 0.0  ;;  %v3739_v22 = vld [vmem:[%s6023_s11 + $0x28] sm:$0xff] }
 0xe28   :  { %v2904_v50 = vsel %vm315_vm0, %v5818_v25, 0.0  ;;  %v2914_v51 = vmul.f32 %v5818_v25, %v5818_v25  ;;  %v4339_v4 = vpack.c.bf16 %v3739_v22, %v3738_v60  ;;  %v3750_v60 = vld [vmem:[%s6025_s13 + $0x58] sm:$0xff] }
 0xe29   :  { %2905 = vadd.xlane.f32.xlu1 %v2904_v50  ;;  %v2901_v42 = vsel %vm315_vm0, %v5829_v23, 0.0  ;;  %v2913_v47 = vmul.f32 %v5829_v23, %v5829_v23 }
 0xe2a   :  { %2919 = vadd.xlane.f32.xlu0 %v2918_v8  ;;  %v2924_v61 = vsel %vm315_vm0, %v2914_v51, 0.0  ;;  %4340 = vmatprep.subr.bf16.mxu1 %v4339_v4 }
 0xe2b   :  { %v2921_v49 = vsel %vm315_vm0, %v2913_v47, 0.0  ;;  %4342 = vmatpush3.bf16.msra.mxu1 %v4339_v4  ;;  %v3752_v4 = vld [vmem:[%s6025_s13 + $0x68] sm:$0xff] }
 0xe2c   :  { %4344 = vmatprep.subr.bf16.mxu1 %v4343_v52  ;;  %v4355_v2 = vpack.c.bf16 %v3752_v4, %v3751_v0 }
 0xe2d   :  { %2925 = vadd.xlane.f32.xlu1 %v2924_v61 }
 0xe2e   :  { %2916 = vadd.xlane.f32.xlu0 %v2915_v24 }
 0xe2f   :  { %4346 = vmatpush3.bf16.msra.mxu1 %v4343_v52  ;;  %v3753_v52 = vld [vmem:[%s6025_s13 + $0x70] sm:$0xff] }
 0xe30   :  { %4363 = vmatprep.subr.bf16.mxu1 %v4928_v20 }
 0xe32   :  { %2902 = vadd.xlane.f32.xlu0 %v2901_v42  ;;  %v3748_v42 = vld [vmem:[%s6025_s13 + $0x48] sm:$0xff] }
 0xe36   :  { %2922 = vadd.xlane.f32.xlu0 %v2921_v49  ;;  %v3749_v49 = vld [vmem:[%s6025_s13 + $0x50] sm:$0xff] }
 0xe37   :  { %v4351_v22 = vpack.c.bf16 %v3750_v60, %v3749_v49  ;;  %v3755_v49 = vld [vmem:[#allocation17 + $0x1] ss:$0 sm:$0xff] }
 0xeb2   :  { %v2900_v29 = vpop.xlane.xlu1 %2899 }
 0xeb3   :  { %v2897_v33 = vpop.xlane.xlu0 %2896  ;;  %v2908_v53 = vmul.f32 0.03125, %v2900_v29  ;;  %v3754_v29 = vld [vmem:[%s6025_s13 + $0x78] sm:$0xff] }
 0xeb4   :  { %v2907_v43 = vmul.f32 0.03125, %v2897_v33  ;;  %v4359_v33 = vpack.c.bf16 %v3754_v29, %v3753_v52 }
 0xeb5   :  { %v2932_v57 = vmul.f32 %v2908_v53, %v2908_v53  ;;  %v2940_v15 = vsub.f32 %v5806_v46, %v2908_v53  ;;  %v3742_v53 = vld [vmem:[#allocation16 + $0x1] ss:$0 sm:$0xff] }
 0xeb6   :  { %v2906_v58 = vpop.xlane.xlu1 %2905  ;;  %v2931_v26 = vmul.f32 %v2907_v43, %v2907_v43  ;;  %v2939_v45 = vsub.f32 %v5809_v34, %v2907_v43 }
 0xeb7   :  { %v2910_v59 = vmul.f32 0.03125, %v2906_v58  ;;  %v2920_v31 = vpop.xlane.xlu0 %2919 }
 0xeb8   :  { %v2928_v44 = vmul.f32 0.03125, %v2920_v31 }
 0xeb9   :  { %v2934_v3 = vmul.f32 %v2910_v59, %v2910_v59  ;;  %v2942_v37 = vsub.f32 %v5818_v25, %v2910_v59 }
 0xeba   :  { %v2936_v39 = vsub.f32 %v2928_v44, %v2932_v57  ;;  %v2926_v63 = vpop.xlane.xlu1 %2925 }
 0xebb   :  { %v2930_v1 = vmul.f32 0.03125, %v2926_v63  ;;  %v2917_v21 = vpop.xlane.xlu0 %2916 }
 0xebc   :  { %v2944_v11 = vadd.f32 1e-12, %v2936_v39  ;;  %v2927_v5 = vmul.f32 0.03125, %v2917_v21 }
 0xebd   :  { %v2938_v30 = vsub.f32 %v2930_v1, %v2934_v3 }
 0xebe   :  { %4556 = vrsqrt.f32 %v2944_v11  ;;  %v2935_v6 = vsub.f32 %v2927_v5, %v2931_v26 }
 0xebf   :  { %v2903_v48 = vpop.xlane.xlu0 %2902  ;;  %v2946_v40 = vadd.f32 1e-12, %v2938_v30 }
 0xec0   :  { %v2943_v56 = vadd.f32 1e-12, %v2935_v6  ;;  %v2909_v10 = vmul.f32 0.03125, %v2903_v48 }
 0xec2   :  { %4558 = vrsqrt.f32 %v2943_v56  ;;  %v2933_v12 = vmul.f32 %v2909_v10, %v2909_v10  ;;  %v2941_v46 = vsub.f32 %v5829_v23, %v2909_v10  ;;  %v3747_v23 = vld [vmem:[%s6025_s13 + $0x40] sm:$0xff]  ;;  %s3637_s13 = sshll.u32 %s4933_s26, 4  ;;  %s3638_s13 = int_to_ptr.vmem [resolvable:$true] %s3637_s13 }
 0xec3   :  { %v2923_v28 = vpop.xlane.xlu0 %2922  ;;  %4560 = vrsqrt.f32 %v2946_v40  ;;  %v4347_v47 = vpack.c.bf16 %v3748_v42, %v3747_v23  ;;  %p4876_p7 = scmp.lt.s32.totalorder %s3638_s13, %s3638_s13 }
 0xec4   :  { %v2929_v62 = vmul.f32 0.03125, %v2923_v28 }
 0xec5   :  { %4348 = vmatprep.subr.bf16.mxu0 %v4347_v47 }
 0xec6   :  { %v2937_v13 = vsub.f32 %v2929_v62, %v2933_v12  ;;  %4350 = vmatpush3.bf16.msra.mxu0 %v4347_v47 }
 0xec7   :  { %4352 = vmatprep.subr.bf16.mxu0 %v4351_v22 }
 0xec8   :  { %v4557_v14 = vpop.eup %4556  ;;  %v2945_v17 = vadd.f32 1e-12, %v2937_v13 }
 0xec9   :  { %v2952_v18 = vmul.f32 %v4557_v14, %v2940_v15 }
 0xeca   :  { %4562 = vrsqrt.f32 %v2945_v17  ;;  %4354 = vmatpush3.bf16.msra.mxu0 %v4351_v22 }
 0xecb   :  { %v2962_v36 = vmul.f32 %v3736_v7, %v2952_v18  ;;  %4356 = vmatprep.subr.bf16.mxu0 %v4355_v2 }
 0xecc   :  { %v4559_v19 = vpop.eup %4558 }
 0xecd   :  { %v2951_v35 = vmul.f32 %v4559_v19, %v2939_v45  ;;  %v4561_v54 = vpop.eup %4560  ;;  %v5855_v51 = vadd.f32 %v3737_v55, %v2962_v36 }
 0xece   :  { %v2954_v27 = vmul.f32 %v4561_v54, %v2942_v37  ;;  %4358 = vmatpush3.bf16.msra.mxu0 %v4355_v2 }
 0xecf   :  { %v2961_v9 = vmul.f32 %v3736_v7, %v2951_v35  ;;  %4360 = vmatprep.subr.bf16.mxu0 %v4359_v33 }
 0xed0   :  { %v2964_v41 = vmul.f32 %v3736_v7, %v2954_v27 }
 0xed1   :  { %v5853_v50 = vadd.f32 %v3737_v55, %v2961_v9 }
 0xed2   :  { %v5864_v25 = vadd.f32 %v3737_v55, %v2964_v41  ;;  %4362 = vmatpush3.bf16.msra.mxu0 %v4359_v33 }
 0xed3   :  { %4150 = vmatprep.mubr.msk.f32.mxu1 %vm315_vm0, %v5853_v50  ;;  %4381 = vmatprep.subr.bf16.mxu0 %v4928_v20 }
 0xed4   :  { %v4563_v34 = vpop.eup %4562  ;;  %4151 = vmatmul.mubr.msk.f32.vlgmr.msra.gmra.mrb[28].mxu1 %vm315_vm0, %v5855_v51 }
 0xed5   :  { %v2953_v8 = vmul.f32 %v4563_v34, %v2941_v46 }
 0xed7   :  { %v2963_v61 = vmul.f32 %v3736_v7, %v2953_v8 }
 0xed9   :  { %v5862_v24 = vadd.f32 %v3737_v55, %v2963_v61 }
 0xedb   :  { %4153 = vmatprep.mubr.msk.f32.mxu1 %vm315_vm0, %v5862_v24 }
 0xedc   :  { %4154 = vmatmul.mubr.msk.f32.gmra.mrb[30].mxu1 %vm315_vm0, %v5864_v25 }
 0xedd   :  { %4186 = vmatprep.mubr.msk.f32.mxu1 %vm4929_vm1, %v4930_v38 }
 0xfa7   :  { %v4152_v58 = vpop.f32.mrb[28].mxu1 }
 0xfa8   :  { %v3072_v59 = vadd.f32 %v4152_v58, %v3742_v53  ;;  %v3066_v31 = vpop.f32.mrb[29].mxu1 }
 0xfa9   :  { %v3067_v57 = vadd.f32 %v3742_v53, %v3066_v31 }
 0xfaa   :  { %v3086_v43 = vmul.f32 %v3072_v59, %v3072_v59 }
 0xfab   :  { %v3085_v44 = vmul.f32 %v3067_v57, %v3067_v57 }
 0xfac   :  { %v3090_v39 = vmul.f32 %v3086_v43, %v3072_v59 }
 0xfad   :  { %v3089_v63 = vmul.f32 %v3085_v44, %v3067_v57 }
 0xfae   :  { %v3094_v3 = vmul.f32 0.044715, %v3090_v39 }
 0xfaf   :  { %v3093_v1 = vmul.f32 0.044715, %v3089_v63  ;;  %v4155_v21 = vpop.f32.mrb[30].mxu1 }
 0xfb0   :  { %v3098_v26 = vadd.f32 %v3094_v3, %v3072_v59  ;;  %v3082_v11 = vadd.f32 %v4155_v21, %v3742_v53  ;;  %v3076_v5 = vpop.f32.mrb[31].mxu1 }
 0xfb1   :  { %v3097_v30 = vadd.f32 %v3093_v1, %v3067_v57  ;;  %v3077_v6 = vadd.f32 %v3742_v53, %v3076_v5  ;;  %v4584_v1 = vld [vmem:[#allocation2] sm:$0xf] }
 0xfb2   :  { %v3102_v48 = vmul.f32 0.7978846, %v3098_v26  ;;  %v3088_v56 = vmul.f32 %v3082_v11, %v3082_v11  ;;  %v3443_v21 = vsel %vm3442_vm6, %v4584_v1, 0.0  ;;  %v3421_v26 = vsub.s32 1, %v5343_v16  ;;  %v3326_v16 = vld [vmem:[%s6029_s17 + $0x18] sm:$0xff] }
 0xfb3   :  { %v3101_v10 = vmul.f32 0.7978846, %v3097_v30  ;;  %v3087_v40 = vmul.f32 %v3077_v6, %v3077_v6  ;;  %v3415_v5 = vrot.slane %v4584_v1, %v5363_v32  ;;  %v3323_v30 = vld [vmem:[%s6029_s17] sm:$0xff] }
 0xfb4   :  { %4564 = vtanh.f32 %v3102_v48  ;;  %v3092_v28 = vmul.f32 %v3088_v56, %v3082_v11  ;;  %v3325_v56 = vld [vmem:[%s6029_s17 + $0x10] sm:$0xff] }
 0xfb5   :  { %4566 = vtanh.f32 %v3101_v10  ;;  %v3091_v12 = vmul.f32 %v3087_v40, %v3077_v6  ;;  %v4367_v32 = vpack.c.bf16 %v3326_v16, %v3325_v56 }
 0xfb6   :  { %v3096_v62 = vmul.f32 0.044715, %v3092_v28 }
 0xfb7   :  { %v3095_v13 = vmul.f32 0.044715, %v3091_v12 }
 0xfb8   :  { %v3100_v14 = vadd.f32 %v3096_v62, %v3082_v11 }
 0xfb9   :  { %v3099_v15 = vadd.f32 %v3095_v13, %v3077_v6 }
 0xfba   :  { %v3104_v17 = vmul.f32 0.7978846, %v3100_v14 }
 0xfbb   :  { %v3103_v18 = vmul.f32 0.7978846, %v3099_v15 }
 0xfbc   :  { %4568 = vtanh.f32 %v3104_v17 }
 0xfbd   :  { %4570 = vtanh.f32 %v3103_v18 }
 0xfbe   :  { %v4565_v45 = vpop.eup %4564 }
 0xfbf   :  { %v4567_v7 = vpop.eup %4566  ;;  %v3110_v19 = vadd.f32 1.0, %v4565_v45 }
 0xfc0   :  { %v3109_v35 = vadd.f32 1.0, %v4567_v7 }
 0xfc1   :  { %v3114_v36 = vmul.f32 0.5, %v3110_v19 }
 0xfc2   :  { %v3113_v54 = vmul.f32 0.5, %v3109_v35 }
 0xfc3   :  { %v3118_v9 = vmul.f32 %v3114_v36, %v3072_v59 }
 0xfc4   :  { %v3117_v55 = vmul.f32 %v3113_v54, %v3067_v57 }
 0xfc6   :  { %v4569_v37 = vpop.eup %4568  ;;  %4172 = vmatprep.mubr.msk.f32.mxu0 %vm1686_vm5, %v3117_v55 }
 0xfc7   :  { %v4571_v27 = vpop.eup %4570  ;;  %4173 = vmatmul.mubr.msk.f32.vlgmr.msra.gmra.mrb[36].mxu0 %vm1686_vm5, %v3118_v9  ;;  %v3112_v46 = vadd.f32 1.0, %v4569_v37 }
 0xfc8   :  { %v3111_v34 = vadd.f32 1.0, %v4571_v27 }
 0xfc9   :  { %v3116_v8 = vmul.f32 0.5, %v3112_v46 }
 0xfca   :  { %v3115_v41 = vmul.f32 0.5, %v3111_v34 }
 0xfcb   :  { %v3120_v23 = vmul.f32 %v3116_v8, %v3082_v11  ;;  %v3422_v11 = vrot.slane %v4584_v1, %v3421_v26 }
 0xfcc   :  { %v3119_v61 = vmul.f32 %v3115_v41, %v3077_v6  ;;  %v3324_v6 = vld [vmem:[%s6029_s17 + $0x8] sm:$0xff] }
 0xfcd   :  { %v4364_v48 = vpack.c.bf16 %v3324_v6, %v3323_v30 }
 0xfce   :  { %4175 = vmatprep.mubr.msk.f32.mxu0 %vm1686_vm5, %v3119_v61 }
 0xfcf   :  { %4176 = vmatmul.mubr.msk.f32.gmra.mrb[38].mxu0 %vm1686_vm5, %v3120_v23  ;;  %4365 = vmatpush3.bf16.msra.mxu1 %v4364_v48 }
 0xfd0   :  { %4216 = vmatprep.mubr.msk.f32.mxu0 %vm4929_vm1, %v4930_v38  ;;  %4366 = vmatprep.subr.bf16.mxu1 %v4928_v20 }
 0xfd3   :  { %4368 = vmatpush3.bf16.msra.mxu1 %v4367_v32 }
 0xfd4   :  { %4369 = vmatprep.subr.bf16.mxu1 %v4928_v20 }
0x109a   :  { %v4174_v42 = vpop.f32.mrb[36].mxu0 }
0x109b   :  { %v3216_v47 = vpop.f32.mrb[37].mxu0  ;;  %v3222_v29 = vadd.f32 %v4174_v42, %v3755_v49 }
0x109c   :  { %v3217_v58 = vadd.f32 %v3755_v49, %v3216_v47 }
0x109e   :  { %v5922_v57 = vadd.f32 %v3217_v58, %v5853_v50 }
0x10a0   :  { %v3259_v63 = vmul.f32 %v5922_v57, %v5922_v57 }
0x10a2   :  { %v4177_v60 = vpop.f32.mrb[38].mxu0  ;;  %v3263_v3 = vsel %vm315_vm0, %v3259_v63, 0.0 }
0x10a3   :  { %v3232_v22 = vadd.f32 %v4177_v60, %v3755_v49  ;;  %v3226_v0 = vpop.f32.mrb[39].mxu0 }
0x10a4   :  { %v3227_v4 = vadd.f32 %v3755_v49, %v3226_v0  ;;  %v3760_v0 = vld [vmem:[#allocation19 + $0x1] ss:$0 sm:$0xff] }
0x10a5   :  { %v5904_v2 = vadd.f32 %v3232_v22, %v5864_v25  ;;  %v5918_v25 = vadd.f32 %v3222_v29, %v5855_v51  ;;  %v3243_v51 = vsel %vm315_vm0, %v5922_v57, 0.0 }
0x10a6   :  { %v5907_v52 = vadd.f32 %v3227_v4, %v5862_v24 }
0x10a7   :  { %v3252_v33 = vsel %vm315_vm0, %v5904_v2, 0.0  ;;  %v3262_v53 = vmul.f32 %v5904_v2, %v5904_v2  ;;  %v3246_v44 = vsel %vm315_vm0, %v5918_v25, 0.0  ;;  %v3260_v39 = vmul.f32 %v5918_v25, %v5918_v25 }
0x10a8   :  { %3253 = vadd.xlane.f32.xlu0 %v3252_v33  ;;  %v3249_v59 = vsel %vm315_vm0, %v5907_v52, 0.0  ;;  %v3261_v31 = vmul.f32 %v5907_v52, %v5907_v52 }
0x10a9   :  { %3250 = vadd.xlane.f32.xlu1 %v3249_v59  ;;  %v3272_v24 = vsel %vm315_vm0, %v3262_v53, 0.0  ;;  %v3266_v50 = vsel %vm315_vm0, %v3260_v39, 0.0  ;;  %v3761_v53 = vld [vmem:[#allocation20 + $0x1] ss:$0 sm:$0xff] }
0x10aa   :  { %v3269_v43 = vsel %vm315_vm0, %v3261_v31, 0.0 }
0x10ac   :  { %3273 = vadd.xlane.f32.xlu0 %v3272_v24 }
0x10ad   :  { %3270 = vadd.xlane.f32.xlu1 %v3269_v43 }
0x10b0   :  { %3247 = vadd.xlane.f32.xlu0 %v3246_v44 }
0x10b1   :  { %3244 = vadd.xlane.f32.xlu1 %v3243_v51 }
0x10b4   :  { %3267 = vadd.xlane.f32.xlu0 %v3266_v50 }
0x10b5   :  { %3264 = vadd.xlane.f32.xlu1 %v3263_v3 }
0x10b8   :  { %3444 = vadd.xlane.f32.xlu0 %v3443_v21 }
0x10c6   :  { %3424 = vbcast.lane.b32.xlu1 %v3422_v11, 256 }
0x10ce   :  { %3417 = vbcast.lane.b32.xlu0 %v3415_v5, 256 }
0x1135   :  { %v3254_v10 = vpop.xlane.xlu0 %3253 }
0x1136   :  { %v3258_v40 = vmul.f32 0.03125, %v3254_v10  ;;  %v3251_v28 = vpop.xlane.xlu1 %3250 }
0x1137   :  { %v3257_v12 = vmul.f32 0.03125, %v3251_v28 }
0x1138   :  { %v3282_v13 = vmul.f32 %v3258_v40, %v3258_v40  ;;  %v3290_v49 = vsub.f32 %v5904_v2, %v3258_v40 }
0x1139   :  { %v3274_v62 = vpop.xlane.xlu0 %3273  ;;  %v3281_v17 = vmul.f32 %v3257_v12, %v3257_v12  ;;  %v3289_v22 = vsub.f32 %v5907_v52, %v3257_v12 }
0x113a   :  { %v3278_v14 = vmul.f32 0.03125, %v3274_v62  ;;  %v3271_v15 = vpop.xlane.xlu1 %3270 }
0x113b   :  { %v3277_v18 = vmul.f32 0.03125, %v3271_v15 }
0x113c   :  { %v3286_v45 = vsub.f32 %v3278_v14, %v3282_v13 }
0x113d   :  { %v3285_v7 = vsub.f32 %v3277_v18, %v3281_v17  ;;  %v3248_v19 = vpop.xlane.xlu0 %3247 }
0x113e   :  { %v3294_v35 = vadd.f32 1e-12, %v3286_v45  ;;  %v3256_v36 = vmul.f32 0.03125, %v3248_v19  ;;  %v3245_v54 = vpop.xlane.xlu1 %3244 }
0x113f   :  { %v3293_v55 = vadd.f32 1e-12, %v3285_v7  ;;  %v3255_v9 = vmul.f32 0.03125, %v3245_v54  ;;  %v3465_v54 = vld [vmem:[%s6031_s19] sm:$0xff] }
0x1140   :  { %4572 = vrsqrt.f32 %v3294_v35  ;;  %v3280_v27 = vmul.f32 %v3256_v36, %v3256_v36  ;;  %v3288_v43 = vsub.f32 %v5918_v25, %v3256_v36 }
0x1141   :  { %4574 = vrsqrt.f32 %v3293_v55  ;;  %v3268_v37 = vpop.xlane.xlu0 %3267  ;;  %v3279_v8 = vmul.f32 %v3255_v9, %v3255_v9  ;;  %v3287_v2 = vsub.f32 %v5922_v57, %v3255_v9  ;;  %v3466_v55 = vld [vmem:[%s6031_s19 + $0x8] sm:$0xff]  ;;  %v3467_v9 = vld [vmem:[%s6031_s19 + $0x10] sm:$0xff] }
0x1142   :  { %v3276_v46 = vmul.f32 0.03125, %v3268_v37  ;;  %v3265_v34 = vpop.xlane.xlu1 %3264  ;;  %v4370_v37 = vpack.c.bf16 %v3466_v55, %v3465_v54 }
0x1143   :  { %v3275_v41 = vmul.f32 0.03125, %v3265_v34  ;;  %v3469_v34 = vld [vmem:[%s6031_s19 + $0x20] sm:$0xff] }
0x1144   :  { %v3284_v61 = vsub.f32 %v3276_v46, %v3280_v27  ;;  %v3468_v27 = vld [vmem:[%s6031_s19 + $0x18] sm:$0xff] }
0x1145   :  { %v3283_v23 = vsub.f32 %v3275_v41, %v3279_v8  ;;  %v3445_v39 = vpop.xlane.xlu0 %3444  ;;  %v4373_v46 = vpack.c.bf16 %v3468_v27, %v3467_v9  ;;  %v3470_v8 = vld [vmem:[%s6031_s19 + $0x28] sm:$0xff] }
0x1146   :  { %v3292_v42 = vadd.f32 1e-12, %v3284_v61  ;;  %v3446_v50 = vmax.f32 %v3445_v39, 1.0  ;;  %v3425_v26 = vpop.permute.xlu1 %3424  ;;  %v4376_v41 = vpack.c.bf16 %v3470_v8, %v3469_v34  ;;  %v3471_v61 = vld [vmem:[%s6031_s19 + $0x30] sm:$0xff] }
0x1147   :  { %v3291_v47 = vadd.f32 1e-12, %v3283_v23  ;;  %v3472_v23 = vld [vmem:[%s6031_s19 + $0x38] sm:$0xff] }
0x1148   :  { %4576 = vrsqrt.f32 %v3292_v42  ;;  %v4379_v42 = vpack.c.bf16 %v3472_v23, %v3471_v61 }
0x1149   :  { %4578 = vrsqrt.f32 %v3291_v47  ;;  %v3418_v5 = vpop.permute.xlu0 %3417  ;;  %v3762_v47 = vld [vmem:[%s6030_s18] ss:$0 sm:$0xff] }
0x114a   :  { %v4573_v60 = vpop.eup %4572  ;;  %4580 = vrcp.f32 %v3446_v50 }
0x114b   :  { %v4575_v4 = vpop.eup %4574  ;;  %v3302_v29 = vmul.f32 %v4573_v60, %v3290_v49 }
0x114c   :  { %v3301_v33 = vmul.f32 %v4575_v4, %v3289_v22  ;;  %v3554_v4 = vld [vmem:[#allocation22 + $0x8] sm:$0xff] }
0x114d   :  { %v3312_v58 = vmul.f32 %v3760_v0, %v3302_v29  ;;  %v3555_v29 = vld [vmem:[#allocation22 + $0x10] sm:$0xff] }
0x114e   :  { %v3311_v59 = vmul.f32 %v3760_v0, %v3301_v33 }
0x114f   :  { %v3322_v31 = vadd.f32 %v3761_v53, %v3312_v58 }
0x1150   :  { %v3321_v24 = vadd.f32 %v3761_v53, %v3311_v59 }
0x1151   :  { %v3336_v44 = vrot.slane %v3322_v31, 7 }
0x1152   :  { %v4577_v51 = vpop.eup %4576 }
0x1153   :  { %v4579_v63 = vpop.eup %4578  ;;  %v3338_v52 = vsel %vm3337_vm7, %v3336_v44, %v3321_v24  ;;  %v3300_v3 = vmul.f32 %v4577_v51, %v3288_v43  ;;  %v3764_v44 = vld [vmem:[%s6061_s9] ss:$0 sm:$0xff] }
0x1154   :  { %4187 = vmatmul.mubr.msk.f32.vlgmr.msra.gmra.mrb[32].mxu1 %vm315_vm0, %v3338_v52  ;;  %v3299_v1 = vmul.f32 %v4579_v63, %v3287_v2  ;;  %v4581_v12 = vpop.eup %4580 }
0x1155   :  { %v3310_v21 = vmul.f32 %v3760_v0, %v3300_v3  ;;  %4205 = vmatprep.mubr.msk.f32.mxu1 %vm4929_vm1, %v4930_v38  ;;  %v3449_v15 = vrot.slane %v4581_v12, 1  ;;  %4371 = vmatpush3.bf16.msra.mxu1 %v4370_v37 }
0x1156   :  { %v3309_v11 = vmul.f32 %v3760_v0, %v3299_v1  ;;  %4372 = vmatprep.subr.bf16.mxu1 %v4928_v20  ;;  %v3553_v0 = vld [vmem:[#allocation22] sm:$0xff] }
0x1157   :  { %v3320_v25 = vadd.f32 %v3761_v53, %v3310_v21  ;;  %v4382_v33 = vpack.c.bf16 %v3554_v4, %v3553_v0 }
0x1158   :  { %v3319_v30 = vadd.f32 %v3761_v53, %v3309_v11  ;;  %v3556_v53 = vld [vmem:[#allocation22 + $0x18] sm:$0xff] }
0x1159   :  { %v3427_v6 = vmul.f32 %v3425_v26, %v3320_v25  ;;  %4374 = vmatpush3.bf16.msra.mxu1 %v4373_v46  ;;  %4383 = vmatpush3.bf16.msra.mxu0 %v4382_v33  ;;  %v4385_v58 = vpack.c.bf16 %v3556_v53, %v3555_v29 }
0x115a   :  { %v3426_v57 = vmul.f32 %v3418_v5, %v3319_v30  ;;  %4375 = vmatprep.subr.bf16.mxu1 %v4928_v20  ;;  %4384 = vmatprep.subr.bf16.mxu0 %v4928_v20 }
0x115b   :  { %v3435_v48 = vsel %vm315_vm0, %v3427_v6, 0.0 }
0x115c   :  { %v3436_v56 = vrot.slane %v3435_v48, 4  ;;  %v3428_v16 = vsel %vm315_vm0, %v3426_v57, 0.0 }
0x115d   :  { %v3429_v32 = vrot.slane %v3428_v16, 4  ;;  %4377 = vmatpush3.bf16.msra.mxu1 %v4376_v41  ;;  %4386 = vmatpush3.bf16.msra.mxu0 %v4385_v58 }
0x115e   :  { %v3437_v10 = vadd.f32 %v3436_v56, %v3435_v48  ;;  %4378 = vmatprep.subr.bf16.mxu1 %v4928_v20 }
0x115f   :  { %v3430_v40 = vadd.f32 %v3429_v32, %v3428_v16 }
0x1160   :  { %v3438_v28 = vrot.slane %v3437_v10, 2 }
0x1161   :  { %v3431_v62 = vrot.slane %v3430_v40, 2  ;;  %4380 = vmatpush3.bf16.msra.mxu1 %v4379_v42 }
0x1162   :  { %v3439_v38 = vadd.f32 %v3438_v28, %v3437_v10 }
0x1163   :  { %v3432_v13 = vadd.f32 %v3431_v62, %v3430_v40 }
0x1164   :  { %v3440_v14 = vrot.slane %v3439_v38, 1 }
0x1165   :  { %v3433_v17 = vrot.slane %v3432_v13, 1 }
0x1166   :  { %v3441_v18 = vadd.f32 %v3440_v14, %v3439_v38 }
0x1167   :  { %v3434_v45 = vadd.f32 %v3433_v17, %v3432_v13 }
0x1168   :  { %v3453_v7 = vmul.f32 %v3449_v15, %v3441_v18 }
0x1169   :  { %v3452_v19 = vmul.f32 %v4581_v12, %v3434_v45 }
0x116a   :  { %v3457_v35 = vrot.slane %v3453_v7, 7 }
0x116c   :  { %v3458_v36 = vsel %vm3337_vm7, %v3457_v35, %v3452_v19 }
0x1227   :  { %v3407_v49 = vpop.f32.mrb[32].mxu1 }
0x1228   :  { %v3408_v60 = vadd.f32 %v3762_v47, %v3407_v49  ;;  %v4188_v22 = vpop.f32.mrb[33].mxu1 }
0x122a   :  { %4582 = vtanh.f32 %v3408_v60 }
0x1234   :  { %v4583_v59 = vpop.eup %4582 }
0x1235   :  { %v3454_v31 = vmul.f32 0.2, %v4583_v59 }
0x1237   :  { %3461 = vrot.lane.b32.xlu1 %v3454_v31, %s4926_s20  ;;  %s4871_s20 = scalar_lea.vmem %s3638_s13, 32 }
0x1238   :  { %p4872_p6 = scmp.ne.s32.totalorder %s3638_s13, %s4871_s20  ;;  %p4877_p8 = scmp.lt.s32.totalorder %s4871_s20, %s4871_s20 }
0x123a   :  { %p4878_p9 = por %p4877_p8, %p4876_p7 }
0x123c   :  { %p4879_p10 = pnand %p4878_p9, %p4872_p6 }
0x12a9   :  { %v3462_v24 = vpop.permute.xlu1 %3461 }
0x12aa   :  { %v3464_v43 = vsel %vm315_vm0, %v3458_v36, %v3462_v24 }
0x12ab   :  { %4206 = vmatmul.mubr.msk.f32.vlgmr.msra.gmra.mrb[34].mxu1 %vm1686_vm5, %v3464_v43 }
0x137e   :  { %v3549_v39 = vpop.f32.mrb[34].mxu1 }
0x137f   :  { %v3550_v51 = vadd.f32 %v3764_v44, %v3549_v39  ;;  %v4207_v2 = vpop.f32.mrb[35].mxu1 }
0x1381   :  { %4217 = vmatmul.mubr.msk.f32.vlgmr.msra.gmra.mrb[40].mxu0 %vm315_vm0, %v3550_v51 }
0x1454   :  { %v3626_v20 = vpop.f32.mrb[40].mxu0 }
0x1455   :  { %3630 = vst [vmem:[#allocation23] sm:$0x3] %v3626_v20  ;;  %v4218_v63 = vpop.f32.mrb[41].mxu0 }
0x1456   :  { %4882 = shalt.err (!%p4879_p10)
}
0x1457   :  { %s6062_s7 = sld [smem:[#allocation40_spill]] }
0x145d   :  { %s4883_s23 = scalar_lea.hbm %s6062_s7, 32 }
0x145e   :  { %p4884_p11 = scmp.ne.s32.totalorder %s6062_s7, %s4883_s23  ;;  %p4887_p12 = scmp.lt.u32.totalorder %s4883_s23, %s6062_s7 }
0x1460   :  { %p4889_p13 = pnand %p4887_p12, %p4884_p11 }
0x1462   :  { %4892 = shalt.err (!%p4889_p13)
}
0x1463   :  { %3640 = dma.vmem_to_hbm [thread:$0]  %s3638_s13, 32, %s6062_s7, [#allocation4]  }
0x1464   :  { %4907 = dma.done.wait [#allocation4], 32  }
0x1465   :  { %4908 = vsyncadd [#allocation4], 4294967264 }
0x1466   :  { %3644 = vsyncpa [#allocation3], 1 }
0x1467   :  { %3645 = vsyncpa [#allocation6], 1 }
0x1468   :  { %3646 = vsyncpa [#allocation9], 1 }
0x1469   :  { %3647 = vsyncpa [#allocation12], 1 }
0x146a   :  { %3648 = vsyncpa [#allocation15], 1 }
0x146b   :  { %3649 = vsyncpa [#allocation18], 1 }
0x146c   :  { %3650 = vsyncpa [#allocation21], 1 }
0x146d   :  { %3651 = vsyncpa [#allocation4], 1 }

</bundles_post_ra>
